<compile_context>
chip_gen: v5e
topology: v5e:2x2
jax: 0.10.0
libtpu: 0.0.40
codegen_flags: <defaults>
</compile_context>

<pallas_src>
import math
from functools import partial

import jax
import jax.numpy as jnp
from jax.experimental import pallas as pl
from jax.experimental.pallas import tpu as pltpu


# ------------------------------ helpers ------------------------------

_VMEM_LIMIT = 48 * 1024 * 1024  # fits v7x's 64 MiB physical VMEM; ample headroom


def _cparams(semantics):
    return pltpu.CompilerParams(dimension_semantics=semantics,
                                vmem_limit_bytes=_VMEM_LIMIT)


def _tile(dim, cap):
    """Largest lane-aligned tile <= cap dividing dim; falls back to full dim."""
    if dim <= cap:
        return dim
    t = (cap // 128) * 128
    while t >= 128:
        if dim % t == 0:
            return t
        t -= 128
    # TODO(synk): pad M/N/K to multiples of (8,128) for dims with no nice divisor.
    return dim


def _gelu(y):
    # tanh-approx GELU (EUP tanh).  TODO(synk): exact erf GELU if bit-parity
    # with PyTorch nn.GELU (erf form) is required.
    c = math.sqrt(2.0 / math.pi)
    return 0.5 * y * (1.0 + jnp.tanh(c * (y + 0.044715 * y * y * y)))


# ------------------------------ kernels ------------------------------

def _ln_matmul_kernel(x_ref, g_ref, beta_ref, w_ref, bias_ref, *rest,
                      eps, gelu_mode):
    """LayerNorm fused into a (M,N) matmul; LN computed once per M-tile."""
    if gelu_mode == "mask":
        mask_ref, o_ref, xn_ref = rest
    else:
        o_ref, xn_ref = rest
        mask_ref = None

    # LayerNorm only on the first N-tile of each M-tile; cached in VMEM scratch.
    @pl.when(pl.program_id(1) == 0)
    def _():
        x = x_ref[...].astype(jnp.float32)
        mean = jnp.mean(x, axis=-1, keepdims=True)
        var = jnp.mean(jnp.square(x - mean), axis=-1, keepdims=True)
        xn = (x - mean) * jax.lax.rsqrt(var + eps)
        xn = xn * g_ref[...].astype(jnp.float32) + beta_ref[...].astype(jnp.float32)
        xn_ref[...] = xn.astype(jnp.bfloat16)

    y = jnp.dot(xn_ref[...], w_ref[...], preferred_element_type=jnp.float32)
    y = y + bias_ref[...].astype(jnp.float32)
    if gelu_mode == "all":
        y = _gelu(y)
    elif gelu_mode == "mask":
        y = jnp.where(mask_ref[...] > 0.5, _gelu(y), y)
    o_ref[...] = y.astype(o_ref.dtype)


def _matmul_kernel(x_ref, w_ref, b_ref, o_ref, acc_ref):
    """Tiled matmul with f32 accumulator; bias added on finalize."""
    @pl.when(pl.program_id(2) == 0)
    def _():
        acc_ref[...] = jnp.zeros_like(acc_ref)

    acc_ref[...] += jnp.dot(x_ref[...], w_ref[...],
                            preferred_element_type=jnp.float32)

    @pl.when(pl.program_id(2) == pl.num_programs(2) - 1)
    def _():
        o_ref[...] = (acc_ref[...] + b_ref[...].astype(jnp.float32)).astype(o_ref.dtype)


def _matmul_residual_kernel(x_ref, w_ref, b_ref, r1_ref, r2_ref, o_ref, acc_ref):
    """Tiled matmul; bias + two residual streams added in the epilogue."""
    @pl.when(pl.program_id(2) == 0)
    def _():
        acc_ref[...] = jnp.zeros_like(acc_ref)

    acc_ref[...] += jnp.dot(x_ref[...], w_ref[...],
                            preferred_element_type=jnp.float32)

    @pl.when(pl.program_id(2) == pl.num_programs(2) - 1)
    def _():
        y = (acc_ref[...] + b_ref[...].astype(jnp.float32)
             + r1_ref[...].astype(jnp.float32) + r2_ref[...].astype(jnp.float32))
        o_ref[...] = y.astype(o_ref.dtype)


def _attention_kernel(q_ref, k_ref, v_ref, cq_ref, sq_ref, cf_ref, sf_ref,
                      *rest, scale, collect):
    """One (batch, query-head, q-tile) step.  Single shared KV head (MQA).

    The RoPE'd, transposed K is computed once per batch (h==0, qi==0) and
    cached in a VMEM scratch, reused across heads and q-tiles.
    """
    if collect:
        o_ref, p_ref, kt_ref = rest
    else:
        o_ref, kt_ref = rest
        p_ref = None

    _, tq, d = q_ref.shape
    s = k_ref.shape[1]
    h = pl.program_id(1)
    qi = pl.program_id(2)

    @pl.when((h == 0) & (qi == 0))
    def _():
        k = k_ref[0].astype(jnp.float32)                            # (S, D)
        # rotate_half(k)*sin == roll(k, D/2)*(sign-folded sin); roll hits XLU.
        kr = k * cf_ref[...] + pltpu.roll(k, shift=d // 2, axis=1) * sf_ref[...]
        kt_ref[...] = kr.T.astype(jnp.bfloat16)                     # (D, S)

    q = q_ref[0].astype(jnp.float32)                                # (tq, D)
    qr = (q * cq_ref[...] + pltpu.roll(q, shift=d // 2, axis=1) * sq_ref[...]) * scale
    scores = jnp.dot(qr.astype(jnp.bfloat16), kt_ref[...],
                     preferred_element_type=jnp.float32)            # (tq, S)

    row0 = pl.multiple_of(qi * tq, tq)
    rows = row0 + jax.lax.broadcasted_iota(jnp.int32, (tq, s), 0)
    cols = jax.lax.broadcasted_iota(jnp.int32, (tq, s), 1)
    scores = jnp.where(cols <= rows, scores, jnp.float32(-1e30))    # causal mask

    m = jnp.max(scores, axis=-1, keepdims=True)
    e = jnp.exp(scores - m)
    denom = jnp.sum(e, axis=-1, keepdims=True)
    p = e * pl.reciprocal(denom, approx=True)

    o = jnp.dot(p.astype(jnp.bfloat16), v_ref[0], preferred_element_type=jnp.float32)
    o_ref[0] = o.astype(o_ref.dtype)
    if collect:
        p_ref[0, 0] = p.astype(p_ref.dtype)


# --------------------------- kernel wrappers ---------------------------

def ln_linear(x, g, beta, w, b, *, gelu_start=None, out_dtype=jnp.bfloat16,
              eps=1e-5):
    """LayerNorm(x) @ w + b; optional GELU on columns >= gelu_start."""
    M, K = x.shape
    _, N = w.shape
    tm, tn = _tile(M, 512), _tile(N, 512)
    grid = (M // tm, N // tn)

    if gelu_start is None:
        gelu_mode = None
    elif gelu_start == 0:
        gelu_mode = "all"
    else:
        gelu_mode = "mask"

    inputs = [x, g.reshape(1, -1), beta.reshape(1, -1), w, b.reshape(1, -1)]
    in_specs = [
        pl.BlockSpec((tm, K), lambda i, j: (i, 0)),
        pl.BlockSpec((1, K), lambda i, j: (0, 0)),
        pl.BlockSpec((1, K), lambda i, j: (0, 0)),
        pl.BlockSpec((K, tn), lambda i, j: (0, j)),
        pl.BlockSpec((1, tn), lambda i, j: (0, j)),
    ]
    if gelu_mode == "mask":
        mask = (jnp.arange(N) >= gelu_start).astype(jnp.float32).reshape(1, N)
        inputs.append(mask)
        in_specs.append(pl.BlockSpec((1, tn), lambda i, j: (0, j)))

    bytes_acc = (M * K * x.dtype.itemsize + K * N * w.dtype.itemsize
                 + M * N * jnp.dtype(out_dtype).itemsize)
    return pl.pallas_call(
        partial(_ln_matmul_kernel, eps=eps, gelu_mode=gelu_mode),
        out_shape=jax.ShapeDtypeStruct((M, N), out_dtype),
        grid=grid,
        in_specs=in_specs,
        out_specs=pl.BlockSpec((tm, tn), lambda i, j: (i, j)),
        scratch_shapes=[pltpu.VMEM((tm, K), jnp.bfloat16)],
        # j axis must stay "arbitrary": the LN scratch is initialized at j==0.
        compiler_params=_cparams(("parallel", "arbitrary")),
        cost_estimate=pl.CostEstimate(
            flops=2 * M * N * K + 8 * M * K,
            transcendentals=(M * N if gelu_mode else 0) + 2 * M,
            bytes_accessed=bytes_acc),
    )(*inputs)


def linear(x, w, b, *, out_dtype=jnp.float32):
    """Tiled, pipelined matmul: x (M,K) @ w (K,N) + b."""
    M, K = x.shape
    _, N = w.shape
    tm, tn, tk = _tile(M, 512), _tile(N, 512), _tile(K, 1024)
    grid = (M // tm, N // tn, K // tk)
    bytes_acc = (M * K * x.dtype.itemsize + K * N * w.dtype.itemsize
                 + M * N * jnp.dtype(out_dtype).itemsize)
    return pl.pallas_call(
        _matmul_kernel,
        out_shape=jax.ShapeDtypeStruct((M, N), out_dtype),
        grid=grid,
        in_specs=[
            pl.BlockSpec((tm, tk), lambda i, j, k: (i, k)),
            pl.BlockSpec((tk, tn), lambda i, j, k: (k, j)),
            pl.BlockSpec((1, tn), lambda i, j, k: (0, j)),
        ],
        out_specs=pl.BlockSpec((tm, tn), lambda i, j, k: (i, j)),
        scratch_shapes=[pltpu.VMEM((tm, tn), jnp.float32)],
        compiler_params=_cparams(("parallel", "parallel", "arbitrary")),
        cost_estimate=pl.CostEstimate(flops=2 * M * N * K, transcendentals=0,
                                      bytes_accessed=bytes_acc),
    )(x, w, b.reshape(1, -1))


def mlp_down_residual(fused, col0, w, b, r1, r2, *, out_dtype=jnp.float32):
    """(fused[:, col0:col0+K] @ w + b) + r1 + r2, reading straight from `fused`."""
    M, _ = fused.shape
    K, N = w.shape
    tm, tn = _tile(M, 512), _tile(N, 512)
    tk = _tile(K, 1024)
    while col0 % tk != 0 or K % tk != 0:   # k index map offsets by whole blocks
        tk //= 2
    koff = col0 // tk
    grid = (M // tm, N // tn, K // tk)
    bytes_acc = (M * K * fused.dtype.itemsize + K * N * w.dtype.itemsize
                 + 2 * M * N * 4 + M * N * jnp.dtype(out_dtype).itemsize)
    return pl.pallas_call(
        _matmul_residual_kernel,
        out_shape=jax.ShapeDtypeStruct((M, N), out_dtype),
        grid=grid,
        in_specs=[
            pl.BlockSpec((tm, tk), lambda i, j, k: (i, k + koff)),   # MLP-up slice
            pl.BlockSpec((tk, tn), lambda i, j, k: (k, j)),
            pl.BlockSpec((1, tn), lambda i, j, k: (0, j)),
            pl.BlockSpec((tm, tn), lambda i, j, k: (i, j)),          # residual x
            pl.BlockSpec((tm, tn), lambda i, j, k: (i, j)),          # attn_out
        ],
        out_specs=pl.BlockSpec((tm, tn), lambda i, j, k: (i, j)),
        scratch_shapes=[pltpu.VMEM((tm, tn), jnp.float32)],
        compiler_params=_cparams(("parallel", "parallel", "arbitrary")),
        cost_estimate=pl.CostEstimate(flops=2 * M * N * K, transcendentals=0,
                                      bytes_accessed=bytes_acc),
    )(fused, w, b.reshape(1, -1), r1, r2)


def mqa_attention(fused, cos, sin_signed, *, nh, d, collect, tq_cap=256):
    """Multi-query attention reading q/k/v directly from the fused activation.

    fused: (B, S, W) bf16 with columns [q0..q{nh-1}, k, v, mlp...].
    Returns (attn (B, S, nh*d) bf16, probs (B, nh, S, S) bf16 or None).
    """
    B, S, _ = fused.shape
    tq = _tile(S, tq_cap)
    scale = 1.0 / math.sqrt(d)

    out_shapes = [jax.ShapeDtypeStruct((B, S, nh * d), jnp.bfloat16)]
    out_specs = [pl.BlockSpec((1, tq, d), lambda b, h, qi: (b, qi, h))]
    if collect:
        # bf16 probs halve HBM writeback; ~1e-2 deviation vs f32 reference.
        out_shapes.append(jax.ShapeDtypeStruct((B, nh, S, S), jnp.bfloat16))
        out_specs.append(pl.BlockSpec((1, 1, tq, S), lambda b, h, qi: (b, h, qi, 0)))

    bytes_acc = (B * S * (nh + 2) * d * 2 + B * S * nh * d * 2 + S * d * 16
                 + (B * nh * S * S * 2 if collect else 0))
    outs = pl.pallas_call(
        partial(_attention_kernel, scale=scale, collect=collect),
        out_shape=tuple(out_shapes),
        grid=(B, nh, S // tq),
        in_specs=[
            pl.BlockSpec((1, tq, d), lambda b, h, qi: (b, qi, h)),        # q head h
            pl.BlockSpec((1, S, d), lambda b, h, qi: (b, 0, nh)),         # shared K
            pl.BlockSpec((1, S, d), lambda b, h, qi: (b, 0, nh + 1)),     # shared V
            pl.BlockSpec((tq, d), lambda b, h, qi: (qi, 0)),              # cos (q rows)
            pl.BlockSpec((tq, d), lambda b, h, qi: (qi, 0)),              # sin (q rows)
            pl.BlockSpec((S, d), lambda b, h, qi: (0, 0)),                # cos (full, K)
            pl.BlockSpec((S, d), lambda b, h, qi: (0, 0)),                # sin (full, K)
        ],
        out_specs=tuple(out_specs),
        scratch_shapes=[pltpu.VMEM((d, S), jnp.bfloat16)],                # cached K^T
        # h/qi must be "arbitrary": the K^T cache is filled at (h==0, qi==0).
        compiler_params=_cparams(("parallel", "arbitrary", "arbitrary")),
        cost_estimate=pl.CostEstimate(
            flops=4 * B * nh * S * S * d,
            transcendentals=B * nh * S * S,
            bytes_accessed=bytes_acc),
    )(fused, fused, fused, cos, sin_signed, cos, sin_signed)

    attn = outs[0]
    probs = outs[1] if collect else None
    return attn, probs


# ----------------------------- Falcon model -----------------------------

def rotary_tables(S, D):
    inv_freq = 1.0 / (10000.0 ** (jnp.arange(0, D, 2, dtype=jnp.float32) / D))
    t = jnp.arange(S, dtype=jnp.float32)
    freqs = jnp.outer(t, inv_freq)                        # (S, D/2)
    emb = jnp.concatenate([freqs, freqs], axis=-1)        # (S, D)
    cos = jnp.cos(emb)
    sin = jnp.sin(emb)
    # Fold the rotate-half sign into sin so kernels can use pltpu.roll:
    # rotate_half(x)*sin == roll(x, D/2)*(sign*sin), sign = [-1]*D/2 ++ [1]*D/2.
    sign = jnp.concatenate([-jnp.ones((D // 2,), jnp.float32),
                            jnp.ones((D // 2,), jnp.float32)])
    return cos, sin * sign


def falcon_block(x, p, cos, sin_signed, cfg, collect):
    B, S, H = x.shape
    NH, D = cfg["num_heads"], cfg["head_dim"]
    qkv_w = (NH + 2) * D
    x2d = x.reshape(B * S, H)

    # One LayerNorm pass + one matmul produce [QKV | MLP-up] together (the
    # parallel-Falcon block shares a single input LN).  GELU only on MLP cols.
    fused = ln_linear(x2d, p["ln_g"], p["ln_b"], p["w_fused"], p["b_fused"],
                      gelu_start=qkv_w, out_dtype=jnp.bfloat16)
    W = fused.shape[1]

    # Attention reads q/k/v straight out of `fused`; output is (B, S, NH*D) so
    # the output projection needs no transpose.
    attn, probs = mqa_attention(fused.reshape(B, S, W), cos, sin_signed,
                                nh=NH, d=D, collect=collect)
    attn_out = linear(attn.reshape(B * S, NH * D), p["wo"], p["bo"],
                      out_dtype=jnp.float32)

    # MLP-down reads its activation straight out of `fused` (column offset in
    # the index map) and fuses the parallel residual x + attn + mlp.
    out = mlp_down_residual(fused, qkv_w, p["w2"], p["b2"], x2d, attn_out,
                            out_dtype=jnp.float32)

    iv = None
    if collect:
        iv = {
            "attention_probs": probs,                        # (B, NH, S, S) bf16
            "attention_output": attn_out.reshape(B, S, H),   # (B, S, H) f32
        }
    return out.reshape(B, S, H), iv


def annotated_falcon_forward(input_ids, params, cfg, layers_to_collect=None):
    """Mirrors Annotated_Falcon.forward: returns (logits, {layer_i: int_values})."""
    # TODO(synk): token-embedding gather stays in XLA (no Pallas win for a gather).
    x = params["wte"][input_ids].astype(jnp.float32)       # (B, S, H)
    B, S, H = x.shape
    cos, sin_signed = rotary_tables(S, cfg["head_dim"])

    int_values = {}
    for i, blk in enumerate(params["blocks"]):
        collect = layers_to_collect is None or i in layers_to_collect
        x, iv = falcon_block(x, blk, cos, sin_signed, cfg, collect)
        if collect:
            int_values[i] = iv

    logits = ln_linear(x.reshape(B * S, H), params["lnf_g"], params["lnf_b"],
                       params["w_lm"], params["b_lm"],
                       out_dtype=jnp.float32).reshape(B, S, -1)
    return logits, int_values


# ------------------------------- params -------------------------------

def init_params(key, cfg):
    H, NH, D = cfg["hidden"], cfg["num_heads"], cfg["head_dim"]
    V, L = cfg["vocab"], cfg["layers"]
    qkv_w, mlp_w = (NH + 2) * D, 4 * H

    def norm(k, shape, scale=0.02):
        return (scale * jax.random.normal(k, shape, dtype=jnp.float32)).astype(jnp.bfloat16)

    keys = jax.random.split(key, 3 + L)
    params = {
        "wte": norm(keys[0], (V, H)),
        "lnf_g": jnp.ones((H,), jnp.float32),
        "lnf_b": jnp.zeros((H,), jnp.float32),
        "w_lm": norm(keys[1], (H, V)),
        "b_lm": jnp.zeros((V,), jnp.float32),
        "blocks": [],
    }
    for li in range(L):
        ks = jax.random.split(keys[3 + li], 3)
        params["blocks"].append({
            "ln_g": jnp.ones((H,), jnp.float32),
            "ln_b": jnp.zeros((H,), jnp.float32),
            # Fused [QKV | MLP-up] weight: columns [q0..q{NH-1}, k, v, mlp...].
            "w_fused": norm(ks[0], (H, qkv_w + mlp_w)),
            "b_fused": jnp.zeros((qkv_w + mlp_w,), jnp.float32),
            "wo": norm(ks[1], (NH * D, H)),
            "bo": jnp.zeros((H,), jnp.float32),
            "w2": norm(ks[2], (mlp_w, H)),
            "b2": jnp.zeros((H,), jnp.float32),
        })
    return params


# -------------------------------- main --------------------------------

if __name__ == "__main__":
    # Small but lane-dense shapes: head_dim=128, hidden=NH*D=256, S=128.
    cfg = dict(hidden=256, num_heads=2, head_dim=128, layers=2, vocab=256)
    B, S = 2, 128

    key = jax.random.PRNGKey(0)
    k_params, k_ids = jax.random.split(key)
    params = init_params(k_params, cfg)
    input_ids = jax.random.randint(k_ids, (B, S), 0, cfg["vocab"], dtype=jnp.int32)

    # Collect all layers.
    logits, int_values = annotated_falcon_forward(
        input_ids, params, cfg, layers_to_collect=None)
    jax.block_until_ready((logits, int_values))

    assert logits.shape == (B, S, cfg["vocab"])
    assert set(int_values.keys()) == {0, 1}
    assert int_values[0]["attention_probs"].shape == (B, cfg["num_heads"], S, S)
    assert int_values[0]["attention_output"].shape == (B, S, cfg["hidden"])
    assert bool(jnp.all(jnp.isfinite(logits)))

    # Collect only layer 1 — exercises the no-probs attention variant.
    logits2, int_values2 = annotated_falcon_forward(
        input_ids, params, cfg, layers_to_collect=[1])
    jax.block_until_ready((logits2, int_values2))
    assert set(int_values2.keys()) == {1}

    print("KERNEL_OK")
</pallas_src>

<mosaic_0001>
module attributes {stable_mosaic.version = 11 : i64} {
  func.func @_ln_matmul_kernel(%arg0: i32, %arg1: i32, %arg2: memref<256x256xf32, #tpu.memory_space<vmem>>, %arg3: memref<1x256xf32, #tpu.memory_space<vmem>>, %arg4: memref<1x256xf32, #tpu.memory_space<vmem>>, %arg5: memref<256x512xbf16, #tpu.memory_space<vmem>>, %arg6: memref<1x512xf32, #tpu.memory_space<vmem>>, %arg7: memref<1x512xf32, #tpu.memory_space<vmem>>, %arg8: memref<256x512xbf16, #tpu.memory_space<vmem>>, %arg9: memref<256x256xbf16, #tpu.memory_space<vmem>>) attributes {dimension_semantics = [#tpu.dimension_semantics<parallel>, #tpu.dimension_semantics<arbitrary>], iteration_bounds = array<i64: 1, 3>, scalar_prefetch = 0 : i64, scratch_operands = 1 : i64, tpu.core_type = #tpu.core_type<tc>, window_params = [{transform_indices = @transform_0, window_bounds = array<i64: 256, 256>}, {pipeline_mode = #tpu.pipeline_mode<synchronous>, transform_indices = @transform_1, window_bounds = array<i64: 1, 256>}, {pipeline_mode = #tpu.pipeline_mode<synchronous>, transform_indices = @transform_2, window_bounds = array<i64: 1, 256>}, {transform_indices = @transform_3, window_bounds = array<i64: 256, 512>}, {transform_indices = @transform_4, window_bounds = array<i64: 1, 512>}, {transform_indices = @transform_5, window_bounds = array<i64: 1, 512>}, {transform_indices = @transform_6, window_bounds = array<i64: 256, 512>}]} {
    %c0_i32 = arith.constant 0 : i32
    %0 = arith.cmpi eq, %arg1, %c0_i32 : i32
    %1 = arith.extui %0 : i1 to i32
    %c0_i32_0 = arith.constant 0 : i32
    %2 = arith.cmpi ne, %1, %c0_i32_0 : i32
    scf.if %2 {
      %c0_15 = arith.constant 0 : index
      %c0_16 = arith.constant 0 : index
      %30 = vector.load %arg2[%c0_15, %c0_16] : memref<256x256xf32, #tpu.memory_space<vmem>>, vector<256x256xf32>
      %cst_17 = arith.constant dense<0.000000e+00> : vector<256xf32>
      %31 = vector.multi_reduction <add>, %30, %cst_17 [1] : vector<256x256xf32> to vector<256xf32>
      %32 = vector.shape_cast %31 : vector<256xf32> to vector<256x1xf32>
      %cst_18 = arith.constant 2.560000e+02 : f32
      %33 = vector.broadcast %cst_18 : f32 to vector<256x1xf32>
      %34 = arith.divf %32, %33 : vector<256x1xf32>
      %35 = vector.broadcast %34 : vector<256x1xf32> to vector<256x256xf32>
      %36 = arith.subf %30, %35 : vector<256x256xf32>
      %37 = arith.mulf %36, %36 : vector<256x256xf32>
      %cst_19 = arith.constant dense<0.000000e+00> : vector<256xf32>
      %38 = vector.multi_reduction <add>, %37, %cst_19 [1] : vector<256x256xf32> to vector<256xf32>
      %39 = vector.shape_cast %38 : vector<256xf32> to vector<256x1xf32>
      %cst_20 = arith.constant 2.560000e+02 : f32
      %40 = vector.broadcast %cst_20 : f32 to vector<256x1xf32>
      %41 = arith.divf %39, %40 : vector<256x1xf32>
      %42 = vector.broadcast %34 : vector<256x1xf32> to vector<256x256xf32>
      %43 = arith.subf %30, %42 : vector<256x256xf32>
      %cst_21 = arith.constant 9.99999974E-6 : f32
      %44 = vector.broadcast %cst_21 : f32 to vector<256x1xf32>
      %45 = arith.addf %41, %44 : vector<256x1xf32>
      %46 = math.rsqrt %45 : vector<256x1xf32>
      %47 = vector.broadcast %46 : vector<256x1xf32> to vector<256x256xf32>
      %48 = arith.mulf %43, %47 : vector<256x256xf32>
      %c0_22 = arith.constant 0 : index
      %c0_23 = arith.constant 0 : index
      %49 = vector.load %arg3[%c0_22, %c0_23] : memref<1x256xf32, #tpu.memory_space<vmem>>, vector<1x256xf32>
      %50 = vector.broadcast %49 : vector<1x256xf32> to vector<256x256xf32>
      %51 = arith.mulf %48, %50 : vector<256x256xf32>
      %c0_24 = arith.constant 0 : index
      %c0_25 = arith.constant 0 : index
      %52 = vector.load %arg4[%c0_24, %c0_25] : memref<1x256xf32, #tpu.memory_space<vmem>>, vector<1x256xf32>
      %53 = vector.broadcast %52 : vector<1x256xf32> to vector<256x256xf32>
      %54 = arith.addf %51, %53 : vector<256x256xf32>
      %55 = arith.truncf %54 : vector<256x256xf32> to vector<256x256xbf16>
      %c0_26 = arith.constant 0 : index
      %c0_27 = arith.constant 0 : index
      %56 = vector.load %arg9[%c0_26, %c0_27] : memref<256x256xbf16, #tpu.memory_space<vmem>>, vector<256x256xbf16>
      tpu.vector_store %arg9[%c0_26, %c0_27], %55 {strides = array<i32>} : memref<256x256xbf16, #tpu.memory_space<vmem>>, vector<256x256xbf16>,
    } else {
    }
    %c0 = arith.constant 0 : index
    %c0_1 = arith.constant 0 : index
    %3 = vector.load %arg9[%c0, %c0_1] : memref<256x256xbf16, #tpu.memory_space<vmem>>, vector<256x256xbf16>
    %c0_2 = arith.constant 0 : index
    %c0_3 = arith.constant 0 : index
    %4 = vector.load %arg5[%c0_2, %c0_3] : memref<256x512xbf16, #tpu.memory_space<vmem>>, vector<256x512xbf16>
    %cst = arith.constant dense<0.000000e+00> : vector<256x512xf32>
    %5 = tpu.matmul %3, %4, %cst {dimension_numbers = #tpu.dot_dimension_numbers<[1], [0], [0], [1], [0, 0, 1, 1], [], []>} : vector<256x256xbf16>, vector<256x512xbf16>, vector<256x512xf32> -> vector<256x512xf32>
    %c0_4 = arith.constant 0 : index
    %c0_5 = arith.constant 0 : index
    %6 = vector.load %arg6[%c0_4, %c0_5] : memref<1x512xf32, #tpu.memory_space<vmem>>, vector<1x512xf32>
    %7 = vector.broadcast %6 : vector<1x512xf32> to vector<256x512xf32>
    %8 = arith.addf %5, %7 : vector<256x512xf32>
    %c0_6 = arith.constant 0 : index
    %c0_7 = arith.constant 0 : index
    %9 = vector.load %arg7[%c0_6, %c0_7] : memref<1x512xf32, #tpu.memory_space<vmem>>, vector<1x512xf32>
    %cst_8 = arith.constant 5.000000e-01 : f32
    %10 = vector.broadcast %cst_8 : f32 to vector<1x512xf32>
    %11 = arith.cmpf ogt, %9, %10 : vector<1x512xf32>
    %cst_9 = arith.constant 5.000000e-01 : f32
    %12 = vector.broadcast %cst_9 : f32 to vector<256x512xf32>
    %13 = arith.mulf %12, %8 : vector<256x512xf32>
    %cst_10 = arith.constant 4.471500e-02 : f32
    %14 = vector.broadcast %cst_10 : f32 to vector<256x512xf32>
    %15 = arith.mulf %14, %8 : vector<256x512xf32>
    %16 = arith.mulf %15, %8 : vector<256x512xf32>
    %17 = arith.mulf %16, %8 : vector<256x512xf32>
    %18 = arith.addf %8, %17 : vector<256x512xf32>
    %cst_11 = arith.constant 0.797884583 : f32
    %19 = vector.broadcast %cst_11 : f32 to vector<256x512xf32>
    %20 = arith.mulf %19, %18 : vector<256x512xf32>
    %21 = math.tanh %20 : vector<256x512xf32>
    %cst_12 = arith.constant 1.000000e+00 : f32
    %22 = vector.broadcast %cst_12 : f32 to vector<256x512xf32>
    %23 = arith.addf %22, %21 : vector<256x512xf32>
    %24 = arith.mulf %13, %23 : vector<256x512xf32>
    %25 = vector.shape_cast %11 : vector<1x512xi1> to vector<1x512xi1>
    %26 = vector.broadcast %25 : vector<1x512xi1> to vector<256x512xi1>
    %27 = arith.select %26, %24, %8 : vector<256x512xi1>, vector<256x512xf32>
    %28 = arith.truncf %27 : vector<256x512xf32> to vector<256x512xbf16>
    %c0_13 = arith.constant 0 : index
    %c0_14 = arith.constant 0 : index
    %29 = vector.load %arg8[%c0_13, %c0_14] : memref<256x512xbf16, #tpu.memory_space<vmem>>, vector<256x512xbf16>
    tpu.vector_store %arg8[%c0_13, %c0_14], %28 {strides = array<i32>} : memref<256x512xbf16, #tpu.memory_space<vmem>>, vector<256x512xbf16>,
    return
  }
  func.func @transform_0(%arg0: i32, %arg1: i32) -> (i32, i32) {
    %c0_i32 = arith.constant 0 : i32
    %c0_i32_0 = arith.constant 0 : i32
    return %arg0, %c0_i32 : i32, i32
  }
  func.func @transform_1(%arg0: i32, %arg1: i32) -> (i32, i32) {
    %c0_i32 = arith.constant 0 : i32
    %c0_i32_0 = arith.constant 0 : i32
    %c0_i32_1 = arith.constant 0 : i32
    return %c0_i32, %c0_i32_0 : i32, i32
  }
  func.func @transform_2(%arg0: i32, %arg1: i32) -> (i32, i32) {
    %c0_i32 = arith.constant 0 : i32
    %c0_i32_0 = arith.constant 0 : i32
    %c0_i32_1 = arith.constant 0 : i32
    return %c0_i32, %c0_i32_0 : i32, i32
  }
  func.func @transform_3(%arg0: i32, %arg1: i32) -> (i32, i32) {
    %c0_i32 = arith.constant 0 : i32
    %c0_i32_0 = arith.constant 0 : i32
    return %c0_i32, %arg1 : i32, i32
  }
  func.func @transform_4(%arg0: i32, %arg1: i32) -> (i32, i32) {
    %c0_i32 = arith.constant 0 : i32
    %c0_i32_0 = arith.constant 0 : i32
    return %c0_i32, %arg1 : i32, i32
  }
  func.func @transform_5(%arg0: i32, %arg1: i32) -> (i32, i32) {
    %c0_i32 = arith.constant 0 : i32
    %c0_i32_0 = arith.constant 0 : i32
    return %c0_i32, %arg1 : i32, i32
  }
  func.func @transform_6(%arg0: i32, %arg1: i32) -> (i32, i32) {
    %c0_i32 = arith.constant 0 : i32
    return %arg0, %arg1 : i32, i32
  }
}

</mosaic_0001>

<bundles_post_ra>
// kernel: tpu_custom_call.1
= control target key start
LH: loop header
LB: loop body
LE: loop exit
PB: predicated region body
PF: predicated region fallthrough
CT: control target
= control target key end

     0   :  { %s8816_s0 = inlined_call_operand.hbm [shape: f32[256,256], index: 0, kind: input, shape index: {}]   ;;  %s8817_s1 = inlined_call_operand.hbm [shape: f32[1,256], index: 1, kind: input, shape index: {}]   ;;  %s8818_s2 = inlined_call_operand.hbm [shape: f32[1,256], index: 2, kind: input, shape index: {}]   ;;  %s8819_s3 = inlined_call_operand.hbm [shape: bf16[256,1536], index: 3, kind: input, shape index: {}]   ;;  %s8820_s4 = inlined_call_operand.hbm [shape: f32[1,1536], index: 4, kind: input, shape index: {}]   ;;  %s8821_s5 = inlined_call_operand.hbm [shape: f32[1,1536], index: 5, kind: input, shape index: {}]   ;;  %s8822_s6 = inlined_call_operand.hbm [shape: bf16[256,1536], index: 6, kind: output, shape index: {}]  }
   0x1   :  { %8885 = sst [smem:[#allocation65_spill]] %s8817_s1 }
   0x2   :  { %8886 = sst [smem:[#allocation66_spill]] %s8819_s3 }
   0x3   :  { %11 = vsyncpa [#allocation4], 0 }
   0x4   :  { %12 = vsyncpa [#allocation7], 0 }
   0x5   :  { %13 = vsyncpa [#allocation10], 0 }
   0x6   :  { %15 = vsyncpa [#allocation10 + $0x1], 0 }
   0x7   :  { %16 = vsyncpa [#allocation13], 0 }
   0x8   :  { %18 = vsyncpa [#allocation13 + $0x1], 0 }
   0x9   :  { %19 = vsyncpa [#allocation5], 0 }
   0xa   :  { %21 = vsyncpa [#allocation5 + $0x1], 0  ;;  %s5663_s21 = smov 0   ;;  %s5665_s22 = smov 0  }
   0xb   :  { %s5667_s23 = smov 0   ;;  %s5669_s24 = smov 0  }
   0xc   :  { %s5671_s25 = smov 0   ;;  %s5673_s26 = smov 0  }
   0xd LB: > { %8887 = sst [smem:[#allocation20_spill]] %s5595_s21  ;;  %s5694_s27 = sadd.s32 4294967295, %s5615_s26   ;;  %s5615_s26 = sphi %s5673_s26, %s27_s26   ;;  %s5611_s25 = sphi %s5671_s25, %s9029_s25   ;;  %s5607_s24 = sphi %s5669_s24, %s9028_s24   ;;  %s5603_s23 = sphi %s5667_s23, %s9024_s23   ;;  %s5599_s22 = sphi %s5665_s22, %s9027_s22   ;;  %s5595_s21 = sphi %s5663_s21, %s9026_s21  }
   0xe   : > { %8888 = sst [smem:[#allocation21_spill]] %s5603_s23  ;;  %s4398_s28 = sadd.s32 4294967294, %s5615_s26  }
   0xf   : > { %8889 = sst [smem:[#allocation22_spill]] %s5615_s26  ;;  %s114_s29 = sadd.s32 1, %s5603_s23 }
  0x10   : > { %p121_p0 = scmp.ne.s32.totalorder %s5603_s23, %s5599_s22  ;;  %p122_p1 = scmp.eq.s32.totalorder %s5615_s26, 0 }
  0x11   : > { %p127_p2 = scmp.ne.s32.totalorder %s5599_s22, %s5595_s21  ;;  %p128_p3 = scmp.eq.s32.totalorder %s5694_s27, 0 }
  0x12   : > { %p205_p4 = scmp.eq.s32.totalorder %s5694_s27, 2  ;;  %p5705_p5 = por %p122_p1, %p121_p0 }
  0x13   : > { %p211_p6 = scmp.eq.s32.totalorder %s4398_s28, 2  ;;  %p5711_p7 = por %p128_p3, %p127_p2 }
  0x14   : > { %p5715_p8 = por %p205_p4, %p121_p0  ;;  %p4399_p10 = scmp.ge.s32.totalorder %s5615_s26, 1 }
  0x15   : > { %p5719_p9 = por %p211_p6, %p127_p2  ;;  %p218_p11 = scmp.lt.s32.totalorder %s5615_s26, 4 }
  0x16   : > { %s8892_s8 = scalar_select %p5715_p8, 1, 0 }
  0x17   : > { %s8894_s9 = scalar_select %p5719_p9, 1, 0 }
  0x18   : > { %8893 = sst [smem:[#allocation23_spill]] %s8892_s8  ;;  %p5728_p12 = pnand %p4399_p10, %p218_p11 }
  0x19   : > { %8895 = sst [smem:[#allocation24_spill]] %s8894_s9  ;;  %s5617_s14 = smov [#allocation6]  }
  0x1a   : > { %s8896_s1 = sld [smem:[#allocation65_spill]]  ;;  %s250_s15 = sshll.u32 %s5617_s14, 4  ;;  %s251_s15 = int_to_ptr.vmem [resolvable:$true] %s250_s15 }
  0x1b   : > { %p4927_p13 = pneg %p5728_p12  ;;  %p4954_p0 = scmp.lt.s32.totalorder %s5615_s26, 3 }
  0x1c   : > { %s36_s18 = sadd.s32 1, %s5611_s25  ;;  %s273_s19 = sand.u32 1, %s5615_s26  }
  0x1d   : > { %p5737_p1 = pnand %p4927_p13, %p128_p3  ;;  %p5743_p2 = pnand %p4954_p0, %p5705_p5 }
  0x1e   : > { %p37_p4 = scmp.ge.s32.totalorder %s36_s18, 3  ;;  %s5756_s28 = sand.u32 1, %s5603_s23  }
  0x1f   : > { %s4404_s30 = sshll.u32 %s5756_s28, 9  ;;  %s4809_s10 = sshll.u32 %s5611_s25, 4 }
  0x20   : > { %s248_s12 = sshll.u32 %s8896_s1, 4  ;;  %s9031_s18 = smov (%p37_p4, %s36_s18), 0  ;;  %s249_s12 = int_to_ptr.hbm [resolvable:$true] %s248_s12 }
  0x21   : > { %4933 = dma.hbm_to_vmem [thread:$0]  (!%p5737_p1), %s249_s12, 32, %s251_s15, [#allocation7]  }
  0x22   : > { %8900 = sst [smem:[#allocation25_spill]] %s9031_s18  ;;  %s111_s20 = ssub.s32 %s5611_s25, %s9031_s18 }
  0x23   : > { %p112_p6 = scmp.eq.s32.totalorder %s111_s20, 0  ;;  %s8902_s3 = sld [smem:[#allocation66_spill]] }
  0x24   : > { %s277_s15 = scalar_lea.vmem [#allocation9], %s4404_s30  ;;  %s274_s20 = scalar_lea.sflag [#allocation10], %s273_s19 }
  0x25   : > { %s5763_s11 = scalar_select %p112_p6, %s5603_s23, %s114_s29  }
  0x26   : > { %s285_s21 = sshll.u32 %s277_s15, 4  ;;  %s5618_s18 = smov 768   ;;  %s286_s21 = int_to_ptr.vmem [resolvable:$true] %s285_s21 }
  0x27   : > { %8901 = sst [smem:[#allocation26_spill]] %s5763_s11  ;;  %s5619_s26 = smov 256  }
  0x28   : > { %s5620_s8 = smov 16   ;;  %s233_s1 = sshll.u32 %s8816_s0, 4  ;;  %s234_s1 = int_to_ptr.hbm [resolvable:$true] %s233_s1 }
  0x29   : > { %s282_s9 = scalar_lea.hbm %s8902_s3, %s4809_s10  ;;  %s260_s15 = sshll.u32 %s8818_s2, 4  ;;  %s261_s15 = int_to_ptr.hbm [resolvable:$true] %s260_s15 }
  0x2a   : > { %s283_s12 = sshll.u32 %s282_s9, 4  ;;  %s5621_s9 = smov [#allocation3]   ;;  %s284_s12 = int_to_ptr.hbm [resolvable:$true] %s283_s12 }
  0x2b   : > { %4940 = dma.hbm_to_vmem [thread:$0]  (!%p5743_p2), %s284_s12, 8192, %s286_s21, %s274_s20, %s5618_s18, %s5619_s26, %s5620_s8  }
  0x2c   : > { %s235_s30 = sshll.u32 %s5621_s9, 4  ;;  %s4407_s19 = sshll.u32 %s5756_s28, 2  ;;  %s236_s30 = int_to_ptr.vmem [resolvable:$true] %s235_s30 }
  0x2d   : > { %4930 = dma.hbm_to_vmem [thread:$0]  (!%p5737_p1), %s234_s1, 8192, %s236_s30, [#allocation4], %s5619_s26, %s5619_s26, %s5620_s8  }
  0x2e   : > { %s5622_s3 = smov [#allocation8]   ;;  %s4408_s21 = sshll.u32 %s5611_s25, 2 }
  0x2f   : > { %s262_s23 = sshll.u32 %s5622_s3, 4  ;;  %s303_s12 = scalar_lea.hbm %s8820_s4, %s4408_s21  ;;  %s263_s23 = int_to_ptr.vmem [resolvable:$true] %s262_s23 }
  0x30   : > { %4936 = dma.hbm_to_vmem [thread:$0]  (!%p5737_p1), %s261_s15, 32, %s263_s23, [#allocation7]  }
  0x31   : > { %s299_s29 = scalar_lea.vmem [#allocation11], %s4407_s19  ;;  %s305_s10 = sshll.u32 %s303_s12, 4  ;;  %s306_s10 = int_to_ptr.hbm [resolvable:$true] %s305_s10 }
  0x32   : > { %s307_s9 = sshll.u32 %s299_s29, 4  ;;  %s322_s3 = scalar_lea.hbm %s8821_s5, %s4408_s21  ;;  %s308_s9 = int_to_ptr.vmem [resolvable:$true] %s307_s9 }
  0x33   : > { %4943 = dma.hbm_to_vmem [thread:$0]  (!%p5743_p2), %s306_s10, 64, %s308_s9, %s274_s20  }
  0x34   : > { %s324_s1 = sshll.u32 %s322_s3, 4  ;;  %s318_s30 = scalar_lea.vmem [#allocation12], %s4407_s19  ;;  %s325_s1 = int_to_ptr.hbm [resolvable:$true] %s324_s1 }
  0x35   : > { %s326_s16 = sshll.u32 %s318_s30, 4  ;;  %s315_s23 = scalar_lea.sflag [#allocation13], %s5756_s28  ;;  %s327_s16 = int_to_ptr.vmem [resolvable:$true] %s326_s16 }
  0x36   : > { %4946 = dma.hbm_to_vmem [thread:$0]  (!%p5743_p2), %s325_s1, 64, %s327_s16, %s315_s23  }
  0x37   : > { %335 = sbr.rel (%p5728_p12) target bundleno = 1196 (0x4ac), region = 44 }
  0x3c   : > { %5574 = dma.done.wait (%p128_p3), [#allocation4], 8192  }
  0x3d   : > { %5576 = vsyncadd (%p128_p3), [#allocation4], 4294959104 }
  0x3e   : > { %5578 = dma.done.wait (%p128_p3), [#allocation7], 64  }
  0x3f   : > { %5580 = vsyncadd (%p128_p3), [#allocation7], 4294967232  ;;  %s352_s17 = sand.u32 1, %s5694_s27   ;;  %s5805_s28 = sand.u32 1, %s5599_s22  }
  0x40   : > { %s4415_s13 = sshll.u32 %s5805_s28, 9  ;;  %s353_s20 = scalar_lea.sflag [#allocation10], %s352_s17 }
  0x41   : > { %s5808_s14 = scalar_lea.vmem [#allocation9], %s4415_s13 }
  0x42   : > { %5582 = dma.done.wait (%p5711_p7), %s353_s20, 8256  }
  0x43   : > { %5584 = vsyncadd (%p5711_p7), %s353_s20, 4294959040  ;;  %s4416_s15 = sshll.u32 %s5805_s28, 2  ;;  %s373_s21 = scalar_lea.sflag [#allocation13], %s5805_s28 }
  0x44   : > { %s5815_s19 = scalar_lea.vmem [#allocation11], %s4416_s15  ;;  %s5818_s27 = scalar_lea.vmem [#allocation12], %s4416_s15 }
  0x45   : > { %5586 = dma.done.wait (%p5711_p7), %s373_s21, 64  }
  0x46   : > { %5588 = vsyncadd (%p5711_p7), %s373_s21, 4294967232  ;;  %s5824_s18 = scalar_lea.vmem [#allocation14], %s4415_s13  ;;  %p4419_p3 = scmp.ne.s32.totalorder %s5607_s24, 0 }
  0x48   : > { %425 = sbr.rel (%p4419_p3) target bundleno = 492 (0x1ec), region = 72 }
  0x4d   : > { %v5827_v0 = vld [vmem:[#allocation3 + $0x40] sm:$0xff]  ;;  %v5829_v1 = vld [vmem:[#allocation3 + $0x48] sm:$0xff]  ;;  %v5845_v9 = vld [vmem:[#allocation3 + $0x50] sm:$0xff] }
  0x4e   : > { %v5831_v2 = vld [vmem:[#allocation3 + $0x20] sm:$0xff]  ;;  %v502_v3 = vadd.f32 %v5829_v1, %v5827_v0  ;;  %v5835_v4 = vld [vmem:[#allocation3 + $0x28] sm:$0xff]  ;;  %v5847_v10 = vld [vmem:[#allocation3 + $0x58] sm:$0xff] }
  0x4f   : > { %v5837_v5 = vld [vmem:[#allocation3] sm:$0xff]  ;;  %v5839_v6 = vld [vmem:[#allocation3 + $0x8] sm:$0xff]  ;;  %v496_v7 = vadd.f32 %v5835_v4, %v5831_v2  ;;  %v5849_v11 = vld [vmem:[#allocation3 + $0x30] sm:$0xff]  ;;  %v505_v15 = vadd.f32 %v5847_v10, %v5845_v9 }
  0x50   : > { %v490_v8 = vadd.f32 %v5839_v6, %v5837_v5  ;;  %503 = vadd.xlane.f32.xlu2 %v502_v3  ;;  %v5851_v12 = vld [vmem:[#allocation3 + $0x38] sm:$0xff]  ;;  %v5853_v13 = vld [vmem:[#allocation3 + $0x10] sm:$0xff]  ;;  %v5863_v18 = vld [vmem:[#allocation3 + $0x80] sm:$0xff] }
  0x51   : > { %497 = vadd.xlane.f32.xlu1 %v496_v7  ;;  %v5855_v14 = vld [vmem:[#allocation3 + $0x18] sm:$0xff]  ;;  %v499_v16 = vadd.f32 %v5851_v12, %v5849_v11  ;;  %v5865_v19 = vld [vmem:[#allocation3 + $0x88] sm:$0xff]  ;;  %v5867_v20 = vld [vmem:[#allocation3 + $0x60] sm:$0xff] }
  0x52   : > { %491 = vadd.xlane.f32.xlu0 %v490_v8  ;;  %v493_v17 = vadd.f32 %v5855_v14, %v5853_v13  ;;  %v5869_v21 = vld [vmem:[#allocation3 + $0x68] sm:$0xff]  ;;  %v5871_v22 = vld [vmem:[#allocation3 + $0x70] sm:$0xff]  ;;  %v5873_v23 = vld [vmem:[#allocation3 + $0x78] sm:$0xff]  ;;  %v514_v24 = vadd.f32 %v5865_v19, %v5863_v18 }
  0x53   : > { %v508_v25 = vadd.f32 %v5869_v21, %v5867_v20  ;;  %v511_v26 = vadd.f32 %v5873_v23, %v5871_v22  ;;  %v5881_v27 = vld [vmem:[#allocation3 + $0xb0] sm:$0xff]  ;;  %v5883_v28 = vld [vmem:[#allocation3 + $0xb8] sm:$0xff]  ;;  %v5889_v31 = vld [vmem:[#allocation3 + $0xa0] sm:$0xff] }
  0x54   : > { %v5885_v29 = vld [vmem:[#allocation3 + $0x90] sm:$0xff]  ;;  %v5887_v30 = vld [vmem:[#allocation3 + $0x98] sm:$0xff]  ;;  %v5891_v32 = vld [vmem:[#allocation3 + $0xa8] sm:$0xff]  ;;  %v523_v33 = vadd.f32 %v5883_v28, %v5881_v27 }
  0x55   : > { %v517_v34 = vadd.f32 %v5887_v30, %v5885_v29  ;;  %v520_v35 = vadd.f32 %v5891_v32, %v5889_v31  ;;  %v5899_v36 = vld [vmem:[#allocation3 + $0xe0] sm:$0xff]  ;;  %v5901_v37 = vld [vmem:[#allocation3 + $0xe8] sm:$0xff]  ;;  %v5907_v40 = vld [vmem:[#allocation3 + $0xd0] sm:$0xff] }
  0x56   : > { %v5903_v38 = vld [vmem:[#allocation3 + $0xc0] sm:$0xff]  ;;  %v5905_v39 = vld [vmem:[#allocation3 + $0xc8] sm:$0xff]  ;;  %v5909_v41 = vld [vmem:[#allocation3 + $0xd8] sm:$0xff]  ;;  %v532_v42 = vadd.f32 %v5901_v37, %v5899_v36 }
  0x57   : > { %v526_v43 = vadd.f32 %v5905_v39, %v5903_v38  ;;  %v529_v44 = vadd.f32 %v5909_v41, %v5907_v40  ;;  %v5917_v45 = vld [vmem:[#allocation3 + $0x110] sm:$0xff]  ;;  %v5919_v46 = vld [vmem:[#allocation3 + $0x118] sm:$0xff]  ;;  %v5925_v49 = vld [vmem:[#allocation3 + $0x100] sm:$0xff] }
  0x58   : > { %506 = vadd.xlane.f32.xlu2 %v505_v15  ;;  %v5921_v47 = vld [vmem:[#allocation3 + $0xf0] sm:$0xff]  ;;  %v5923_v48 = vld [vmem:[#allocation3 + $0xf8] sm:$0xff]  ;;  %v5927_v50 = vld [vmem:[#allocation3 + $0x108] sm:$0xff]  ;;  %v541_v51 = vadd.f32 %v5919_v46, %v5917_v45 }
  0x59   : > { %500 = vadd.xlane.f32.xlu1 %v499_v16  ;;  %v535_v52 = vadd.f32 %v5923_v48, %v5921_v47  ;;  %v538_v53 = vadd.f32 %v5927_v50, %v5925_v49  ;;  %v5935_v54 = vld [vmem:[#allocation3 + $0x140] sm:$0xff]  ;;  %v5937_v55 = vld [vmem:[#allocation3 + $0x148] sm:$0xff]  ;;  %v5943_v58 = vld [vmem:[#allocation3 + $0x130] sm:$0xff] }
  0x5a   : > { %494 = vadd.xlane.f32.xlu0 %v493_v17  ;;  %v5939_v56 = vld [vmem:[#allocation3 + $0x120] sm:$0xff]  ;;  %v5941_v57 = vld [vmem:[#allocation3 + $0x128] sm:$0xff]  ;;  %v5945_v59 = vld [vmem:[#allocation3 + $0x138] sm:$0xff]  ;;  %v550_v60 = vadd.f32 %v5937_v55, %v5935_v54 }
  0x5b   : > { %v544_v61 = vadd.f32 %v5941_v57, %v5939_v56  ;;  %v547_v62 = vadd.f32 %v5945_v59, %v5943_v58  ;;  %v5953_v63 = vld [vmem:[#allocation3 + $0x170] sm:$0xff]  ;;  %v5955_v3 = vld [vmem:[#allocation3 + $0x178] sm:$0xff]  ;;  %v5961_v15 = vld [vmem:[#allocation3 + $0x160] sm:$0xff] }
  0x5c   : > { %v5957_v7 = vld [vmem:[#allocation3 + $0x150] sm:$0xff]  ;;  %v5959_v8 = vld [vmem:[#allocation3 + $0x158] sm:$0xff]  ;;  %v5963_v16 = vld [vmem:[#allocation3 + $0x168] sm:$0xff]  ;;  %v559_v17 = vadd.f32 %v5955_v3, %v5953_v63 }
  0x60   : > { %515 = vadd.xlane.f32.xlu2 %v514_v24  ;;  %v553_v24 = vadd.f32 %v5959_v8, %v5957_v7 }
  0x61   : > { %512 = vadd.xlane.f32.xlu1 %v511_v26  ;;  %v5971_v26 = vld [vmem:[#allocation3 + $0x1a0] sm:$0xff] }
  0x62   : > { %509 = vadd.xlane.f32.xlu0 %v508_v25  ;;  %v556_v25 = vadd.f32 %v5963_v16, %v5961_v15  ;;  %8903 = vst [vmem:[#allocation27_spill] sm:$0xff] %v5971_v26 }
  0x68   : > { %524 = vadd.xlane.f32.xlu2 %v523_v33  ;;  %v5973_v33 = vld [vmem:[#allocation3 + $0x1a8] sm:$0xff] }
  0x69   : > { %521 = vadd.xlane.f32.xlu1 %v520_v35  ;;  %8904 = vst [vmem:[#allocation28_spill] sm:$0xff] %v5973_v33  ;;  %v5977_v35 = vld [vmem:[#allocation3 + $0x188] sm:$0xff] }
  0x6a   : > { %518 = vadd.xlane.f32.xlu0 %v517_v34  ;;  %v5975_v34 = vld [vmem:[#allocation3 + $0x180] sm:$0xff]  ;;  %8906 = vst [vmem:[#allocation30_spill] sm:$0xff] %v5977_v35 }
  0x6b   : > { %8905 = vst [vmem:[#allocation29_spill] sm:$0xff] %v5975_v34 }
  0x70   : > { %533 = vadd.xlane.f32.xlu2 %v532_v42  ;;  %v5979_v42 = vld [vmem:[#allocation3 + $0x190] sm:$0xff] }
  0x71   : > { %530 = vadd.xlane.f32.xlu1 %v529_v44  ;;  %8907 = vst [vmem:[#allocation31_spill] sm:$0xff] %v5979_v42  ;;  %v568_v44 = vadd.f32 %v5973_v33, %v5971_v26 }
  0x72   : > { %527 = vadd.xlane.f32.xlu0 %v526_v43  ;;  %v5981_v43 = vld [vmem:[#allocation3 + $0x198] sm:$0xff] }
  0x73   : > { %8908 = vst [vmem:[#allocation32_spill] sm:$0xff] %v5981_v43 }
  0x78   : > { %542 = vadd.xlane.f32.xlu2 %v541_v51  ;;  %v562_v51 = vadd.f32 %v5977_v35, %v5975_v34  ;;  %v6013_v35 = vld [vmem:[#allocation3 + $0x1f8] sm:$0xff] }
  0x79   : > { %539 = vadd.xlane.f32.xlu1 %v538_v53  ;;  %v5989_v53 = vld [vmem:[#allocation3 + $0x1d0] sm:$0xff] }
  0x7a   : > { %536 = vadd.xlane.f32.xlu0 %v535_v52  ;;  %v565_v52 = vadd.f32 %v5981_v43, %v5979_v42  ;;  %8909 = vst [vmem:[#allocation33_spill] sm:$0xff] %v5989_v53  ;;  %v6009_v43 = vld [vmem:[#allocation3 + $0x1e8] sm:$0xff]  ;;  %v6011_v42 = vld [vmem:[#allocation3 + $0x1f0] sm:$0xff] }
  0x7b   : > { %8916 = vst [vmem:[#allocation40_spill] sm:$0xff] %v6009_v43 }
  0x80   : > { %551 = vadd.xlane.f32.xlu2 %v550_v60  ;;  %v5991_v60 = vld [vmem:[#allocation3 + $0x1d8] sm:$0xff] }
  0x81   : > { %548 = vadd.xlane.f32.xlu1 %v547_v62  ;;  %8910 = vst [vmem:[#allocation34_spill] sm:$0xff] %v5991_v60  ;;  %v5995_v62 = vld [vmem:[#allocation3 + $0x1b8] sm:$0xff] }
  0x82   : > { %545 = vadd.xlane.f32.xlu0 %v544_v61  ;;  %v5993_v61 = vld [vmem:[#allocation3 + $0x1b0] sm:$0xff]  ;;  %8912 = vst [vmem:[#allocation36_spill] sm:$0xff] %v5995_v62 }
  0x83   : > { %8911 = vst [vmem:[#allocation35_spill] sm:$0xff] %v5993_v61 }
  0x88   : > { %560 = vadd.xlane.f32.xlu2 %v559_v17  ;;  %v5997_v17 = vld [vmem:[#allocation3 + $0x1c0] sm:$0xff] }
  0x89   : > { %557 = vadd.xlane.f32.xlu1 %v556_v25  ;;  %8913 = vst [vmem:[#allocation37_spill] sm:$0xff] %v5997_v17  ;;  %v577_v25 = vadd.f32 %v5991_v60, %v5989_v53 }
  0x8a   : > { %554 = vadd.xlane.f32.xlu0 %v553_v24  ;;  %v5999_v24 = vld [vmem:[#allocation3 + $0x1c8] sm:$0xff] }
  0x8b   : > { %8914 = vst [vmem:[#allocation38_spill] sm:$0xff] %v5999_v24 }
  0x90   : > { %569 = vadd.xlane.f32.xlu2 %v568_v44  ;;  %v571_v44 = vadd.f32 %v5995_v62, %v5993_v61  ;;  %v583_v62 = vadd.f32 %v6013_v35, %v6011_v42 }
  0x91   : > { %566 = vadd.xlane.f32.xlu1 %v565_v52  ;;  %v6007_v52 = vld [vmem:[#allocation3 + $0x1e0] sm:$0xff] }
  0x92   : > { %563 = vadd.xlane.f32.xlu0 %v562_v51  ;;  %v574_v51 = vadd.f32 %v5999_v24, %v5997_v17  ;;  %8915 = vst [vmem:[#allocation39_spill] sm:$0xff] %v6007_v52  ;;  %v580_v60 = vadd.f32 %v6009_v43, %v6007_v52  ;;  %v5623_v24 = vmov 256.0  }
  0x93   : > { %5018 = vrcp.f32 %v5623_v24 }
  0x98   : > { %578 = vadd.xlane.f32.xlu2 %v577_v25 }
  0x99   : > { %575 = vadd.xlane.f32.xlu1 %v574_v51  ;;  %v5019_v25 = vpop.eup %5018 }
  0x9a   : > { %572 = vadd.xlane.f32.xlu0 %v571_v44  ;;  %v587_v44 = vmul.f32 256.0, %v5019_v25  ;;  %vm591_vm0 = vweird.f32 %v5019_v25 }
  0x9c   : > { %v588_v51 = vsub.f32 1.0, %v587_v44 }
  0x9e   : > { %v589_v17 = vmul.f32 %v5019_v25, %v588_v51 }
  0xa0   : > { %v590_v61 = vadd.f32 %v5019_v25, %v589_v17 }
  0xa1   : > { %584 = vadd.xlane.f32.xlu1 %v583_v62 }
  0xa2   : > { %581 = vadd.xlane.f32.xlu0 %v580_v60  ;;  %v6019_v53 = vsel %vm591_vm0, %v5019_v25, %v590_v61 }
  0xc3   : > { %v504_v34 = vpop.xlane.xlu2 %503 }
  0xc4   : > { %v498_v33 = vpop.xlane.xlu1 %497 }
  0xc5   : > { %v492_v26 = vpop.xlane.xlu0 %491  ;;  %v595_v43 = vmul.f32 %v6019_v53, %v498_v33 }
  0xc6   : > { %v593_v52 = vmul.f32 %v6019_v53, %v492_v26 }
  0xc7   : > { %v6024_v60 = vsub.f32 %v5831_v2, %v595_v43  ;;  %v6027_v62 = vsub.f32 %v5835_v4, %v595_v43 }
  0xc8   : > { %v6030_v24 = vsub.f32 %v5837_v5, %v593_v52  ;;  %v6033_v17 = vsub.f32 %v5839_v6, %v593_v52 }
  0xc9   : > { %8917 = vst [vmem:[#allocation41_spill] sm:$0xff] %v6027_v62  ;;  %v693_v61 = vmul.f32 %v6024_v60, %v6024_v60  ;;  %v694_v33 = vmul.f32 %v6027_v62, %v6027_v62  ;;  %v597_v62 = vmul.f32 %v6019_v53, %v504_v34 }
  0xca   : > { %8918 = vst [vmem:[#allocation42_spill] sm:$0xff] %v6030_v24  ;;  %v689_v26 = vmul.f32 %v6030_v24, %v6030_v24  ;;  %v690_v2 = vmul.f32 %v6033_v17, %v6033_v17 }
  0xcb   : > { %8919 = vst [vmem:[#allocation43_spill] sm:$0xff] %v6033_v17  ;;  %v507_v4 = vpop.xlane.xlu2 %506  ;;  %v759_v43 = vadd.f32 %v694_v33, %v693_v61 }
  0xcc   : > { %v753_v25 = vadd.f32 %v690_v2, %v689_v26  ;;  %v598_v5 = vmul.f32 %v6019_v53, %v507_v4  ;;  %v501_v44 = vpop.xlane.xlu1 %500  ;;  %v6081_v4 = vsub.f32 %v5829_v1, %v597_v62 }
  0xcd   : > { %v495_v6 = vpop.xlane.xlu0 %494  ;;  %v596_v52 = vmul.f32 %v6019_v53, %v501_v44  ;;  %760 = vadd.xlane.f32.xlu1 %v759_v43 }
  0xce   : > { %v594_v51 = vmul.f32 %v6019_v53, %v495_v6  ;;  %754 = vadd.xlane.f32.xlu2 %v753_v25  ;;  %v6048_v24 = vsub.f32 %v5845_v9, %v598_v5  ;;  %v6051_v17 = vsub.f32 %v5847_v10, %v598_v5 }
  0xcf   : > { %v6054_v61 = vsub.f32 %v5849_v11, %v596_v52  ;;  %v6057_v33 = vsub.f32 %v5851_v12, %v596_v52 }
  0xd0   : > { %v6060_v26 = vsub.f32 %v5853_v13, %v594_v51  ;;  %v6063_v2 = vsub.f32 %v5855_v14, %v594_v51  ;;  %v699_v34 = vmul.f32 %v6048_v24, %v6048_v24  ;;  %v700_v9 = vmul.f32 %v6051_v17, %v6051_v17 }
  0xd1   : > { %8920 = vst [vmem:[#allocation44_spill] sm:$0xff] %v6057_v33  ;;  %v695_v10 = vmul.f32 %v6054_v61, %v6054_v61  ;;  %v696_v11 = vmul.f32 %v6057_v33, %v6057_v33  ;;  %v6078_v14 = vsub.f32 %v5827_v0, %v597_v62 }
  0xd2   : > { %8921 = vst [vmem:[#allocation45_spill] sm:$0xff] %v6063_v2  ;;  %v691_v12 = vmul.f32 %v6060_v26, %v6060_v26  ;;  %v692_v13 = vmul.f32 %v6063_v2, %v6063_v2  ;;  %v768_v43 = vadd.f32 %v700_v9, %v699_v34  ;;  %v698_v34 = vmul.f32 %v6081_v4, %v6081_v4 }
  0xd3   : > { %v516_v25 = vpop.xlane.xlu2 %515  ;;  %v762_v5 = vadd.f32 %v696_v11, %v695_v10  ;;  %v697_v62 = vmul.f32 %v6078_v14, %v6078_v14 }
  0xd4   : > { %v756_v44 = vadd.f32 %v692_v13, %v691_v12  ;;  %v601_v6 = vmul.f32 %v6019_v53, %v516_v25  ;;  %v513_v51 = vpop.xlane.xlu1 %512 }
  0xd5   : > { %v510_v52 = vpop.xlane.xlu0 %509  ;;  %769 = vadd.xlane.f32.xlu1 %v768_v43  ;;  %v600_v2 = vmul.f32 %v6019_v53, %v513_v51 }
  0xd6   : > { %v599_v33 = vmul.f32 %v6019_v53, %v510_v52  ;;  %763 = vadd.xlane.f32.xlu2 %v762_v5  ;;  %v6087_v0 = vsub.f32 %v5863_v18, %v601_v6  ;;  %v6090_v1 = vsub.f32 %v5865_v19, %v601_v6  ;;  %757 = vadd.xlane.f32.xlu0 %v756_v44 }
  0xd7   : > { %v6107_v11 = vsub.f32 %v5871_v22, %v600_v2 }
  0xd8   : > { %v6097_v9 = vsub.f32 %v5867_v20, %v599_v33  ;;  %v6100_v10 = vsub.f32 %v5869_v21, %v599_v33  ;;  %v705_v18 = vmul.f32 %v6087_v0, %v6087_v0  ;;  %v706_v19 = vmul.f32 %v6090_v1, %v6090_v1 }
  0xd9   : > { %v6114_v20 = vsub.f32 %v5873_v23, %v600_v2  ;;  %v765_v33 = vadd.f32 %v698_v34, %v697_v62  ;;  %v703_v52 = vmul.f32 %v6107_v11, %v6107_v11 }
  0xda   : > { %v701_v12 = vmul.f32 %v6097_v9, %v6097_v9  ;;  %v702_v13 = vmul.f32 %v6100_v10, %v6100_v10  ;;  %v777_v21 = vadd.f32 %v706_v19, %v705_v18 }
  0xdb   : > { %v525_v43 = vpop.xlane.xlu2 %524  ;;  %v704_v62 = vmul.f32 %v6114_v20, %v6114_v20 }
  0xdc   : > { %v771_v25 = vadd.f32 %v702_v13, %v701_v12  ;;  %v604_v5 = vmul.f32 %v6019_v53, %v525_v43  ;;  %v522_v6 = vpop.xlane.xlu1 %521 }
  0xdd   : > { %v519_v44 = vpop.xlane.xlu0 %518  ;;  %778 = vadd.xlane.f32.xlu1 %v777_v21  ;;  %v603_v2 = vmul.f32 %v6019_v53, %v522_v6  ;;  %v774_v21 = vadd.f32 %v704_v62, %v703_v52 }
  0xde   : > { %v602_v22 = vmul.f32 %v6019_v53, %v519_v44  ;;  %772 = vadd.xlane.f32.xlu2 %v771_v25  ;;  %v6121_v51 = vsub.f32 %v5881_v27, %v604_v5  ;;  %v6124_v23 = vsub.f32 %v5883_v28, %v604_v5  ;;  %766 = vadd.xlane.f32.xlu0 %v765_v33 }
  0xdf   : > { %v6144_v13 = vsub.f32 %v5889_v31, %v603_v2 }
  0xe0   : > { %v6130_v34 = vsub.f32 %v5885_v29, %v602_v22  ;;  %v6133_v18 = vsub.f32 %v5887_v30, %v602_v22  ;;  %v711_v19 = vmul.f32 %v6121_v51, %v6121_v51  ;;  %v712_v27 = vmul.f32 %v6124_v23, %v6124_v23 }
  0xe1   : > { %v6147_v29 = vsub.f32 %v5891_v32, %v603_v2  ;;  %v709_v52 = vmul.f32 %v6144_v13, %v6144_v13 }
  0xe2   : > { %v707_v28 = vmul.f32 %v6130_v34, %v6130_v34  ;;  %v708_v12 = vmul.f32 %v6133_v18, %v6133_v18  ;;  %v786_v30 = vadd.f32 %v712_v27, %v711_v19 }
  0xe3   : > { %v534_v33 = vpop.xlane.xlu2 %533  ;;  %v710_v2 = vmul.f32 %v6147_v29, %v6147_v29 }
  0xe4   : > { %v780_v43 = vadd.f32 %v708_v12, %v707_v28  ;;  %v607_v25 = vmul.f32 %v6019_v53, %v534_v33  ;;  %v531_v44 = vpop.xlane.xlu1 %530 }
  0xe5   : > { %v528_v5 = vpop.xlane.xlu0 %527  ;;  %787 = vadd.xlane.f32.xlu1 %v786_v30  ;;  %v606_v22 = vmul.f32 %v6019_v53, %v531_v44  ;;  %v783_v30 = vadd.f32 %v710_v2, %v709_v52 }
  0xe6   : > { %v605_v6 = vmul.f32 %v6019_v53, %v528_v5  ;;  %781 = vadd.xlane.f32.xlu2 %v780_v43  ;;  %v6153_v31 = vsub.f32 %v5899_v36, %v607_v25  ;;  %v6156_v32 = vsub.f32 %v5901_v37, %v607_v25  ;;  %775 = vadd.xlane.f32.xlu0 %v774_v21 }
  0xe7   : > { %v6173_v27 = vsub.f32 %v5907_v40, %v606_v22 }
  0xe8   : > { %v6163_v62 = vsub.f32 %v5903_v38, %v605_v6  ;;  %v6166_v19 = vsub.f32 %v5905_v39, %v605_v6  ;;  %v717_v36 = vmul.f32 %v6153_v31, %v6153_v31  ;;  %v718_v37 = vmul.f32 %v6156_v32, %v6156_v32 }
  0xe9   : > { %v6180_v38 = vsub.f32 %v5909_v41, %v606_v22  ;;  %v715_v44 = vmul.f32 %v6173_v27, %v6173_v27 }
  0xea   : > { %v713_v28 = vmul.f32 %v6163_v62, %v6163_v62  ;;  %v714_v12 = vmul.f32 %v6166_v19, %v6166_v19  ;;  %v795_v39 = vadd.f32 %v718_v37, %v717_v36 }
  0xeb   : > { %8922 = vst [vmem:[#allocation46_spill] sm:$0xff] %v6180_v38  ;;  %v543_v21 = vpop.xlane.xlu2 %542  ;;  %v716_v52 = vmul.f32 %v6180_v38, %v6180_v38 }
  0xec   : > { %v789_v33 = vadd.f32 %v714_v12, %v713_v28  ;;  %v610_v43 = vmul.f32 %v6019_v53, %v543_v21  ;;  %v540_v5 = vpop.xlane.xlu1 %539 }
  0xed   : > { %v537_v25 = vpop.xlane.xlu0 %536  ;;  %796 = vadd.xlane.f32.xlu1 %v795_v39  ;;  %v609_v22 = vmul.f32 %v6019_v53, %v540_v5  ;;  %v792_v39 = vadd.f32 %v716_v52, %v715_v44 }
  0xee   : > { %v608_v40 = vmul.f32 %v6019_v53, %v537_v25  ;;  %790 = vadd.xlane.f32.xlu2 %v789_v33  ;;  %v6187_v6 = vsub.f32 %v5917_v45, %v610_v43  ;;  %v6190_v41 = vsub.f32 %v5919_v46, %v610_v43  ;;  %784 = vadd.xlane.f32.xlu0 %v783_v30 }
  0xef   : > { %v6210_v12 = vsub.f32 %v5925_v49, %v609_v22 }
  0xf0   : > { %v6196_v2 = vsub.f32 %v5921_v47, %v608_v40  ;;  %v6199_v36 = vsub.f32 %v5923_v48, %v608_v40  ;;  %v723_v37 = vmul.f32 %v6187_v6, %v6187_v6  ;;  %v724_v45 = vmul.f32 %v6190_v41, %v6190_v41 }
  0xf1   : > { %8923 = vst [vmem:[#allocation47_spill] sm:$0xff] %v6210_v12  ;;  %v6213_v47 = vsub.f32 %v5927_v50, %v609_v22  ;;  %v721_v44 = vmul.f32 %v6210_v12, %v6210_v12  ;;  %v8968_v12 = vld [vmem:[#allocation42_spill] sm:$0xff] }
  0xf2   : > { %v719_v46 = vmul.f32 %v6196_v2, %v6196_v2  ;;  %v720_v28 = vmul.f32 %v6199_v36, %v6199_v36  ;;  %v804_v48 = vadd.f32 %v724_v45, %v723_v37 }
  0xf3   : > { %8924 = vst [vmem:[#allocation48_spill] sm:$0xff] %v6213_v47  ;;  %v552_v30 = vpop.xlane.xlu2 %551  ;;  %v722_v22 = vmul.f32 %v6213_v47, %v6213_v47 }
  0xf4   : > { %v798_v21 = vadd.f32 %v720_v28, %v719_v46  ;;  %v613_v33 = vmul.f32 %v6019_v53, %v552_v30  ;;  %v549_v25 = vpop.xlane.xlu1 %548 }
  0xf5   : > { %v546_v43 = vpop.xlane.xlu0 %545  ;;  %805 = vadd.xlane.f32.xlu1 %v804_v48  ;;  %v612_v40 = vmul.f32 %v6019_v53, %v549_v25  ;;  %v801_v48 = vadd.f32 %v722_v22, %v721_v44 }
  0xf6   : > { %v611_v5 = vmul.f32 %v6019_v53, %v546_v43  ;;  %799 = vadd.xlane.f32.xlu2 %v798_v21  ;;  %v6219_v49 = vsub.f32 %v5935_v54, %v613_v33  ;;  %v6222_v50 = vsub.f32 %v5937_v55, %v613_v33  ;;  %793 = vadd.xlane.f32.xlu0 %v792_v39 }
  0xf7   : > { %v6239_v45 = vsub.f32 %v5943_v58, %v612_v40 }
  0xf8   : > { %8925 = vst [vmem:[#allocation49_spill] sm:$0xff] %v6219_v49  ;;  %v6229_v52 = vsub.f32 %v5939_v56, %v611_v5  ;;  %v6232_v37 = vsub.f32 %v5941_v57, %v611_v5  ;;  %v729_v54 = vmul.f32 %v6219_v49, %v6219_v49  ;;  %v730_v55 = vmul.f32 %v6222_v50, %v6222_v50 }
  0xf9   : > { %8926 = vst [vmem:[#allocation50_spill] sm:$0xff] %v6222_v50  ;;  %v6246_v56 = vsub.f32 %v5945_v59, %v612_v40  ;;  %v727_v25 = vmul.f32 %v6239_v45, %v6239_v45 }
  0xfa   : > { %8927 = vst [vmem:[#allocation51_spill] sm:$0xff] %v6229_v52  ;;  %v725_v46 = vmul.f32 %v6229_v52, %v6229_v52  ;;  %v726_v28 = vmul.f32 %v6232_v37, %v6232_v37  ;;  %v813_v57 = vadd.f32 %v730_v55, %v729_v54 }
  0xfb   : > { %8928 = vst [vmem:[#allocation52_spill] sm:$0xff] %v6232_v37  ;;  %v561_v39 = vpop.xlane.xlu2 %560  ;;  %v728_v44 = vmul.f32 %v6246_v56, %v6246_v56 }
  0xfc   : > { %8929 = vst [vmem:[#allocation53_spill] sm:$0xff] %v6239_v45  ;;  %v807_v30 = vadd.f32 %v726_v28, %v725_v46  ;;  %v616_v21 = vmul.f32 %v6019_v53, %v561_v39  ;;  %v558_v43 = vpop.xlane.xlu1 %557  ;;  %v8939_v45 = vld [vmem:[#allocation28_spill] sm:$0xff] }
  0xfd   : > { %8930 = vst [vmem:[#allocation54_spill] sm:$0xff] %v6246_v56  ;;  %v555_v33 = vpop.xlane.xlu0 %554  ;;  %814 = vadd.xlane.f32.xlu1 %v813_v57  ;;  %v615_v40 = vmul.f32 %v6019_v53, %v558_v43  ;;  %v810_v57 = vadd.f32 %v728_v44, %v727_v25  ;;  %v8937_v56 = vld [vmem:[#allocation27_spill] sm:$0xff]  ;;  %v8941_v44 = vld [vmem:[#allocation29_spill] sm:$0xff] }
  0xfe   : > { %v614_v58 = vmul.f32 %v6019_v53, %v555_v33  ;;  %808 = vadd.xlane.f32.xlu2 %v807_v30  ;;  %v6253_v5 = vsub.f32 %v5953_v63, %v616_v21  ;;  %v6256_v59 = vsub.f32 %v5955_v3, %v616_v21  ;;  %802 = vadd.xlane.f32.xlu0 %v801_v48 }
  0xff   : > { %v6276_v28 = vsub.f32 %v5961_v15, %v615_v40 }
 0x100   : > { %8931 = vst [vmem:[#allocation55_spill] sm:$0xff] %v6253_v5  ;;  %v6262_v22 = vsub.f32 %v5957_v7, %v614_v58  ;;  %v6265_v54 = vsub.f32 %v5959_v8, %v614_v58  ;;  %v735_v55 = vmul.f32 %v6253_v5, %v6253_v5  ;;  %v736_v63 = vmul.f32 %v6256_v59, %v6256_v59 }
 0x101   : > { %8932 = vst [vmem:[#allocation56_spill] sm:$0xff] %v6256_v59  ;;  %v6279_v7 = vsub.f32 %v5963_v16, %v615_v40  ;;  %v733_v25 = vmul.f32 %v6276_v28, %v6276_v28 }
 0x102   : > { %8933 = vst [vmem:[#allocation57_spill] sm:$0xff] %v6262_v22  ;;  %v731_v3 = vmul.f32 %v6262_v22, %v6262_v22  ;;  %v732_v46 = vmul.f32 %v6265_v54, %v6265_v54  ;;  %v822_v8 = vadd.f32 %v736_v63, %v735_v55  ;;  %v8943_v63 = vld [vmem:[#allocation30_spill] sm:$0xff] }
 0x103   : > { %8934 = vst [vmem:[#allocation58_spill] sm:$0xff] %v6265_v54  ;;  %v570_v48 = vpop.xlane.xlu2 %569  ;;  %v734_v40 = vmul.f32 %v6279_v7, %v6279_v7 }
 0x104   : > { %8935 = vst [vmem:[#allocation59_spill] sm:$0xff] %v6276_v28  ;;  %v816_v39 = vadd.f32 %v732_v46, %v731_v3  ;;  %v619_v30 = vmul.f32 %v6019_v53, %v570_v48  ;;  %v567_v33 = vpop.xlane.xlu1 %566  ;;  %v8945_v46 = vld [vmem:[#allocation31_spill] sm:$0xff] }
 0x105   : > { %8936 = vst [vmem:[#allocation60_spill] sm:$0xff] %v6279_v7  ;;  %v564_v21 = vpop.xlane.xlu0 %563  ;;  %823 = vadd.xlane.f32.xlu1 %v822_v8  ;;  %v618_v58 = vmul.f32 %v6019_v53, %v567_v33  ;;  %v819_v33 = vadd.f32 %v734_v40, %v733_v25 }
 0x106   : > { %v617_v43 = vmul.f32 %v6019_v53, %v564_v21  ;;  %817 = vadd.xlane.f32.xlu2 %v816_v39  ;;  %v6285_v15 = vsub.f32 %v8937_v56, %v619_v30  ;;  %v6288_v16 = vsub.f32 %v8939_v45, %v619_v30  ;;  %811 = vadd.xlane.f32.xlu0 %v810_v57  ;;  %v8947_v39 = vld [vmem:[#allocation32_spill] sm:$0xff] }
 0x107   : > { %v6305_v8 = vsub.f32 %v8945_v46, %v618_v58  ;;  %v6312_v30 = vsub.f32 %v8947_v39, %v618_v58  ;;  %v8951_v58 = vld [vmem:[#allocation34_spill] sm:$0xff] }
 0x108   : > { %8938 = vst [vmem:[#allocation27_spill] sm:$0xff] %v6285_v15  ;;  %v6295_v55 = vsub.f32 %v8941_v44, %v617_v43  ;;  %v6298_v3 = vsub.f32 %v8943_v63, %v617_v43  ;;  %v741_v56 = vmul.f32 %v6285_v15, %v6285_v15  ;;  %v742_v45 = vmul.f32 %v6288_v16, %v6288_v16 }
 0x109   : > { %8940 = vst [vmem:[#allocation28_spill] sm:$0xff] %v6288_v16  ;;  %v8949_v16 = vld [vmem:[#allocation33_spill] sm:$0xff]  ;;  %v740_v40 = vmul.f32 %v6312_v30, %v6312_v30 }
 0x10a   : > { %8942 = vst [vmem:[#allocation29_spill] sm:$0xff] %v6295_v55  ;;  %v737_v57 = vmul.f32 %v6295_v55, %v6295_v55  ;;  %v738_v48 = vmul.f32 %v6298_v3, %v6298_v3  ;;  %v831_v21 = vadd.f32 %v742_v45, %v741_v56  ;;  %v739_v55 = vmul.f32 %v6305_v8, %v6305_v8  ;;  %v8953_v56 = vld [vmem:[#allocation35_spill] sm:$0xff] }
 0x10b   : > { %8944 = vst [vmem:[#allocation30_spill] sm:$0xff] %v6298_v3  ;;  %v579_v43 = vpop.xlane.xlu2 %578 }
 0x10c   : > { %8946 = vst [vmem:[#allocation31_spill] sm:$0xff] %v6305_v8  ;;  %v825_v44 = vadd.f32 %v738_v48, %v737_v57  ;;  %v622_v63 = vmul.f32 %v6019_v53, %v579_v43  ;;  %v576_v28 = vpop.xlane.xlu1 %575 }
 0x10d   : > { %8948 = vst [vmem:[#allocation32_spill] sm:$0xff] %v6312_v30  ;;  %v573_v7 = vpop.xlane.xlu0 %572  ;;  %832 = vadd.xlane.f32.xlu1 %v831_v21  ;;  %v621_v25 = vmul.f32 %v6019_v53, %v576_v28 }
 0x10e   : > { %v620_v46 = vmul.f32 %v6019_v53, %v573_v7  ;;  %826 = vadd.xlane.f32.xlu2 %v825_v44  ;;  %v6319_v3 = vsub.f32 %v8949_v16, %v622_v63  ;;  %v6322_v39 = vsub.f32 %v8951_v58, %v622_v63  ;;  %820 = vadd.xlane.f32.xlu0 %v819_v33  ;;  %v8955_v7 = vld [vmem:[#allocation36_spill] sm:$0xff]  ;;  %v8957_v33 = vld [vmem:[#allocation37_spill] sm:$0xff]  ;;  %v8959_v44 = vld [vmem:[#allocation38_spill] sm:$0xff] }
 0x10f   : > { %v6342_v43 = vsub.f32 %v8957_v33, %v621_v25  ;;  %v6345_v63 = vsub.f32 %v8959_v44, %v621_v25  ;;  %v828_v58 = vadd.f32 %v740_v40, %v739_v55  ;;  %v8961_v25 = vld [vmem:[#allocation39_spill] sm:$0xff]  ;;  %v8963_v55 = vld [vmem:[#allocation40_spill] sm:$0xff] }
 0x110   : > { %8950 = vst [vmem:[#allocation33_spill] sm:$0xff] %v6319_v3  ;;  %v6328_v45 = vsub.f32 %v8953_v56, %v620_v46  ;;  %v6331_v57 = vsub.f32 %v8955_v7, %v620_v46  ;;  %v747_v48 = vmul.f32 %v6319_v3, %v6319_v3  ;;  %v748_v16 = vmul.f32 %v6322_v39, %v6322_v39 }
 0x111   : > { %8952 = vst [vmem:[#allocation34_spill] sm:$0xff] %v6322_v39  ;;  %v746_v33 = vmul.f32 %v6345_v63, %v6345_v63 }
 0x112   : > { %8954 = vst [vmem:[#allocation35_spill] sm:$0xff] %v6328_v45  ;;  %v743_v21 = vmul.f32 %v6328_v45, %v6328_v45  ;;  %v744_v28 = vmul.f32 %v6331_v57, %v6331_v57  ;;  %v840_v46 = vadd.f32 %v748_v16, %v747_v48 }
 0x113   : > { %8956 = vst [vmem:[#allocation36_spill] sm:$0xff] %v6331_v57  ;;  %v745_v57 = vmul.f32 %v6342_v43, %v6342_v43 }
 0x114   : > { %8958 = vst [vmem:[#allocation37_spill] sm:$0xff] %v6342_v43  ;;  %v834_v56 = vadd.f32 %v744_v28, %v743_v21  ;;  %v585_v30 = vpop.xlane.xlu1 %584 }
 0x115   : > { %8960 = vst [vmem:[#allocation38_spill] sm:$0xff] %v6345_v63  ;;  %v582_v7 = vpop.xlane.xlu0 %581  ;;  %841 = vadd.xlane.f32.xlu1 %v840_v46  ;;  %v624_v45 = vmul.f32 %v6019_v53, %v585_v30  ;;  %v837_v28 = vadd.f32 %v746_v33, %v745_v57 }
 0x116   : > { %v623_v8 = vmul.f32 %v6019_v53, %v582_v7  ;;  %835 = vadd.xlane.f32.xlu2 %v834_v56  ;;  %829 = vadd.xlane.f32.xlu0 %v828_v58 }
 0x117   : > { %v6364_v30 = vsub.f32 %v6011_v42, %v624_v45  ;;  %v6367_v21 = vsub.f32 %v6013_v35, %v624_v45 }
 0x118   : > { %v6354_v44 = vsub.f32 %v8961_v25, %v623_v8  ;;  %v6357_v40 = vsub.f32 %v8963_v55, %v623_v8 }
 0x119   : > { %8965 = vst [vmem:[#allocation61_spill] sm:$0xff] %v6364_v30  ;;  %v751_v8 = vmul.f32 %v6364_v30, %v6364_v30  ;;  %v752_v58 = vmul.f32 %v6367_v21, %v6367_v21 }
 0x11a   : > { %8962 = vst [vmem:[#allocation39_spill] sm:$0xff] %v6354_v44  ;;  %v749_v48 = vmul.f32 %v6354_v44, %v6354_v44  ;;  %v750_v16 = vmul.f32 %v6357_v40, %v6357_v40 }
 0x11b   : > { %8964 = vst [vmem:[#allocation40_spill] sm:$0xff] %v6357_v40  ;;  %v846_v56 = vadd.f32 %v752_v58, %v751_v8 }
 0x11c   : > { %8966 = vst [vmem:[#allocation62_spill] sm:$0xff] %v6367_v21  ;;  %v843_v46 = vadd.f32 %v750_v16, %v749_v48  ;;  %v1367_v21 = vld [vmem:[#allocation8] sm:$0x3] }
 0x11d   : > { %v6393_v63 = vperm.slane %v1367_v21, 1 }
 0x11e   : > { %844 = vadd.xlane.f32.xlu2 %v843_v46  ;;  %838 = vadd.xlane.f32.xlu0 %v837_v28 }
 0x126   : > { %847 = vadd.xlane.f32.xlu0 %v846_v56 }
 0x140   : > { %v761_v7 = vpop.xlane.xlu1 %760 }
 0x141   : > { %v755_v25 = vpop.xlane.xlu2 %754  ;;  %v851_v42 = vmul.f32 %v761_v7, %v6019_v53 }
 0x142   : > { %v849_v55 = vmul.f32 %v755_v25, %v6019_v53  ;;  %v1297_v25 = vld [vmem:[#allocation6] sm:$0x3] }
 0x143   : > { %v883_v35 = vadd.f32 1e-05, %v851_v42 }
 0x144   : > { %v881_v45 = vadd.f32 1e-05, %v849_v55 }
 0x145   : > { %5020 = vrsqrt.f32 %v883_v35  ;;  %vm939_vm1 = vweird.f32 %v883_v35 }
 0x146   : > { %5022 = vrsqrt.f32 %v881_v45  ;;  %vm919_vm2 = vweird.f32 %v881_v45 }
 0x148   : > { %v770_v57 = vpop.xlane.xlu1 %769 }
 0x149   : > { %v764_v33 = vpop.xlane.xlu2 %763  ;;  %v854_v48 = vmul.f32 %v770_v57, %v6019_v53  ;;  %v758_v28 = vpop.xlane.xlu0 %757 }
 0x14a   : > { %v852_v16 = vmul.f32 %v764_v33, %v6019_v53  ;;  %v850_v46 = vmul.f32 %v758_v28, %v6019_v53  ;;  %v6386_v33 = vperm.slane %v1297_v25, 0  ;;  %v6388_v28 = vperm.slane %v1297_v25, 1 }
 0x14b   : > { %v5021_v8 = vpop.eup %5020  ;;  %v6378_v58 = vadd.f32 1e-05, %v854_v48 }
 0x14c   : > { %v6380_v56 = vadd.f32 1e-05, %v852_v16  ;;  %v5023_v7 = vpop.eup %5022  ;;  %v934_v42 = vmul.f32 %v5021_v8, %v883_v35  ;;  %v6382_v55 = vadd.f32 1e-05, %v850_v46  ;;  %v6391_v16 = vperm.slane %v1367_v21, 0  ;;  %v8967_v35 = vld [vmem:[#allocation41_spill] sm:$0xff] }
 0x14d   : > { %v914_v30 = vmul.f32 %v5023_v7, %v881_v45  ;;  %5024 = vrsqrt.f32 %v6378_v58  ;;  %vm940_vm3 = vweird.f32 %v5021_v8  ;;  %vm920_vm4 = vweird.f32 %v5023_v7 }
 0x14e   : > { %v935_v57 = vmul.f32 %v5021_v8, %v934_v42  ;;  %5026 = vrsqrt.f32 %v6380_v56  ;;  %vm969_vm5 = vweird.f32 %v6378_v58  ;;  %vm949_vm6 = vweird.f32 %v6380_v56  ;;  %vm941_vm8 = vmor %vm939_vm1, %vm940_vm3 }
 0x14f   : > { %v915_v48 = vmul.f32 %v5023_v7, %v914_v30  ;;  %5028 = vrsqrt.f32 %v6382_v55  ;;  %vm921_vm9 = vmor %vm919_vm2, %vm920_vm4  ;;  %vm929_vm11 = vweird.f32 %v6382_v55 }
 0x150   : > { %v936_v46 = vmul.f32 0.5, %v935_v57  ;;  %v779_v43 = vpop.xlane.xlu1 %778 }
 0x151   : > { %v773_v40 = vpop.xlane.xlu2 %772  ;;  %v916_v44 = vmul.f32 0.5, %v915_v48  ;;  %v857_v42 = vmul.f32 %v779_v43, %v6019_v53  ;;  %v767_v3 = vpop.xlane.xlu0 %766 }
 0x152   : > { %v855_v39 = vmul.f32 %v773_v40, %v6019_v53  ;;  %v937_v25 = vsub.f32 1.5, %v936_v46  ;;  %v853_v30 = vmul.f32 %v767_v3, %v6019_v53 }
 0x153   : > { %v5025_v15 = vpop.eup %5024  ;;  %v917_v54 = vsub.f32 1.5, %v916_v44  ;;  %v6400_v21 = vadd.f32 1e-05, %v857_v42 }
 0x154   : > { %v5027_v57 = vpop.eup %5026  ;;  %v938_v48 = vmul.f32 %v5021_v8, %v937_v25  ;;  %v964_v43 = vmul.f32 %v5025_v15, %v6378_v58  ;;  %vm970_vm7 = vweird.f32 %v5025_v15  ;;  %v6403_v40 = vadd.f32 1e-05, %v855_v39 }
 0x155   : > { %v5029_v46 = vpop.eup %5028  ;;  %v918_v22 = vmul.f32 %v5023_v7, %v917_v54  ;;  %v944_v3 = vmul.f32 %v5027_v57, %v6380_v56  ;;  %5030 = vrsqrt.f32 %v6400_v21  ;;  %v6408_v44 = vadd.f32 1e-05, %v853_v30  ;;  %v8969_v30 = vld [vmem:[#allocation43_spill] sm:$0xff]  ;;  %vm971_vm13 = vmor %vm969_vm5, %vm970_vm7  ;;  %v8970_v56 = vld [vmem:[#allocation44_spill] sm:$0xff] }
 0x156   : > { %v942_v59 = vsel %vm941_vm8, %v5021_v8, %v938_v48  ;;  %v965_v42 = vmul.f32 %v5025_v15, %v964_v43  ;;  %vm950_vm10 = vweird.f32 %v5027_v57  ;;  %v924_v25 = vmul.f32 %v5029_v46, %v6382_v55 }
 0x157   : > { %v1237_v39 = vmul.f32 %v942_v59, %v6024_v60  ;;  %v1238_v54 = vmul.f32 %v942_v59, %v8967_v35  ;;  %v922_v5 = vsel %vm921_vm9, %v5023_v7, %v918_v22  ;;  %v945_v47 = vmul.f32 %v5027_v57, %v944_v3  ;;  %vm951_vm15 = vmor %vm949_vm6, %vm950_vm10 }
 0x158   : > { %v1233_v37 = vmul.f32 %v922_v5, %v8968_v12  ;;  %v1234_v52 = vmul.f32 %v922_v5, %v8969_v30  ;;  %v966_v8 = vmul.f32 0.5, %v965_v42  ;;  %v925_v48 = vmul.f32 %v5029_v46, %v924_v25  ;;  %v788_v35 = vpop.xlane.xlu1 %787 }
 0x159   : > { %v1307_v45 = vmul.f32 %v6386_v33, %v1237_v39  ;;  %v1308_v43 = vmul.f32 %v6388_v28, %v1238_v54  ;;  %v946_v50 = vmul.f32 0.5, %v945_v47  ;;  %vm930_vm12 = vweird.f32 %v5029_v46 }
 0x15a   : > { %v1303_v49 = vmul.f32 %v6386_v33, %v1233_v37  ;;  %v1304_v60 = vmul.f32 %v6388_v28, %v1234_v52  ;;  %v967_v38 = vsub.f32 1.5, %v966_v8  ;;  %v926_v59 = vmul.f32 0.5, %v925_v48  ;;  %vm931_vm1 = vmor %vm929_vm11, %vm930_vm12 }
 0x15b   : > { %v6422_v22 = vpop.eup %5030  ;;  %v1377_v12 = vadd.f32 %v6391_v16, %v1307_v45  ;;  %v1378_v5 = vadd.f32 %v6393_v63, %v1308_v43  ;;  %v947_v7 = vsub.f32 1.5, %v946_v50  ;;  %5032 = vrsqrt.f32 %v6403_v40 }
 0x15c   : > { %v1373_v47 = vadd.f32 %v6391_v16, %v1303_v49  ;;  %v1374_v37 = vadd.f32 %v6393_v63, %v1304_v60  ;;  %v968_v52 = vmul.f32 %v5025_v15, %v967_v38  ;;  %v927_v3 = vsub.f32 1.5, %v926_v59  ;;  %v8971_v60 = vld [vmem:[#allocation45_spill] sm:$0xff] }
 0x15d   : > { %v1439_v42 = vpack.c.bf16 %v1378_v5, %v1377_v12  ;;  %v948_v25 = vmul.f32 %v5027_v57, %v947_v7  ;;  %v994_v39 = vmul.f32 %v6422_v22, %v6400_v21  ;;  %vm999_vm14 = vweird.f32 %v6400_v21  ;;  %v782_v7 = vpop.xlane.xlu2 %781 }
 0x15e   : > { %v1437_v54 = vpack.c.bf16 %v1374_v37, %v1373_v47  ;;  %v972_v58 = vsel %vm971_vm13, %v5025_v15, %v968_v52  ;;  %v928_v50 = vmul.f32 %v5029_v46, %v927_v3  ;;  %vm1000_vm0 = vweird.f32 %v6422_v22  ;;  %v776_v3 = vpop.xlane.xlu0 %775 }
 0x15f   : > { %1471 = vst [vmem:[#allocation2 + $0x10] sm:$0xff] %v1439_v42  ;;  %v1243_v38 = vmul.f32 %v972_v58, %v6048_v24  ;;  %v1244_v49 = vmul.f32 %v972_v58, %v6051_v17  ;;  %v952_v30 = vsel %vm951_vm15, %v5027_v57, %v948_v25  ;;  %v995_v8 = vmul.f32 %v6422_v22, %v994_v39  ;;  %vm1001_vm2 = vmor %vm999_vm14, %vm1000_vm0 }
 0x160   : > { %1469 = vst [vmem:[#allocation2] sm:$0xff] %v1437_v54  ;;  %v1239_v15 = vmul.f32 %v952_v30, %v6054_v61  ;;  %v1240_v48 = vmul.f32 %v952_v30, %v8970_v56  ;;  %v932_v45 = vsel %vm931_vm1, %v5029_v46, %v928_v50  ;;  %5034 = vrsqrt.f32 %v6408_v44 }
 0x161   : > { %v5033_v43 = vpop.eup %5032  ;;  %v1313_v24 = vmul.f32 %v6386_v33, %v1243_v38  ;;  %v1314_v17 = vmul.f32 %v6388_v28, %v1244_v49  ;;  %v1235_v57 = vmul.f32 %v932_v45, %v6060_v26  ;;  %v1236_v55 = vmul.f32 %v932_v45, %v8971_v60  ;;  %v797_v45 = vpop.xlane.xlu1 %796 }
 0x162   : > { %v1309_v59 = vmul.f32 %v6386_v33, %v1239_v15  ;;  %v1310_v12 = vmul.f32 %v6388_v28, %v1240_v48  ;;  %v996_v5 = vmul.f32 0.5, %v995_v8  ;;  %v974_v61 = vmul.f32 %v5033_v43, %v6403_v40 }
 0x163   : > { %v1383_v46 = vadd.f32 %v6391_v16, %v1313_v24  ;;  %v1384_v47 = vadd.f32 %v6393_v63, %v1314_v17  ;;  %v1305_v37 = vmul.f32 %v6386_v33, %v1235_v57  ;;  %v1306_v52 = vmul.f32 %v6388_v28, %v1236_v55 }
 0x164   : > { %v1379_v26 = vadd.f32 %v6391_v16, %v1309_v59  ;;  %v1380_v42 = vadd.f32 %v6393_v63, %v1310_v12  ;;  %v997_v25 = vsub.f32 1.5, %v996_v5  ;;  %v975_v39 = vmul.f32 %v5033_v43, %v974_v61 }
 0x165   : > { %v1442_v54 = vpack.c.bf16 %v1384_v47, %v1383_v46  ;;  %v1375_v58 = vadd.f32 %v6391_v16, %v1305_v37  ;;  %v1376_v50 = vadd.f32 %v6393_v63, %v1306_v52  ;;  %vm979_vm3 = vweird.f32 %v6403_v40  ;;  %v791_v47 = vpop.xlane.xlu2 %790 }
 0x166   : > { %v5035_v38 = vpop.eup %5034  ;;  %v1440_v49 = vpack.c.bf16 %v1380_v42, %v1379_v26  ;;  %v998_v30 = vmul.f32 %v6422_v22, %v997_v25  ;;  %v976_v8 = vmul.f32 0.5, %v975_v39  ;;  %vm980_vm4 = vweird.f32 %v5033_v43  ;;  %v785_v42 = vpop.xlane.xlu0 %784 }
 0x167   : > { %1474 = vst [vmem:[#allocation2 + $0x28] sm:$0xff] %v1442_v54  ;;  %v1438_v15 = vpack.c.bf16 %v1376_v50, %v1375_v58  ;;  %v954_v56 = vmul.f32 %v5035_v38, %v6408_v44  ;;  %v860_v48 = vmul.f32 %v788_v35, %v6019_v53  ;;  %v858_v17 = vmul.f32 %v782_v7, %v6019_v53  ;;  %vm981_vm5 = vmor %vm979_vm3, %vm980_vm4 }
 0x168   : > { %1472 = vst [vmem:[#allocation2 + $0x18] sm:$0xff] %v1440_v49  ;;  %v1002_v24 = vsel %vm1001_vm2, %v6422_v22, %v998_v30  ;;  %v977_v21 = vsub.f32 1.5, %v976_v8  ;;  %v856_v57 = vmul.f32 %v776_v3, %v6019_v53  ;;  %v863_v22 = vmul.f32 %v797_v45, %v6019_v53 }
 0x169   : > { %1470 = vst [vmem:[#allocation2 + $0x8] sm:$0xff] %v1438_v15  ;;  %v1249_v60 = vmul.f32 %v1002_v24, %v6087_v0  ;;  %v1250_v55 = vmul.f32 %v1002_v24, %v6090_v1  ;;  %v955_v59 = vmul.f32 %v5035_v38, %v954_v56  ;;  %v6476_v12 = vadd.f32 1e-05, %v860_v48  ;;  %v806_v15 = vpop.xlane.xlu1 %805 }
 0x16a   : > { %v978_v5 = vmul.f32 %v5033_v43, %v977_v21  ;;  %v6478_v61 = vadd.f32 1e-05, %v858_v17  ;;  %v6480_v35 = vadd.f32 1e-05, %v856_v57  ;;  %vm960_vm6 = vweird.f32 %v5035_v38 }
 0x16b   : > { %v1319_v46 = vmul.f32 %v6386_v33, %v1249_v60  ;;  %v1320_v7 = vmul.f32 %v6388_v28, %v1250_v55  ;;  %v956_v0 = vmul.f32 0.5, %v955_v59  ;;  %5036 = vrsqrt.f32 %v6476_v12 }
 0x16c   : > { %v982_v1 = vsel %vm981_vm5, %v5033_v43, %v978_v5  ;;  %5038 = vrsqrt.f32 %v6478_v61  ;;  %v6495_v40 = vadd.f32 1e-05, %v863_v22  ;;  %v861_v58 = vmul.f32 %v791_v47, %v6019_v53 }
 0x16d   : > { %v1389_v37 = vadd.f32 %v6391_v16, %v1319_v46  ;;  %v1390_v52 = vadd.f32 %v6393_v63, %v1320_v7  ;;  %v1245_v3 = vmul.f32 %v982_v1, %v6097_v9  ;;  %v1246_v26 = vmul.f32 %v982_v1, %v6100_v10  ;;  %v800_v7 = vpop.xlane.xlu2 %799 }
 0x16e   : > { %v957_v25 = vsub.f32 1.5, %v956_v0  ;;  %5040 = vrsqrt.f32 %v6480_v35  ;;  %vm959_vm7 = vweird.f32 %v6408_v44  ;;  %v859_v9 = vmul.f32 %v785_v42, %v6019_v53  ;;  %v6532_v42 = vpop.xlane.xlu0 %793 }
 0x16f   : > { %v1445_v39 = vpack.c.bf16 %v1390_v52, %v1389_v37  ;;  %v1315_v43 = vmul.f32 %v6386_v33, %v1245_v3  ;;  %v1316_v54 = vmul.f32 %v6388_v28, %v1246_v26  ;;  %5042 = vrsqrt.f32 %v6495_v40  ;;  %vm961_vm8 = vmor %vm959_vm7, %vm960_vm6 }
 0x170   : > { %v958_v50 = vmul.f32 %v5035_v38, %v957_v25  ;;  %v6506_v8 = vadd.f32 1e-05, %v861_v58  ;;  %vm1029_vm9 = vweird.f32 %v6476_v12  ;;  %v6510_v44 = vadd.f32 1e-05, %v859_v9 }
 0x171   : > { %v5037_v10 = vpop.eup %5036  ;;  %1477 = vst [vmem:[#allocation2 + $0x40] sm:$0xff] %v1445_v39  ;;  %v1385_v49 = vadd.f32 %v6391_v16, %v1315_v43  ;;  %v1386_v30 = vadd.f32 %v6393_v63, %v1316_v54  ;;  %vm1009_vm10 = vweird.f32 %v6478_v61  ;;  %vm989_vm11 = vweird.f32 %v6480_v35 }
 0x172   : > { %v5039_v56 = vpop.eup %5038  ;;  %v962_v48 = vsel %vm961_vm8, %v5035_v38, %v958_v50  ;;  %v1024_v45 = vmul.f32 %v5037_v10, %v6476_v12  ;;  %5044 = vrsqrt.f32 %v6506_v8  ;;  %v866_v38 = vmul.f32 %v806_v15, %v6019_v53 }
 0x173   : > { %v1443_v24 = vpack.c.bf16 %v1386_v30, %v1385_v49  ;;  %v1241_v21 = vmul.f32 %v962_v48, %v6078_v14  ;;  %v1242_v17 = vmul.f32 %v962_v48, %v6081_v4  ;;  %v1004_v57 = vmul.f32 %v5039_v56, %v6478_v61 }
 0x174   : > { %v5041_v60 = vpop.eup %5040  ;;  %v1025_v55 = vmul.f32 %v5037_v10, %v1024_v45  ;;  %vm1030_vm12 = vweird.f32 %v5037_v10  ;;  %vm1059_vm13 = vweird.f32 %v6495_v40  ;;  %5046 = vrsqrt.f32 %v6510_v44 }
 0x175   : > { %1475 = vst [vmem:[#allocation2 + $0x30] sm:$0xff] %v1443_v24  ;;  %v1311_v59 = vmul.f32 %v6386_v33, %v1241_v21  ;;  %v1312_v5 = vmul.f32 %v6388_v28, %v1242_v17  ;;  %v1005_v22 = vmul.f32 %v5039_v56, %v1004_v57  ;;  %v984_v14 = vmul.f32 %v5041_v60, %v6480_v35  ;;  %v6522_v4 = vpop.eup %5042  ;;  %vm6536_vm15 = vmor %vm1029_vm9, %vm1030_vm12 }
 0x176   : > { %v1026_v46 = vmul.f32 0.5, %v1025_v55  ;;  %vm1010_vm14 = vweird.f32 %v5039_v56  ;;  %v1054_v3 = vmul.f32 %v6522_v4, %v6495_v40  ;;  %v6530_v26 = vadd.f32 1e-05, %v866_v38 }
 0x177   : > { %v1381_v0 = vadd.f32 %v6391_v16, %v1311_v59  ;;  %v1382_v1 = vadd.f32 %v6393_v63, %v1312_v5  ;;  %v1006_v47 = vmul.f32 0.5, %v1005_v22  ;;  %v985_v37 = vmul.f32 %v5041_v60, %v984_v14  ;;  %vm1011_vm3 = vmor %vm1009_vm10, %vm1010_vm14 }
 0x178   : > { %v1027_v52 = vsub.f32 1.5, %v1026_v46  ;;  %v864_v58 = vmul.f32 %v800_v7, %v6019_v53  ;;  %v6541_v50 = vpop.eup %5044  ;;  %vm990_vm0 = vweird.f32 %v5041_v60  ;;  %v1055_v49 = vmul.f32 %v6522_v4, %v1054_v3 }
 0x179   : > { %v1441_v25 = vpack.c.bf16 %v1382_v1, %v1381_v0  ;;  %v1007_v43 = vsub.f32 1.5, %v1006_v47  ;;  %v986_v54 = vmul.f32 0.5, %v985_v37  ;;  %vm1060_vm1 = vweird.f32 %v6522_v4  ;;  %vm991_vm5 = vmor %vm989_vm11, %vm990_vm0  ;;  %v803_v37 = vpop.xlane.xlu0 %802 }
 0x17a   : > { %v1028_v9 = vmul.f32 %v5037_v10, %v1027_v52  ;;  %v1034_v12 = vmul.f32 %v6541_v50, %v6506_v8  ;;  %vm1039_vm2 = vweird.f32 %v6506_v8  ;;  %5048 = vrsqrt.f32 %v6530_v26  ;;  %v6549_v48 = vpop.eup %5046  ;;  %vm1061_vm6 = vmor %vm1059_vm13, %vm1060_vm1 }
 0x17b   : > { %1473 = vst [vmem:[#allocation2 + $0x20] sm:$0xff] %v1441_v25  ;;  %v1008_v30 = vmul.f32 %v5039_v56, %v1007_v43  ;;  %v987_v15 = vsub.f32 1.5, %v986_v54  ;;  %v1056_v24 = vmul.f32 0.5, %v1055_v49  ;;  %vm1040_vm4 = vweird.f32 %v6541_v50  ;;  %v815_v49 = vpop.xlane.xlu1 %814 }
 0x17c   : > { %v1032_v45 = vsel %vm6536_vm15, %v5037_v10, %v1028_v9  ;;  %v6557_v21 = vadd.f32 1e-05, %v864_v58  ;;  %v1035_v10 = vmul.f32 %v6541_v50, %v1034_v12  ;;  %vm1019_vm7 = vweird.f32 %v6510_v44  ;;  %vm1041_vm8 = vmor %vm1039_vm2, %vm1040_vm4 }
 0x17d   : > { %v1255_v17 = vmul.f32 %v1032_v45, %v6121_v51  ;;  %v1256_v57 = vmul.f32 %v1032_v45, %v6124_v23  ;;  %v1012_v55 = vsel %vm1011_vm3, %v5039_v56, %v1008_v30  ;;  %v988_v38 = vmul.f32 %v5041_v60, %v987_v15  ;;  %v809_v30 = vpop.xlane.xlu2 %808 }
 0x17e   : > { %v1251_v59 = vmul.f32 %v1012_v55, %v6130_v34  ;;  %v1252_v5 = vmul.f32 %v1012_v55, %v6133_v18  ;;  %v1057_v61 = vsub.f32 1.5, %v1056_v24  ;;  %v1014_v23 = vmul.f32 %v6549_v48, %v6510_v44 }
 0x17f   : > { %v1325_v22 = vmul.f32 %v6386_v33, %v1255_v17  ;;  %v1326_v14 = vmul.f32 %v6388_v28, %v1256_v57  ;;  %v992_v51 = vsel %vm991_vm5, %v5041_v60, %v988_v38  ;;  %v1036_v1 = vmul.f32 0.5, %v1035_v10 }
 0x180   : > { %v1321_v56 = vmul.f32 %v6386_v33, %v1251_v59  ;;  %v1322_v34 = vmul.f32 %v6388_v28, %v1252_v5  ;;  %v1247_v18 = vmul.f32 %v992_v51, %v6107_v11  ;;  %v1248_v35 = vmul.f32 %v992_v51, %v6114_v20  ;;  %v6579_v46 = vpop.eup %5048 }
 0x181   : > { %v1395_v60 = vadd.f32 %v6391_v16, %v1325_v22  ;;  %v1396_v7 = vadd.f32 %v6393_v63, %v1326_v14  ;;  %v1058_v0 = vmul.f32 %v6522_v4, %v1057_v61  ;;  %v1037_v25 = vsub.f32 1.5, %v1036_v1  ;;  %v6632_v44 = vpop.xlane.xlu0 %811 }
 0x182   : > { %v1391_v11 = vadd.f32 %v6391_v16, %v1321_v56  ;;  %v1392_v20 = vadd.f32 %v6393_v63, %v1322_v34  ;;  %v1317_v47 = vmul.f32 %v6386_v33, %v1247_v18  ;;  %v1318_v40 = vmul.f32 %v6388_v28, %v1248_v35 }
 0x183   : > { %v1448_v52 = vpack.c.bf16 %v1396_v7, %v1395_v60  ;;  %v1062_v3 = vsel %vm1061_vm6, %v6522_v4, %v1058_v0  ;;  %v1015_v39 = vmul.f32 %v6549_v48, %v1014_v23  ;;  %v1038_v12 = vmul.f32 %v6541_v50, %v1037_v25 }
 0x184   : > { %v1446_v43 = vpack.c.bf16 %v1392_v20, %v1391_v11  ;;  %v1387_v54 = vadd.f32 %v6391_v16, %v1317_v47  ;;  %v1388_v58 = vadd.f32 %v6393_v63, %v1318_v40  ;;  %v1261_v9 = vmul.f32 %v1062_v3, %v6153_v31 }
 0x185   : > { %1480 = vst [vmem:[#allocation2 + $0x58] sm:$0xff] %v1448_v52  ;;  %v1262_v15 = vmul.f32 %v1062_v3, %v6156_v32  ;;  %v1016_v45 = vmul.f32 0.5, %v1015_v39  ;;  %v862_v4 = vmul.f32 %v6532_v42, %v6019_v53  ;;  %vm1020_vm9 = vweird.f32 %v6549_v48  ;;  %v818_v47 = vpop.xlane.xlu2 %817 }
 0x186   : > { %1478 = vst [vmem:[#allocation2 + $0x48] sm:$0xff] %v1446_v43  ;;  %v1444_v24 = vpack.c.bf16 %v1388_v58, %v1387_v54  ;;  %v1331_v17 = vmul.f32 %v6386_v33, %v1261_v9  ;;  %v1084_v31 = vmul.f32 %v6579_v46, %v6530_v26  ;;  %v1042_v57 = vsel %vm1041_vm8, %v6541_v50, %v1038_v12  ;;  %vm1021_vm11 = vmor %vm1019_vm7, %vm1020_vm9 }
 0x187   : > { %v1332_v32 = vmul.f32 %v6388_v28, %v1262_v15  ;;  %v1017_v55 = vsub.f32 1.5, %v1016_v45  ;;  %5050 = vrsqrt.f32 %v6557_v21  ;;  %v1257_v38 = vmul.f32 %v1042_v57, %v6163_v62 }
 0x188   : > { %1476 = vst [vmem:[#allocation2 + $0x38] sm:$0xff] %v1444_v24  ;;  %v1401_v42 = vadd.f32 %v6391_v16, %v1331_v17  ;;  %v1258_v8 = vmul.f32 %v1042_v57, %v6166_v19  ;;  %v1085_v59 = vmul.f32 %v6579_v46, %v1084_v31  ;;  %vm1089_vm10 = vweird.f32 %v6530_v26 }
 0x189   : > { %v1402_v5 = vadd.f32 %v6393_v63, %v1332_v32  ;;  %v1018_v61 = vmul.f32 %v6549_v48, %v1017_v55  ;;  %v6616_v10 = vadd.f32 1e-05, %v862_v4  ;;  %v1327_v50 = vmul.f32 %v6386_v33, %v1257_v38 }
 0x18a   : > { %v1328_v22 = vmul.f32 %v6388_v28, %v1258_v8  ;;  %v1086_v62 = vmul.f32 0.5, %v1085_v59  ;;  %v869_v19 = vmul.f32 %v815_v49, %v6019_v53  ;;  %vm1090_vm12 = vweird.f32 %v6579_v46 }
 0x18b   : > { %v1451_v14 = vpack.c.bf16 %v1402_v5, %v1401_v42  ;;  %v1022_v51 = vsel %vm1021_vm11, %v6549_v48, %v1018_v61  ;;  %5052 = vrsqrt.f32 %v6616_v10  ;;  %v1397_v23 = vadd.f32 %v6391_v16, %v1327_v50  ;;  %vm1091_vm13 = vmor %vm1089_vm10, %vm1090_vm12  ;;  %v6676_v42 = vpop.xlane.xlu0 %820 }
 0x18c   : > { %v1398_v56 = vadd.f32 %v6393_v63, %v1328_v22  ;;  %v1253_v34 = vmul.f32 %v1022_v51, %v6144_v13  ;;  %v1254_v18 = vmul.f32 %v1022_v51, %v6147_v29  ;;  %v1087_v60 = vsub.f32 1.5, %v1086_v62  ;;  %v824_v29 = vpop.xlane.xlu1 %823 }
 0x18d   : > { %v5051_v35 = vpop.eup %5050  ;;  %1483 = vst [vmem:[#allocation2 + $0x70] sm:$0xff] %v1451_v14  ;;  %v6634_v7 = vadd.f32 1e-05, %v869_v19  ;;  %v867_v48 = vmul.f32 %v809_v30, %v6019_v53  ;;  %v865_v0 = vmul.f32 %v803_v37, %v6019_v53  ;;  %v872_v54 = vmul.f32 %v824_v29, %v6019_v53 }
 0x18e   : > { %v1449_v1 = vpack.c.bf16 %v1398_v56, %v1397_v23  ;;  %v1323_v11 = vmul.f32 %v6386_v33, %v1253_v34  ;;  %v1324_v20 = vmul.f32 %v6388_v28, %v1254_v18  ;;  %v1064_v13 = vmul.f32 %v5051_v35, %v6557_v21 }
 0x18f   : > { %v1088_v40 = vmul.f32 %v6579_v46, %v1087_v60  ;;  %5054 = vrsqrt.f32 %v6634_v7  ;;  %v6649_v25 = vadd.f32 1e-05, %v867_v48  ;;  %v6654_v43 = vadd.f32 1e-05, %v865_v0  ;;  %v6714_v0 = vpop.xlane.xlu2 %826 }
 0x190   : > { %1481 = vst [vmem:[#allocation2 + $0x60] sm:$0xff] %v1449_v1  ;;  %v1393_v37 = vadd.f32 %v6391_v16, %v1323_v11  ;;  %v1394_v52 = vadd.f32 %v6393_v63, %v1324_v20  ;;  %v1065_v3 = vmul.f32 %v5051_v35, %v1064_v13  ;;  %v870_v58 = vmul.f32 %v818_v47, %v6019_v53  ;;  %v8974_v11 = vld [vmem:[#allocation46_spill] sm:$0xff] }
 0x191   : > { %v6651_v39 = vpop.eup %5052  ;;  %v1092_v26 = vsel %vm1091_vm13, %v6579_v46, %v1088_v40  ;;  %vm1069_vm14 = vweird.f32 %v6557_v21  ;;  %vm1070_vm15 = vweird.f32 %v5051_v35  ;;  %5056 = vrsqrt.f32 %v6649_v25 }
 0x192   : > { %v1447_v9 = vpack.c.bf16 %v1394_v52, %v1393_v37  ;;  %v1267_v49 = vmul.f32 %v1092_v26, %v6187_v6  ;;  %v1268_v30 = vmul.f32 %v1092_v26, %v6190_v41  ;;  %v1066_v15 = vmul.f32 0.5, %v1065_v3  ;;  %vm1071_vm1 = vmor %vm1069_vm14, %vm1070_vm15 }
 0x193   : > { %v1044_v12 = vmul.f32 %v6651_v39, %v6616_v10  ;;  %5058 = vrsqrt.f32 %v6654_v43  ;;  %vm1049_vm0 = vweird.f32 %v6616_v10  ;;  %v6669_v24 = vadd.f32 1e-05, %v872_v54 }
 0x194   : > { %1479 = vst [vmem:[#allocation2 + $0x50] sm:$0xff] %v1447_v9  ;;  %v1337_v46 = vmul.f32 %v6386_v33, %v1267_v49  ;;  %v1338_v45 = vmul.f32 %v6388_v28, %v1268_v30  ;;  %v1067_v4 = vsub.f32 1.5, %v1066_v15  ;;  %v6671_v17 = vadd.f32 1e-05, %v870_v58  ;;  %v8975_v58 = vld [vmem:[#allocation49_spill] sm:$0xff]  ;;  %v8976_v49 = vld [vmem:[#allocation50_spill] sm:$0xff] }
 0x195   : > { %v5055_v6 = vpop.eup %5054  ;;  %v1045_v41 = vmul.f32 %v6651_v39, %v1044_v12  ;;  %vm1050_vm2 = vweird.f32 %v6651_v39  ;;  %vm1119_vm3 = vweird.f32 %v6634_v7  ;;  %5060 = vrsqrt.f32 %v6669_v24 }
 0x196   : > { %v1407_v31 = vadd.f32 %v6391_v16, %v1337_v46  ;;  %v1408_v32 = vadd.f32 %v6393_v63, %v1338_v45  ;;  %v1068_v57 = vmul.f32 %v5051_v35, %v1067_v4  ;;  %v1114_v55 = vmul.f32 %v5055_v6, %v6634_v7  ;;  %vm1051_vm6 = vmor %vm1049_vm0, %vm1050_vm2 }
 0x197   : > { %v1046_v38 = vmul.f32 0.5, %v1045_v41  ;;  %vm1099_vm4 = vweird.f32 %v6649_v25  ;;  %v5057_v61 = vpop.eup %5056  ;;  %5062 = vrsqrt.f32 %v6671_v17  ;;  %vm1120_vm5 = vweird.f32 %v5055_v6 }
 0x198   : > { %v1454_v8 = vpack.c.bf16 %v1408_v32, %v1407_v31  ;;  %v1072_v59 = vsel %vm1071_vm1, %v5051_v35, %v1068_v57  ;;  %v1115_v5 = vmul.f32 %v5055_v6, %v1114_v55  ;;  %v1094_v14 = vmul.f32 %v5057_v61, %v6649_v25  ;;  %vm1121_vm11 = vmor %vm1119_vm3, %vm1120_vm5  ;;  %v833_v25 = vpop.xlane.xlu1 %832 }
 0x199   : > { %v1263_v50 = vmul.f32 %v1072_v59, %v6196_v2  ;;  %v1264_v22 = vmul.f32 %v1072_v59, %v6199_v36  ;;  %v1047_v62 = vsub.f32 1.5, %v1046_v38  ;;  %v6688_v21 = vpop.eup %5058  ;;  %v868_v51 = vmul.f32 %v6632_v44, %v6019_v53 }
 0x19a   : > { %1486 = vst [vmem:[#allocation2 + $0x88] sm:$0xff] %v1454_v8  ;;  %v1116_v19 = vmul.f32 0.5, %v1115_v5  ;;  %v1074_v36 = vmul.f32 %v6688_v21, %v6654_v43  ;;  %v1095_v18 = vmul.f32 %v5057_v61, %v1094_v14  ;;  %vm1100_vm7 = vweird.f32 %v5057_v61 }
 0x19b   : > { %v1333_v23 = vmul.f32 %v6386_v33, %v1263_v50  ;;  %v1334_v56 = vmul.f32 %v6388_v28, %v1264_v22  ;;  %v1048_v2 = vmul.f32 %v6651_v39, %v1047_v62  ;;  %vm1079_vm8 = vweird.f32 %v6654_v43  ;;  %v6705_v44 = vpop.eup %5060  ;;  %vm1101_vm13 = vmor %vm1099_vm4, %vm1100_vm7  ;;  %v8977_v50 = vld [vmem:[#allocation51_spill] sm:$0xff]  ;;  %v8978_v62 = vld [vmem:[#allocation52_spill] sm:$0xff]  ;;  %v836_v43 = vpop.xlane.xlu2 %835 }
 0x19c   : > { %v1117_v34 = vsub.f32 1.5, %v1116_v19  ;;  %vm1080_vm9 = vweird.f32 %v6688_v21  ;;  %vm1149_vm10 = vweird.f32 %v6669_v24  ;;  %v1075_v10 = vmul.f32 %v6688_v21, %v1074_v36  ;;  %v8979_v36 = vld [vmem:[#allocation47_spill] sm:$0xff] }
 0x19d   : > { %v1403_v35 = vadd.f32 %v6391_v16, %v1333_v23  ;;  %v1404_v60 = vadd.f32 %v6393_v63, %v1334_v56  ;;  %v1052_v48 = vsel %vm1051_vm6, %v6651_v39, %v1048_v2  ;;  %v1096_v29 = vmul.f32 0.5, %v1095_v18  ;;  %v6718_v47 = vpop.eup %5062  ;;  %vm1081_vm15 = vmor %vm1079_vm8, %vm1080_vm9  ;;  %v8980_v18 = vld [vmem:[#allocation48_spill] sm:$0xff] }
 0x19e   : > { %v1259_v1 = vmul.f32 %v1052_v48, %v6173_v27  ;;  %v1260_v20 = vmul.f32 %v1052_v48, %v8974_v11  ;;  %v1118_v13 = vmul.f32 %v5055_v6, %v1117_v34  ;;  %v1076_v37 = vmul.f32 0.5, %v1075_v10  ;;  %v6727_v27 = vpop.xlane.xlu0 %829 }
 0x19f   : > { %v1452_v40 = vpack.c.bf16 %v1404_v60, %v1403_v35  ;;  %v1144_v52 = vmul.f32 %v6705_v44, %v6669_v24  ;;  %v6722_v3 = vadd.f32 1e-05, %v868_v51  ;;  %v1097_v54 = vsub.f32 1.5, %v1096_v29 }
 0x1a0   : > { %v1329_v7 = vmul.f32 %v6386_v33, %v1259_v1  ;;  %v1330_v39 = vmul.f32 %v6388_v28, %v1260_v20  ;;  %v1122_v26 = vsel %vm1121_vm11, %v5055_v6, %v1118_v13  ;;  %vm1129_vm12 = vweird.f32 %v6671_v17 }
 0x1a1   : > { %1484 = vst [vmem:[#allocation2 + $0x78] sm:$0xff] %v1452_v40  ;;  %v1273_v9 = vmul.f32 %v1122_v26, %v8975_v58  ;;  %v1274_v30 = vmul.f32 %v1122_v26, %v8976_v49  ;;  %v1077_v15 = vsub.f32 1.5, %v1076_v37  ;;  %v1145_v12 = vmul.f32 %v6705_v44, %v1144_v52  ;;  %v8982_v26 = vld [vmem:[#allocation56_spill] sm:$0xff] }
 0x1a2   : > { %v1399_v46 = vadd.f32 %v6391_v16, %v1329_v7  ;;  %v1400_v45 = vadd.f32 %v6393_v63, %v1330_v39  ;;  %v1098_v4 = vmul.f32 %v5057_v61, %v1097_v54  ;;  %v1124_v6 = vmul.f32 %v6718_v47, %v6671_v17  ;;  %v8981_v7 = vld [vmem:[#allocation55_spill] sm:$0xff] }
 0x1a3   : > { %v1343_v41 = vmul.f32 %v6386_v33, %v1273_v9  ;;  %v1344_v31 = vmul.f32 %v6388_v28, %v1274_v30  ;;  %v1078_v32 = vmul.f32 %v6688_v21, %v1077_v15  ;;  %v1146_v57 = vmul.f32 0.5, %v1145_v12  ;;  %v8983_v12 = vld [vmem:[#allocation57_spill] sm:$0xff] }
 0x1a4   : > { %v1450_v55 = vpack.c.bf16 %v1400_v45, %v1399_v46  ;;  %v1102_v38 = vsel %vm1101_vm13, %v5057_v61, %v1098_v4  ;;  %vm1150_vm14 = vweird.f32 %v6705_v44  ;;  %v1125_v8 = vmul.f32 %v6718_v47, %v1124_v6  ;;  %v8984_v45 = vld [vmem:[#allocation58_spill] sm:$0xff] }
 0x1a5   : > { %v1413_v59 = vadd.f32 %v6391_v16, %v1343_v41  ;;  %v1414_v5 = vadd.f32 %v6393_v63, %v1344_v31  ;;  %v1269_v22 = vmul.f32 %v1102_v38, %v8977_v50  ;;  %v1270_v19 = vmul.f32 %v1102_v38, %v8978_v62  ;;  %vm1151_vm0 = vmor %vm1149_vm10, %vm1150_vm14  ;;  %v845_v50 = vpop.xlane.xlu2 %844 }
 0x1a6   : > { %1482 = vst [vmem:[#allocation2 + $0x68] sm:$0xff] %v1450_v55  ;;  %v1082_v61 = vsel %vm1081_vm15, %v6688_v21, %v1078_v32  ;;  %v1147_v14 = vsub.f32 1.5, %v1146_v57  ;;  %v1126_v51 = vmul.f32 0.5, %v1125_v8  ;;  %5064 = vrsqrt.f32 %v6722_v3  ;;  %v839_v40 = vpop.xlane.xlu0 %838  ;;  %v842_v57 = vpop.xlane.xlu1 %841 }
 0x1a7   : > { %v1457_v23 = vpack.c.bf16 %v1414_v5, %v1413_v59  ;;  %v1339_v56 = vmul.f32 %v6386_v33, %v1269_v22  ;;  %v1340_v2 = vmul.f32 %v6388_v28, %v1270_v19  ;;  %v1265_v34 = vmul.f32 %v1082_v61, %v8979_v36 }
 0x1a8   : > { %v1266_v35 = vmul.f32 %v1082_v61, %v8980_v18  ;;  %v1148_v21 = vmul.f32 %v6705_v44, %v1147_v14  ;;  %v1127_v60 = vsub.f32 1.5, %v1126_v51  ;;  %vm1130_vm1 = vweird.f32 %v6718_v47 }
 0x1a9   : > { %1489 = vst [vmem:[#allocation2 + $0xa0] sm:$0xff] %v1457_v23  ;;  %v1409_v48 = vadd.f32 %v6391_v16, %v1339_v56  ;;  %v1410_v10 = vadd.f32 %v6393_v63, %v1340_v2  ;;  %v1335_v1 = vmul.f32 %v6386_v33, %v1265_v34  ;;  %v875_v11 = vmul.f32 %v833_v25, %v6019_v53  ;;  %vm1131_vm2 = vmor %vm1129_vm12, %vm1130_vm1 }
 0x1aa   : > { %v1336_v24 = vmul.f32 %v6388_v28, %v1266_v35  ;;  %v1152_v20 = vsel %vm1151_vm0, %v6705_v44, %v1148_v21  ;;  %v1128_v13 = vmul.f32 %v6718_v47, %v1127_v60  ;;  %v873_v29 = vmul.f32 %v6714_v0, %v6019_v53 }
 0x1ab   : > { %v1455_v37 = vpack.c.bf16 %v1410_v10, %v1409_v48  ;;  %v1405_v52 = vadd.f32 %v6391_v16, %v1335_v1  ;;  %v1279_v39 = vmul.f32 %v1152_v20, %v8981_v7  ;;  %v1280_v54 = vmul.f32 %v1152_v20, %v8982_v26  ;;  %v8985_v1 = vld [vmem:[#allocation53_spill] sm:$0xff] }
 0x1ac   : > { %v5065_v58 = vpop.eup %5064  ;;  %v1406_v44 = vadd.f32 %v6393_v63, %v1336_v24  ;;  %v1132_v9 = vsel %vm1131_vm2, %v6718_v47, %v1128_v13  ;;  %v6782_v49 = vadd.f32 1e-05, %v875_v11  ;;  %v6784_v0 = vadd.f32 1e-05, %v873_v29  ;;  %v8986_v24 = vld [vmem:[#allocation54_spill] sm:$0xff] }
 0x1ad   : > { %1487 = vst [vmem:[#allocation2 + $0x90] sm:$0xff] %v1455_v37  ;;  %v1349_v30 = vmul.f32 %v6386_v33, %v1279_v39  ;;  %v1350_v15 = vmul.f32 %v6388_v28, %v1280_v54  ;;  %v1275_v46 = vmul.f32 %v1132_v9, %v8983_v12  ;;  %v1276_v4 = vmul.f32 %v1132_v9, %v8984_v45 }
 0x1ae   : > { %v1453_v17 = vpack.c.bf16 %v1406_v44, %v1405_v52  ;;  %v1104_v6 = vmul.f32 %v5065_v58, %v6722_v3  ;;  %5066 = vrsqrt.f32 %v6782_v49  ;;  %v871_v5 = vmul.f32 %v6676_v42, %v6019_v53  ;;  %v848_v36 = vpop.xlane.xlu0 %847 }
 0x1af   : > { %v1419_v47 = vadd.f32 %v6391_v16, %v1349_v30  ;;  %v1420_v41 = vadd.f32 %v6393_v63, %v1350_v15  ;;  %v1345_v31 = vmul.f32 %v6386_v33, %v1275_v46  ;;  %v1346_v32 = vmul.f32 %v6388_v28, %v1276_v4 }
 0x1b0   : > { %1485 = vst [vmem:[#allocation2 + $0x80] sm:$0xff] %v1453_v17  ;;  %v1105_v55 = vmul.f32 %v5065_v58, %v1104_v6  ;;  %5068 = vrsqrt.f32 %v6784_v0  ;;  %v878_v62 = vmul.f32 %v842_v57, %v6019_v53  ;;  %v876_v19 = vmul.f32 %v836_v43, %v6019_v53  ;;  %v8990_v57 = vld [vmem:[#allocation28_spill] sm:$0xff] }
 0x1b1   : > { %v1460_v38 = vpack.c.bf16 %v1420_v41, %v1419_v47  ;;  %v1415_v8 = vadd.f32 %v6391_v16, %v1345_v31  ;;  %v1416_v59 = vadd.f32 %v6393_v63, %v1346_v32  ;;  %vm1110_vm3 = vweird.f32 %v5065_v58  ;;  %v8989_v31 = vld [vmem:[#allocation27_spill] sm:$0xff] }
 0x1b2   : > { %v1106_v22 = vmul.f32 0.5, %v1105_v55  ;;  %v6803_v61 = vadd.f32 1e-05, %v871_v5  ;;  %v874_v14 = vmul.f32 %v6727_v27, %v6019_v53  ;;  %v6807_v56 = vadd.f32 1e-05, %v878_v62 }
 0x1b3   : > { %1492 = vst [vmem:[#allocation2 + $0xb8] sm:$0xff] %v1460_v38  ;;  %v1458_v25 = vpack.c.bf16 %v1416_v59, %v1415_v8  ;;  %v6809_v2 = vadd.f32 1e-05, %v876_v19  ;;  %v879_v42 = vmul.f32 %v845_v50, %v6019_v53  ;;  %vm1109_vm4 = vweird.f32 %v6722_v3 }
 0x1b4   : > { %v5067_v51 = vpop.eup %5066  ;;  %v1107_v23 = vsub.f32 1.5, %v1106_v22  ;;  %5070 = vrsqrt.f32 %v6803_v61  ;;  %vm1179_vm5 = vweird.f32 %v6782_v49  ;;  %v877_v27 = vmul.f32 %v839_v40, %v6019_v53  ;;  %vm1111_vm6 = vmor %vm1109_vm4, %vm1110_vm3 }
 0x1b5   : > { %1490 = vst [vmem:[#allocation2 + $0xa8] sm:$0xff] %v1458_v25  ;;  %v1174_v34 = vmul.f32 %v5067_v51, %v6782_v49  ;;  %5072 = vrsqrt.f32 %v6807_v56  ;;  %v880_v3 = vmul.f32 %v848_v36, %v6019_v53  ;;  %vm1180_vm7 = vweird.f32 %v5067_v51  ;;  %v8991_v25 = vld [vmem:[#allocation29_spill] sm:$0xff] }
 0x1b6   : > { %v5069_v43 = vpop.eup %5068  ;;  %v1108_v18 = vmul.f32 %v5065_v58, %v1107_v23  ;;  %5074 = vrsqrt.f32 %v6809_v2  ;;  %v6822_v48 = vadd.f32 1e-05, %v874_v14  ;;  %v6824_v10 = vadd.f32 1e-05, %v879_v42  ;;  %vm6842_vm11 = vmor %vm1179_vm5, %vm1180_vm7  ;;  %v8992_v14 = vld [vmem:[#allocation30_spill] sm:$0xff] }
 0x1b7   : > { %v1175_v35 = vmul.f32 %v5067_v51, %v1174_v34  ;;  %v1154_v21 = vmul.f32 %v5069_v43, %v6784_v0  ;;  %vm1159_vm8 = vweird.f32 %v6784_v0  ;;  %vm1160_vm9 = vweird.f32 %v5069_v43 }
 0x1b8   : > { %v1112_v60 = vsel %vm1111_vm6, %v5065_v58, %v1108_v18  ;;  %5076 = vrsqrt.f32 %v6822_v48  ;;  %v6830_v40 = vadd.f32 1e-05, %v877_v27  ;;  %vm1209_vm10 = vweird.f32 %v6807_v56  ;;  %vm1161_vm1 = vmor %vm1159_vm8, %vm1160_vm9 }
 0x1b9   : > { %v1271_v11 = vmul.f32 %v1112_v60, %v8985_v1  ;;  %v1272_v20 = vmul.f32 %v1112_v60, %v8986_v24  ;;  %v1176_v13 = vmul.f32 0.5, %v1175_v35  ;;  %v1155_v29 = vmul.f32 %v5069_v43, %v1154_v21 }
 0x1ba   : > { %v6832_v53 = vpop.eup %5070  ;;  %vm1139_vm12 = vweird.f32 %v6803_v61  ;;  %5078 = vrsqrt.f32 %v6824_v10  ;;  %v6851_v44 = vadd.f32 1e-05, %v880_v3  ;;  %vm1189_vm14 = vweird.f32 %v6809_v2 }
 0x1bb   : > { %v1341_v37 = vmul.f32 %v6386_v33, %v1271_v11  ;;  %v1342_v52 = vmul.f32 %v6388_v28, %v1272_v20  ;;  %v1177_v7 = vsub.f32 1.5, %v1176_v13  ;;  %v1156_v39 = vmul.f32 0.5, %v1155_v29  ;;  %v6837_v26 = vpop.eup %5072 }
 0x1bc   : > { %v1134_v58 = vmul.f32 %v6832_v53, %v6803_v61  ;;  %vm1140_vm13 = vweird.f32 %v6832_v53  ;;  %v5075_v9 = vpop.eup %5074  ;;  %v1204_v45 = vmul.f32 %v6837_v26, %v6807_v56  ;;  %vm1210_vm15 = vweird.f32 %v6837_v26 }
 0x1bd   : > { %v1411_v30 = vadd.f32 %v6391_v16, %v1341_v37  ;;  %v1412_v49 = vadd.f32 %v6393_v63, %v1342_v52  ;;  %v1178_v15 = vmul.f32 %v5067_v51, %v1177_v7  ;;  %v1157_v12 = vsub.f32 1.5, %v1156_v39  ;;  %vm1141_vm4 = vmor %vm1139_vm12, %vm1140_vm13  ;;  %v8993_v39 = vld [vmem:[#allocation59_spill] sm:$0xff] }
 0x1be   : > { %v1135_v46 = vmul.f32 %v6832_v53, %v1134_v58  ;;  %v1184_v4 = vmul.f32 %v5075_v9, %v6809_v2  ;;  %vm1190_vm0 = vweird.f32 %v5075_v9  ;;  %v5077_v41 = vpop.eup %5076  ;;  %v1205_v8 = vmul.f32 %v6837_v26, %v1204_v45  ;;  %vm1211_vm5 = vmor %vm1209_vm10, %vm1210_vm15  ;;  %v8994_v58 = vld [vmem:[#allocation60_spill] sm:$0xff]  ;;  %v8995_v45 = vld [vmem:[#allocation33_spill] sm:$0xff] }
 0x1bf   : > { %v1456_v17 = vpack.c.bf16 %v1412_v49, %v1411_v30  ;;  %v1182_v6 = vsel %vm6842_vm11, %v5067_v51, %v1178_v15  ;;  %v1158_v47 = vmul.f32 %v5069_v43, %v1157_v12  ;;  %v1164_v50 = vmul.f32 %v5077_v41, %v6822_v48  ;;  %vm1191_vm7 = vmor %vm1189_vm14, %vm1190_vm0  ;;  %v8997_v2 = vld [vmem:[#allocation35_spill] sm:$0xff] }
 0x1c0   : > { %v1285_v32 = vmul.f32 %v1182_v6, %v8989_v31  ;;  %v1286_v55 = vmul.f32 %v1182_v6, %v8990_v57  ;;  %v1136_v38 = vmul.f32 0.5, %v1135_v46  ;;  %v1185_v5 = vmul.f32 %v5075_v9, %v1184_v4  ;;  %v6871_v22 = vpop.eup %5078 }
 0x1c1   : > { %1488 = vst [vmem:[#allocation2 + $0x98] sm:$0xff] %v1456_v17  ;;  %v1162_v59 = vsel %vm1161_vm1, %v5069_v43, %v1158_v47  ;;  %vm1169_vm2 = vweird.f32 %v6822_v48  ;;  %vm1170_vm3 = vweird.f32 %v5077_v41  ;;  %v1206_v42 = vmul.f32 0.5, %v1205_v8  ;;  %v8996_v17 = vld [vmem:[#allocation34_spill] sm:$0xff]  ;;  %v8999_v48 = vld [vmem:[#allocation31_spill] sm:$0xff] }
 0x1c2   : > { %v1355_v62 = vmul.f32 %v6386_v33, %v1285_v32  ;;  %v1356_v19 = vmul.f32 %v6388_v28, %v1286_v55  ;;  %v1281_v0 = vmul.f32 %v1162_v59, %v8991_v25  ;;  %v1282_v51 = vmul.f32 %v1162_v59, %v8992_v14  ;;  %vm1171_vm9 = vmor %vm1169_vm2, %vm1170_vm3 }
 0x1c3   : > { %v1137_v23 = vsub.f32 1.5, %v1136_v38  ;;  %v1186_v36 = vmul.f32 0.5, %v1185_v5  ;;  %v1165_v34 = vmul.f32 %v5077_v41, %v1164_v50  ;;  %v1207_v3 = vsub.f32 1.5, %v1206_v42 }
 0x1c4   : > { %v1425_v43 = vadd.f32 %v6391_v16, %v1355_v62  ;;  %v1426_v18 = vadd.f32 %v6393_v63, %v1356_v19  ;;  %v1351_v27 = vmul.f32 %v6386_v33, %v1281_v0  ;;  %v1352_v35 = vmul.f32 %v6388_v28, %v1282_v51  ;;  %v9000_v62 = vld [vmem:[#allocation32_spill] sm:$0xff] }
 0x1c5   : > { %v1138_v21 = vmul.f32 %v6832_v53, %v1137_v23  ;;  %v1187_v60 = vsub.f32 1.5, %v1186_v36  ;;  %v1166_v1 = vmul.f32 0.5, %v1165_v34  ;;  %v1214_v13 = vmul.f32 %v6871_v22, %v6824_v10 }
 0x1c6   : > { %v1463_v11 = vpack.c.bf16 %v1426_v18, %v1425_v43  ;;  %v1421_v24 = vadd.f32 %v6391_v16, %v1351_v27  ;;  %v1422_v20 = vadd.f32 %v6393_v63, %v1352_v35  ;;  %vm1219_vm6 = vweird.f32 %v6824_v10 }
 0x1c7   : > { %v1142_v61 = vsel %vm1141_vm4, %v6832_v53, %v1138_v21  ;;  %v1208_v29 = vmul.f32 %v6837_v26, %v1207_v3  ;;  %v1188_v37 = vmul.f32 %v5075_v9, %v1187_v60  ;;  %v1167_v52 = vsub.f32 1.5, %v1166_v1  ;;  %v9001_v60 = vld [vmem:[#allocation39_spill] sm:$0xff] }
 0x1c8   : > { %1495 = vst [vmem:[#allocation2 + $0xd0] sm:$0xff] %v1463_v11  ;;  %v1461_v7 = vpack.c.bf16 %v1422_v20, %v1421_v24  ;;  %v1277_v54 = vmul.f32 %v1142_v61, %v8993_v39  ;;  %v1278_v30 = vmul.f32 %v1142_v61, %v8994_v58  ;;  %v1215_v56 = vmul.f32 %v6871_v22, %v1214_v13  ;;  %v9002_v11 = vld [vmem:[#allocation40_spill] sm:$0xff] }
 0x1c9   : > { %v1212_v49 = vsel %vm1211_vm5, %v6837_v26, %v1208_v29  ;;  %v1192_v15 = vsel %vm1191_vm7, %v5075_v9, %v1188_v37  ;;  %v1168_v53 = vmul.f32 %v5077_v41, %v1167_v52  ;;  %vm1220_vm8 = vweird.f32 %v6871_v22  ;;  %v8998_v26 = vld [vmem:[#allocation36_spill] sm:$0xff] }
 0x1ca   : > { %1493 = vst [vmem:[#allocation2 + $0xc0] sm:$0xff] %v1461_v7  ;;  %v1347_v12 = vmul.f32 %v6386_v33, %v1277_v54  ;;  %v1348_v46 = vmul.f32 %v6388_v28, %v1278_v30  ;;  %v1291_v4 = vmul.f32 %v1212_v49, %v8995_v45  ;;  %v1292_v6 = vmul.f32 %v1212_v49, %v8996_v17  ;;  %vm1221_vm10 = vmor %vm1219_vm6, %vm1220_vm8 }
 0x1cb   : > { %v1287_v47 = vmul.f32 %v1192_v15, %v8997_v2  ;;  %v1288_v9 = vmul.f32 %v1192_v15, %v8998_v26  ;;  %v1172_v31 = vsel %vm1171_vm9, %v5077_v41, %v1168_v53  ;;  %v1216_v32 = vmul.f32 0.5, %v1215_v56  ;;  %v9005_v2 = vld [vmem:[#allocation61_spill] sm:$0xff]  ;;  %v9006_v26 = vld [vmem:[#allocation62_spill] sm:$0xff] }
 0x1cc   : > { %v1417_v57 = vadd.f32 %v6391_v16, %v1347_v12  ;;  %v1418_v55 = vadd.f32 %v6393_v63, %v1348_v46  ;;  %v1361_v38 = vmul.f32 %v6386_v33, %v1291_v4  ;;  %v1362_v8 = vmul.f32 %v6388_v28, %v1292_v6  ;;  %v9003_v46 = vld [vmem:[#allocation37_spill] sm:$0xff]  ;;  %v9004_v4 = vld [vmem:[#allocation38_spill] sm:$0xff] }
 0x1cd   : > { %v1357_v59 = vmul.f32 %v6386_v33, %v1287_v47  ;;  %v1358_v5 = vmul.f32 %v6388_v28, %v1288_v9  ;;  %v1283_v50 = vmul.f32 %v1172_v31, %v8999_v48  ;;  %v1284_v19 = vmul.f32 %v1172_v31, %v9000_v62 }
 0x1ce   : > { %v1459_v25 = vpack.c.bf16 %v1418_v55, %v1417_v57  ;;  %v1431_v41 = vadd.f32 %v6391_v16, %v1361_v38  ;;  %v1432_v0 = vadd.f32 %v6393_v63, %v1362_v8  ;;  %v1217_v14 = vsub.f32 1.5, %v1216_v32 }
 0x1cf   : > { %v1427_v51 = vadd.f32 %v6391_v16, %v1357_v59  ;;  %v1428_v23 = vadd.f32 %v6393_v63, %v1358_v5  ;;  %v1353_v42 = vmul.f32 %v6386_v33, %v1283_v50  ;;  %v1354_v36 = vmul.f32 %v6388_v28, %v1284_v19 }
 0x1d0   : > { %1491 = vst [vmem:[#allocation2 + $0xb0] sm:$0xff] %v1459_v25  ;;  %v1466_v34 = vpack.c.bf16 %v1432_v0, %v1431_v41  ;;  %v1218_v43 = vmul.f32 %v6871_v22, %v1217_v14  ;;  %5080 = vrsqrt.f32 %v6830_v40  ;;  %vm1199_vm13 = vweird.f32 %v6830_v40 }
 0x1d1   : > { %v1464_v18 = vpack.c.bf16 %v1428_v23, %v1427_v51  ;;  %v1423_v27 = vadd.f32 %v6391_v16, %v1353_v42  ;;  %v1424_v35 = vadd.f32 %v6393_v63, %v1354_v36  ;;  %5082 = vrsqrt.f32 %v6851_v44 }
 0x1d2   : > { %1498 = vst [vmem:[#allocation2 + $0xe8] sm:$0xff] %v1466_v34  ;;  %v1222_v21 = vsel %vm1221_vm10, %v6871_v22, %v1218_v43  ;;  %vm1229_vm15 = vweird.f32 %v6851_v44 }
 0x1d3   : > { %1496 = vst [vmem:[#allocation2 + $0xd8] sm:$0xff] %v1464_v18  ;;  %v1462_v3 = vpack.c.bf16 %v1424_v35, %v1423_v27  ;;  %v1293_v1 = vmul.f32 %v1222_v21, %v9001_v60  ;;  %v1294_v24 = vmul.f32 %v1222_v21, %v9002_v11 }
 0x1d5   : > { %1494 = vst [vmem:[#allocation2 + $0xc8] sm:$0xff] %v1462_v3  ;;  %v1363_v20 = vmul.f32 %v6386_v33, %v1293_v1  ;;  %v1364_v13 = vmul.f32 %v6388_v28, %v1294_v24 }
 0x1d6   : > { %v5081_v61 = vpop.eup %5080 }
 0x1d7   : > { %v5083_v29 = vpop.eup %5082  ;;  %v1433_v10 = vadd.f32 %v6391_v16, %v1363_v20  ;;  %v1434_v37 = vadd.f32 %v6393_v63, %v1364_v13  ;;  %v1194_v52 = vmul.f32 %v5081_v61, %v6830_v40  ;;  %vm1200_vm11 = vweird.f32 %v5081_v61 }
 0x1d8   : > { %v1224_v22 = vmul.f32 %v5083_v29, %v6851_v44  ;;  %vm1230_vm12 = vweird.f32 %v5083_v29  ;;  %vm1201_vm14 = vmor %vm1199_vm13, %vm1200_vm11 }
 0x1d9   : > { %v1467_v7 = vpack.c.bf16 %v1434_v37, %v1433_v10  ;;  %v1195_v39 = vmul.f32 %v5081_v61, %v1194_v52  ;;  %vm1231_vm0 = vmor %vm1229_vm15, %vm1230_vm12 }
 0x1da   : > { %v1225_v54 = vmul.f32 %v5083_v29, %v1224_v22 }
 0x1db   : > { %1499 = vst [vmem:[#allocation2 + $0xf0] sm:$0xff] %v1467_v7  ;;  %v1196_v58 = vmul.f32 0.5, %v1195_v39 }
 0x1dc   : > { %v1226_v30 = vmul.f32 0.5, %v1225_v54 }
 0x1dd   : > { %v1197_v56 = vsub.f32 1.5, %v1196_v58 }
 0x1de   : > { %v1227_v49 = vsub.f32 1.5, %v1226_v30 }
 0x1df   : > { %v1198_v15 = vmul.f32 %v5081_v61, %v1197_v56 }
 0x1e0   : > { %v1228_v53 = vmul.f32 %v5083_v29, %v1227_v49 }
 0x1e1   : > { %v1202_v12 = vsel %vm1201_vm14, %v5081_v61, %v1198_v15 }
 0x1e2   : > { %v1289_v45 = vmul.f32 %v1202_v12, %v9003_v46  ;;  %v1290_v17 = vmul.f32 %v1202_v12, %v9004_v4  ;;  %v1232_v6 = vsel %vm1231_vm0, %v5083_v29, %v1228_v53 }
 0x1e3   : > { %v1295_v47 = vmul.f32 %v1232_v6, %v9005_v2  ;;  %v1296_v9 = vmul.f32 %v1232_v6, %v9006_v26 }
 0x1e4   : > { %v1359_v31 = vmul.f32 %v6386_v33, %v1289_v45  ;;  %v1360_v32 = vmul.f32 %v6388_v28, %v1290_v17 }
 0x1e5   : > { %v1365_v40 = vmul.f32 %v6386_v33, %v1295_v47  ;;  %v1366_v57 = vmul.f32 %v6388_v28, %v1296_v9 }
 0x1e6   : > { %v1429_v44 = vadd.f32 %v6391_v16, %v1359_v31  ;;  %v1430_v55 = vadd.f32 %v6393_v63, %v1360_v32 }
 0x1e7   : > { %v1435_v38 = vadd.f32 %v6391_v16, %v1365_v40  ;;  %v1436_v8 = vadd.f32 %v6393_v63, %v1366_v57 }
 0x1e8   : > { %v1465_v59 = vpack.c.bf16 %v1430_v55, %v1429_v44 }
 0x1e9   : > { %v1468_v5 = vpack.c.bf16 %v1436_v8, %v1435_v38 }
 0x1ea   : > { %1497 = vst [vmem:[#allocation2 + $0xe0] sm:$0xff] %v1465_v59 }
 0x1eb   : > { %1500 = vst [vmem:[#allocation2 + $0xf8] sm:$0xff] %v1468_v5 }
 0x1ec PF: > { %v4662_v33 = vld [vmem:[%s5808_s14 + $0xe0] sm:$0xf]  ;;  %v4872_v28 = vld [vmem:[%s5808_s14 + $0xec] sm:$0xf0]  ;;  %v4870_v50 = vld [vmem:[%s5808_s14 + $0xe4] sm:$0xf] }
 0x1ed   : > { %v4790_v63 = vld [vmem:[%s5808_s14 + $0x1e0] sm:$0xf]  ;;  %v4663_v16 = vor.u32 %v4872_v28, %v4662_v33  ;;  %v4904_v48 = vld [vmem:[%s5808_s14 + $0x1ec] sm:$0xf0]  ;;  %v4664_v62 = vld [vmem:[%s5808_s14 + $0xf0] sm:$0xf0] }
 0x1ee   : > { %v4791_v19 = vor.u32 %v4904_v48, %v4790_v63  ;;  %v4667_v25 = vor.u32 %v4870_v50, %v4664_v62  ;;  %v4902_v41 = vld [vmem:[%s5808_s14 + $0x1e4] sm:$0xf]  ;;  %v4792_v0 = vld [vmem:[%s5808_s14 + $0x1f0] sm:$0xf0]  ;;  %v4646_v14 = vld [vmem:[%s5808_s14 + $0xc0] sm:$0xf] }
 0x1ef   : > { %2087 = vmatpush.bf16.msra.mxu0 %v4663_v16  ;;  %v4795_v51 = vor.u32 %v4902_v41, %v4792_v0  ;;  %v4868_v23 = vld [vmem:[%s5808_s14 + $0xcc] sm:$0xf0]  ;;  %v4774_v42 = vld [vmem:[%s5808_s14 + $0x1c0] sm:$0xf]  ;;  %v4866_v18 = vld [vmem:[%s5808_s14 + $0xc4] sm:$0xf] }
 0x1f0   : > { %v4900_v36 = vld [vmem:[%s5808_s14 + $0x1cc] sm:$0xf0]  ;;  %2176 = vmatpush.bf16.msra.mxu1 %v4791_v19  ;;  %2265 = vmatpush.bf16.msra.mxu2 %v4667_v25  ;;  %v4647_v34 = vor.u32 %v4868_v23, %v4646_v14  ;;  %v4648_v27 = vld [vmem:[%s5808_s14 + $0xd0] sm:$0xf0]  ;;  %v4898_v35 = vld [vmem:[%s5808_s14 + $0x1c4] sm:$0xf] }
 0x1f1   : > { %v4775_v43 = vor.u32 %v4900_v36, %v4774_v42  ;;  %2354 = vmatpush.bf16.msra.mxu3 %v4795_v51  ;;  %v4651_v21 = vor.u32 %v4866_v18, %v4648_v27  ;;  %v4776_v3 = vld [vmem:[%s5808_s14 + $0x1d0] sm:$0xf0]  ;;  %v4630_v60 = vld [vmem:[%s5808_s14 + $0xa0] sm:$0xf]  ;;  %v4864_v1 = vld [vmem:[%s5808_s14 + $0xac] sm:$0xf0] }
 0x1f2   : > { %v4779_v11 = vor.u32 %v4898_v35, %v4776_v3  ;;  %v4758_v24 = vld [vmem:[%s5808_s14 + $0x1a0] sm:$0xf]  ;;  %v4896_v20 = vld [vmem:[%s5808_s14 + $0x1ac] sm:$0xf0]  ;;  %v4862_v13 = vld [vmem:[%s5808_s14 + $0xa4] sm:$0xf]  ;;  %v4631_v61 = vor.u32 %v4864_v1, %v4630_v60 }
 0x1f3   : > { %2088 = vmatpush.bf16.msra.mxu0 %v4647_v34  ;;  %v4632_v29 = vld [vmem:[%s5808_s14 + $0xb0] sm:$0xf0]  ;;  %v4894_v10 = vld [vmem:[%s5808_s14 + $0x1a4] sm:$0xf]  ;;  %v4759_v52 = vor.u32 %v4896_v20, %v4758_v24  ;;  %v4614_v7 = vld [vmem:[%s5808_s14 + $0x80] sm:$0xf] }
 0x1f4   : > { %v4760_v37 = vld [vmem:[%s5808_s14 + $0x1b0] sm:$0xf0]  ;;  %2177 = vmatpush.bf16.msra.mxu1 %v4775_v43  ;;  %2266 = vmatpush.bf16.msra.mxu2 %v4651_v21  ;;  %v4635_v22 = vor.u32 %v4862_v13, %v4632_v29  ;;  %v4860_v39 = vld [vmem:[%s5808_s14 + $0x8c] sm:$0xf0]  ;;  %v4742_v54 = vld [vmem:[%s5808_s14 + $0x180] sm:$0xf] }
 0x1f5   : > { %2355 = vmatpush.bf16.msra.mxu3 %v4779_v11  ;;  %v4763_v58 = vor.u32 %v4894_v10, %v4760_v37  ;;  %v4892_v30 = vld [vmem:[%s5808_s14 + $0x18c] sm:$0xf0]  ;;  %v4858_v56 = vld [vmem:[%s5808_s14 + $0x84] sm:$0xf]  ;;  %v4616_v49 = vld [vmem:[%s5808_s14 + $0x90] sm:$0xf0]  ;;  %v4615_v12 = vor.u32 %v4860_v39, %v4614_v7 }
 0x1f6   : > { %v4890_v15 = vld [vmem:[%s5808_s14 + $0x184] sm:$0xf]  ;;  %v4744_v53 = vld [vmem:[%s5808_s14 + $0x190] sm:$0xf0]  ;;  %v4743_v46 = vor.u32 %v4892_v30, %v4742_v54  ;;  %v4619_v45 = vor.u32 %v4858_v56, %v4616_v49  ;;  %v4598_v4 = vld [vmem:[%s5808_s14 + $0x60] sm:$0xf] }
 0x1f7   : > { %2089 = vmatpush.bf16.msra.mxu0 %v4631_v61  ;;  %v4856_v17 = vld [vmem:[%s5808_s14 + $0x6c] sm:$0xf0]  ;;  %v4726_v6 = vld [vmem:[%s5808_s14 + $0x160] sm:$0xf]  ;;  %v4747_v2 = vor.u32 %v4890_v15, %v4744_v53  ;;  %v4854_v26 = vld [vmem:[%s5808_s14 + $0x64] sm:$0xf] }
 0x1f8   : > { %2178 = vmatpush.bf16.msra.mxu1 %v4759_v52  ;;  %2267 = vmatpush.bf16.msra.mxu2 %v4635_v22  ;;  %v4888_v47 = vld [vmem:[%s5808_s14 + $0x16c] sm:$0xf0]  ;;  %v4600_v9 = vld [vmem:[%s5808_s14 + $0x70] sm:$0xf0]  ;;  %v4886_v31 = vld [vmem:[%s5808_s14 + $0x164] sm:$0xf]  ;;  %v4599_v40 = vor.u32 %v4856_v17, %v4598_v4 }
 0x1f9   : > { %2356 = vmatpush.bf16.msra.mxu3 %v4763_v58  ;;  %v4728_v32 = vld [vmem:[%s5808_s14 + $0x170] sm:$0xf0]  ;;  %v4727_v57 = vor.u32 %v4888_v47, %v4726_v6  ;;  %v4603_v44 = vor.u32 %v4854_v26, %v4600_v9  ;;  %v4582_v55 = vld [vmem:[%s5808_s14 + $0x40] sm:$0xf]  ;;  %v4852_v38 = vld [vmem:[%s5808_s14 + $0x4c] sm:$0xf0] }
 0x1fa   : > { %v4710_v8 = vld [vmem:[%s5808_s14 + $0x140] sm:$0xf]  ;;  %v4731_v59 = vor.u32 %v4886_v31, %v4728_v32  ;;  %v4884_v5 = vld [vmem:[%s5808_s14 + $0x14c] sm:$0xf0]  ;;  %v4850_v33 = vld [vmem:[%s5808_s14 + $0x44] sm:$0xf]  ;;  %v4583_v48 = vor.u32 %v4852_v38, %v4582_v55 }
 0x1fb   : > { %2090 = vmatpush.bf16.msra.mxu0 %v4615_v12  ;;  %v4584_v28 = vld [vmem:[%s5808_s14 + $0x50] sm:$0xf0]  ;;  %v4882_v63 = vld [vmem:[%s5808_s14 + $0x144] sm:$0xf]  ;;  %v4711_v50 = vor.u32 %v4884_v5, %v4710_v8  ;;  %v4566_v19 = vld [vmem:[%s5808_s14 + $0x20] sm:$0xf] }
 0x1fc   : > { %2179 = vmatpush.bf16.msra.mxu1 %v4743_v46  ;;  %2268 = vmatpush.bf16.msra.mxu2 %v4619_v45  ;;  %v4712_v16 = vld [vmem:[%s5808_s14 + $0x150] sm:$0xf0]  ;;  %v4587_v62 = vor.u32 %v4850_v33, %v4584_v28  ;;  %v4848_v25 = vld [vmem:[%s5808_s14 + $0x2c] sm:$0xf0]  ;;  %v4694_v41 = vld [vmem:[%s5808_s14 + $0x120] sm:$0xf] }
 0x1fd   : > { %2357 = vmatpush.bf16.msra.mxu3 %v4747_v2  ;;  %v4715_v0 = vor.u32 %v4882_v63, %v4712_v16  ;;  %v4880_v14 = vld [vmem:[%s5808_s14 + $0x12c] sm:$0xf0]  ;;  %v4846_v51 = vld [vmem:[%s5808_s14 + $0x24] sm:$0xf]  ;;  %v4568_v23 = vld [vmem:[%s5808_s14 + $0x30] sm:$0xf0]  ;;  %v4567_v34 = vor.u32 %v4848_v25, %v4566_v19 }
 0x1fe   : > { %v4878_v42 = vld [vmem:[%s5808_s14 + $0x124] sm:$0xf]  ;;  %v4696_v36 = vld [vmem:[%s5808_s14 + $0x130] sm:$0xf0]  ;;  %v4550_v43 = vld [vmem:[%s5808_s14] sm:$0xf]  ;;  %v4695_v27 = vor.u32 %v4880_v14, %v4694_v41  ;;  %v4571_v35 = vor.u32 %v4846_v51, %v4568_v23 }
 0x1ff   : > { %2091 = vmatpush.bf16.msra.mxu0 %v4599_v40  ;;  %v4844_v18 = vld [vmem:[%s5808_s14 + $0xc] sm:$0xf0]  ;;  %v4678_v21 = vld [vmem:[%s5808_s14 + $0x100] sm:$0xf]  ;;  %v4842_v60 = vld [vmem:[%s5808_s14 + $0x4] sm:$0xf]  ;;  %v4699_v1 = vor.u32 %v4878_v42, %v4696_v36 }
 0x200   : > { %2180 = vmatpush.bf16.msra.mxu1 %v4727_v57  ;;  %2269 = vmatpush.bf16.msra.mxu2 %v4603_v44  ;;  %v4876_v3 = vld [vmem:[%s5808_s14 + $0x10c] sm:$0xf0]  ;;  %v4552_v11 = vld [vmem:[%s5808_s14 + $0x10] sm:$0xf0]  ;;  %v4874_v24 = vld [vmem:[%s5808_s14 + $0x104] sm:$0xf]  ;;  %v4551_v10 = vor.u32 %v4844_v18, %v4550_v43 }
 0x201   : > { %2358 = vmatpush.bf16.msra.mxu3 %v4731_v59  ;;  %v4680_v20 = vld [vmem:[%s5808_s14 + $0x110] sm:$0xf0]  ;;  %v4422_v13 = vld [vmem:[#allocation2] sm:$0xf]  ;;  %v4871_v61 = vld [vmem:[%s5808_s14 + $0xec] sm:$0xf]  ;;  %v4679_v7 = vor.u32 %v4876_v3, %v4678_v21  ;;  %v4555_v39 = vor.u32 %v4842_v60, %v4552_v11 }
 0x202   : > { %v4672_v29 = vld [vmem:[%s5808_s14 + $0xf8] sm:$0xf0]  ;;  %v4811_v37 = vld [vmem:[#allocation2 + $0x4] sm:$0xf0]  ;;  %v4903_v52 = vld [vmem:[%s5808_s14 + $0x1ec] sm:$0xf]  ;;  %v4683_v30 = vor.u32 %v4874_v24, %v4680_v20 }
 0x203   : > { %2092 = vmatpush.bf16.msra.mxu0 %v4583_v48  ;;  %v4800_v22 = vld [vmem:[%s5808_s14 + $0x1f8] sm:$0xf0]  ;;  %v4810_v54 = vld [vmem:[#allocation2 + $0x4] sm:$0xf]  ;;  %v4424_v58 = vld [vmem:[#allocation2 + $0x8] sm:$0xf0]  ;;  %v4675_v56 = vor.u32 %v4871_v61, %v4672_v29  ;;  %v7030_v53 = vor.u32 %v4811_v37, %v4422_v13 }
 0x204   : > { %2181 = vmatpush.bf16.msra.mxu1 %v4711_v50  ;;  %2270 = vmatpush.bf16.msra.mxu2 %v4587_v62  ;;  %v4670_v49 = vld [vmem:[%s5808_s14 + $0xe8] sm:$0xf]  ;;  %v4873_v15 = vld [vmem:[%s5808_s14 + $0xf4] sm:$0xf0]  ;;  %v4803_v12 = vor.u32 %v4903_v52, %v4800_v22  ;;  %v7034_v4 = vor.u32 %v4810_v54, %v4424_v58  ;;  %v4867_v2 = vld [vmem:[%s5808_s14 + $0xcc] sm:$0xf] }
 0x205   : > { %2359 = vmatpush.bf16.msra.mxu3 %v4715_v0  ;;  %v4798_v46 = vld [vmem:[%s5808_s14 + $0x1e8] sm:$0xf]  ;;  %v4905_v45 = vld [vmem:[%s5808_s14 + $0x1f4] sm:$0xf0]  ;;  %v4671_v17 = vor.u32 %v4873_v15, %v4670_v49  ;;  %v4656_v47 = vld [vmem:[%s5808_s14 + $0xd8] sm:$0xf0] }
 0x206   : > { %v4799_v6 = vor.u32 %v4905_v45, %v4798_v46  ;;  %v4899_v26 = vld [vmem:[%s5808_s14 + $0x1cc] sm:$0xf]  ;;  %v4659_v9 = vor.u32 %v4867_v2, %v4656_v47  ;;  %v4784_v31 = vld [vmem:[%s5808_s14 + $0x1d8] sm:$0xf0]  ;;  %v4654_v32 = vld [vmem:[%s5808_s14 + $0xc8] sm:$0xf] }
 0x207   : > { %2093 = vmatpush.bf16.msra.mxu0 %v4567_v34  ;;  %v4869_v40 = vld [vmem:[%s5808_s14 + $0xd4] sm:$0xf0]  ;;  %v4787_v57 = vor.u32 %v4899_v26, %v4784_v31  ;;  %v4782_v55 = vld [vmem:[%s5808_s14 + $0x1c8] sm:$0xf]  ;;  %v4430_v59 = vld [vmem:[#allocation2 + $0x10] sm:$0xf] }
 0x208   : > { %2182 = vmatpush.bf16.msra.mxu1 %v4695_v27  ;;  %2271 = vmatpush.bf16.msra.mxu2 %v4571_v35  ;;  %v4655_v44 = vor.u32 %v4869_v40, %v4654_v32  ;;  %v4901_v38 = vld [vmem:[%s5808_s14 + $0x1d4] sm:$0xf0]  ;;  %v4813_v5 = vld [vmem:[#allocation2 + $0x14] sm:$0xf0]  ;;  %v4812_v33 = vld [vmem:[#allocation2 + $0x14] sm:$0xf] }
 0x209   : > { %2360 = vmatpush.bf16.msra.mxu3 %v4699_v1  ;;  %v4783_v8 = vor.u32 %v4901_v38, %v4782_v55  ;;  %v4432_v28 = vld [vmem:[#allocation2 + $0x18] sm:$0xf0]  ;;  %v7048_v63 = vor.u32 %v4813_v5, %v4430_v59  ;;  %v4438_v48 = vld [vmem:[#allocation2 + $0x20] sm:$0xf]  ;;  %v4815_v50 = vld [vmem:[#allocation2 + $0x24] sm:$0xf0] }
 0x20a   : > { %v7050_v16 = vor.u32 %v4812_v33, %v4432_v28  ;;  %v4814_v62 = vld [vmem:[#allocation2 + $0x24] sm:$0xf]  ;;  %v4440_v19 = vld [vmem:[#allocation2 + $0x28] sm:$0xf0]  ;;  %v7056_v25 = vor.u32 %v4815_v50, %v4438_v48  ;;  %v4863_v0 = vld [vmem:[%s5808_s14 + $0xac] sm:$0xf] }
 0x20b   : > { %2094 = vmatpush.bf16.msra.mxu0 %v4551_v10  ;;  %v7058_v41 = vor.u32 %v4814_v62, %v4440_v19  ;;  %v4640_v14 = vld [vmem:[%s5808_s14 + $0xb8] sm:$0xf0]  ;;  %v4895_v51 = vld [vmem:[%s5808_s14 + $0x1ac] sm:$0xf]  ;;  %v4638_v36 = vld [vmem:[%s5808_s14 + $0xa8] sm:$0xf] }
 0x20c   : > { %2183 = vmatpush.bf16.msra.mxu1 %v4679_v7  ;;  %2272 = vmatpush.bf16.msra.mxu2 %v4555_v39  ;;  %v4643_v23 = vor.u32 %v4863_v0, %v4640_v14  ;;  %v4768_v42 = vld [vmem:[%s5808_s14 + $0x1b8] sm:$0xf0]  ;;  %v4865_v34 = vld [vmem:[%s5808_s14 + $0xb4] sm:$0xf0]  ;;  %v4766_v27 = vld [vmem:[%s5808_s14 + $0x1a8] sm:$0xf] }
 0x20d   : > { %2361 = vmatpush.bf16.msra.mxu3 %v4683_v30  ;;  %v4771_v43 = vor.u32 %v4895_v51, %v4768_v42  ;;  %v4639_v18 = vor.u32 %v4865_v34, %v4638_v36  ;;  %v4897_v35 = vld [vmem:[%s5808_s14 + $0x1b4] sm:$0xf0]  ;;  %v4446_v3 = vld [vmem:[#allocation2 + $0x30] sm:$0xf]  ;;  %v4817_v60 = vld [vmem:[#allocation2 + $0x34] sm:$0xf0] }
 0x20e   : > { %2095 = vmatmul.bf16.vlgmr.msra.gmra.mxu0 %v7030_v53  ;;  %v4767_v21 = vor.u32 %v4897_v35, %v4766_v27  ;;  %v4816_v1 = vld [vmem:[#allocation2 + $0x34] sm:$0xf]  ;;  %v4448_v11 = vld [vmem:[#allocation2 + $0x38] sm:$0xf0]  ;;  %v7072_v24 = vor.u32 %v4817_v60, %v4446_v3  ;;  %v4454_v13 = vld [vmem:[#allocation2 + $0x40] sm:$0xf] }
 0x20f   : > { %2184 = vmatmul.bf16.vlgmr.msra.gmra.mxu1 %v7034_v4  ;;  %2273 = vmatmul.bf16.vlgmr.msra.gmra.mxu2 %v7030_v53  ;;  %v7074_v20 = vor.u32 %v4816_v1, %v4448_v11  ;;  %v4819_v61 = vld [vmem:[#allocation2 + $0x44] sm:$0xf0]  ;;  %v4818_v29 = vld [vmem:[#allocation2 + $0x44] sm:$0xf]  ;;  %v4456_v10 = vld [vmem:[#allocation2 + $0x48] sm:$0xf0] }
 0x210   : > { %2621 = vmatpush.bf16.msrb.mxu2 %v4675_v56  ;;  %2362 = vmatmul.bf16.vlgmr.msra.gmra.mxu3 %v7034_v4  ;;  %v7080_v37 = vor.u32 %v4819_v61, %v4454_v13  ;;  %v7082_v52 = vor.u32 %v4818_v29, %v4456_v10  ;;  %v4859_v22 = vld [vmem:[%s5808_s14 + $0x8c] sm:$0xf]  ;;  %v4624_v7 = vld [vmem:[%s5808_s14 + $0x98] sm:$0xf0]  ;;  %v4622_v30 = vld [vmem:[%s5808_s14 + $0x88] sm:$0xf] }
 0x211   : > { %2710 = vmatpush.bf16.msrb.mxu3 %v4803_v12  ;;  %2443 = vmatpush.bf16.msrb.mxu0 %v4671_v17  ;;  %v4891_v39 = vld [vmem:[%s5808_s14 + $0x18c] sm:$0xf]  ;;  %v4627_v54 = vor.u32 %v4859_v22, %v4624_v7  ;;  %v4752_v58 = vld [vmem:[%s5808_s14 + $0x198] sm:$0xf0]  ;;  %v4861_v56 = vld [vmem:[%s5808_s14 + $0x94] sm:$0xf0] }
 0x212   : > { %2532 = vmatpush.bf16.msrb.mxu1 %v4799_v6  ;;  %v4755_v49 = vor.u32 %v4891_v39, %v4752_v58  ;;  %v4623_v15 = vor.u32 %v4861_v56, %v4622_v30  ;;  %v4750_v12 = vld [vmem:[%s5808_s14 + $0x188] sm:$0xf]  ;;  %v4893_v46 = vld [vmem:[%s5808_s14 + $0x194] sm:$0xf0]  ;;  %v4462_v17 = vld [vmem:[#allocation2 + $0x50] sm:$0xf] }
 0x213   : > { %v4751_v45 = vor.u32 %v4893_v46, %v4750_v12  ;;  %v4821_v6 = vld [vmem:[#allocation2 + $0x54] sm:$0xf0]  ;;  %v4820_v2 = vld [vmem:[#allocation2 + $0x54] sm:$0xf]  ;;  %v4464_v47 = vld [vmem:[#allocation2 + $0x58] sm:$0xf0] }
 0x214   : > { %2622 = vmatpush.bf16.msrb.mxu2 %v4659_v9  ;;  %v7096_v26 = vor.u32 %v4821_v6, %v4462_v17  ;;  %v7098_v9 = vor.u32 %v4820_v2, %v4464_v47  ;;  %v4470_v31 = vld [vmem:[#allocation2 + $0x60] sm:$0xf]  ;;  %v4823_v32 = vld [vmem:[#allocation2 + $0x64] sm:$0xf0]  ;;  %v4822_v40 = vld [vmem:[#allocation2 + $0x64] sm:$0xf] }
 0x215   : > { %2711 = vmatpush.bf16.msrb.mxu3 %v4787_v57  ;;  %2444 = vmatpush.bf16.msrb.mxu0 %v4655_v44  ;;  %v4472_v57 = vld [vmem:[#allocation2 + $0x68] sm:$0xf0]  ;;  %v7104_v44 = vor.u32 %v4823_v32, %v4470_v31  ;;  %v4478_v38 = vld [vmem:[#allocation2 + $0x70] sm:$0xf]  ;;  %v4824_v59 = vld [vmem:[#allocation2 + $0x74] sm:$0xf] }
 0x216   : > { %2533 = vmatpush.bf16.msrb.mxu1 %v4783_v8  ;;  %v7106_v55 = vor.u32 %v4822_v40, %v4472_v57  ;;  %v4825_v8 = vld [vmem:[#allocation2 + $0x74] sm:$0xf0]  ;;  %v4480_v5 = vld [vmem:[#allocation2 + $0x78] sm:$0xf0]  ;;  %v1597_v48 = vld [vmem:[%s5815_s19] sm:$0xf] }
 0x217   : > { %v7112_v33 = vor.u32 %v4825_v8, %v4478_v38  ;;  %v7114_v28 = vor.u32 %v4824_v59, %v4480_v5  ;;  %v4855_v50 = vld [vmem:[%s5808_s14 + $0x6c] sm:$0xf]  ;;  %v4608_v62 = vld [vmem:[%s5808_s14 + $0x78] sm:$0xf0]  ;;  %v7125_v36 = vperm.slane %v1597_v48, 0  ;;  %v7135_v1 = vperm.slane %v1597_v48, 1 }
 0x218   : > { %2623 = vmatpush.bf16.msrb.mxu2 %v4643_v23  ;;  %v4887_v19 = vld [vmem:[%s5808_s14 + $0x16c] sm:$0xf]  ;;  %v4611_v0 = vor.u32 %v4855_v50, %v4608_v62  ;;  %v4736_v14 = vld [vmem:[%s5808_s14 + $0x178] sm:$0xf0]  ;;  %v4827_v23 = vld [vmem:[#allocation2 + $0x84] sm:$0xf0] }
 0x219   : > { %2712 = vmatpush.bf16.msrb.mxu3 %v4771_v43  ;;  %2445 = vmatpush.bf16.msrb.mxu0 %v4639_v18  ;;  %v4486_v51 = vld [vmem:[#allocation2 + $0x80] sm:$0xf]  ;;  %v4739_v42 = vor.u32 %v4887_v19, %v4736_v14  ;;  %v4826_v34 = vld [vmem:[#allocation2 + $0x84] sm:$0xf]  ;;  %v4488_v43 = vld [vmem:[#allocation2 + $0x88] sm:$0xf0] }
 0x21a   : > { %2534 = vmatpush.bf16.msrb.mxu1 %v4767_v21  ;;  %v7127_v18 = vor.u32 %v4827_v23, %v4486_v51  ;;  %v7129_v35 = vor.u32 %v4826_v34, %v4488_v43  ;;  %v4606_v11 = vld [vmem:[%s5808_s14 + $0x68] sm:$0xf]  ;;  %v4857_v13 = vld [vmem:[%s5808_s14 + $0x74] sm:$0xf0]  ;;  %v4494_v2 = vld [vmem:[#allocation2 + $0x90] sm:$0xf] }
 0x21b   : > { %v4734_v61 = vld [vmem:[%s5808_s14 + $0x168] sm:$0xf]  ;;  %v4607_v10 = vor.u32 %v4857_v13, %v4606_v11  ;;  %v4889_v22 = vld [vmem:[%s5808_s14 + $0x174] sm:$0xf0]  ;;  %v4829_v31 = vld [vmem:[#allocation2 + $0x94] sm:$0xf0] }
 0x21c   : > { %2624 = vmatpush.bf16.msrb.mxu2 %v4627_v54  ;;  %v4735_v7 = vor.u32 %v4889_v22, %v4734_v61  ;;  %v4828_v32 = vld [vmem:[#allocation2 + $0x94] sm:$0xf]  ;;  %v4496_v38 = vld [vmem:[#allocation2 + $0x98] sm:$0xf0]  ;;  %v7159_v48 = vor.u32 %v4829_v31, %v4494_v2  ;;  %s4906_s7 = sshll.u32 %s5607_s24, 4  ;;  %s4234_s9 = sshll.u32 %s5824_s18, 4  ;;  %s4235_s9 = int_to_ptr.vmem [resolvable:$true] %s4234_s9 }
 0x21d   : > { %2713 = vmatpush.bf16.msrb.mxu3 %v4755_v49  ;;  %2446 = vmatpush.bf16.msrb.mxu0 %v4623_v15  ;;  %v7163_v14 = vor.u32 %v4828_v32, %v4496_v38  ;;  %v4502_v38 = vld [vmem:[#allocation2 + $0xa0] sm:$0xf]  ;;  %s4233_s29 = scalar_lea.hbm %s8822_s6, %s4906_s7  ;;  %s4219_s26 = scalar_lea.sflag [#allocation5], %s5805_s28 }
 0x21e   : > { %2100 = vmatmul.bf16.gmra.mxu0 %v7048_v63  ;;  %2535 = vmatpush.bf16.msrb.mxu1 %v4751_v45  ;;  %v2799_v45 = vld [vmem:[%s5818_s27] sm:$0xf]  ;;  %s4236_s10 = sshll.u32 %s4233_s29, 4  ;;  %s5541_s16 = scalar_lea.hbm %s8822_s6, 1536  ;;  %s4237_s10 = int_to_ptr.hbm [resolvable:$true] %s4236_s10 }
 0x21f   : > { %2189 = vmatmul.bf16.gmra.mxu1 %v7050_v16  ;;  %2278 = vmatmul.bf16.gmra.mxu2 %v7048_v63  ;;  %vm2800_vm1 = vcmp.gt.f32.partialorder %v2799_v45, 0.5  ;;  %s5535_s8 = sshra.s32 %s4237_s10, 4  ;;  %s5536_s8 = int_to_ptr.hbm [resolvable:$true] %s5535_s8 }
 0x220   : > { %2367 = vmatmul.bf16.gmra.mxu3 %v7050_v16  ;;  %2625 = vmatpush.bf16.msrb.mxu2 %v4611_v0  ;;  %s5537_s3 = scalar_lea.hbm %s5536_s8, 512  ;;  %p5542_p11 = scmp.lt.s32.totalorder %s5536_s8, %s8822_s6 }
 0x221   : > { %2714 = vmatpush.bf16.msrb.mxu3 %v4739_v42  ;;  %2447 = vmatpush.bf16.msrb.mxu0 %v4607_v10  ;;  %p5538_p5 = scmp.ne.s32.totalorder %s5536_s8, %s5537_s3  ;;  %p5543_p12 = scmp.lt.s32.totalorder %s5541_s16, %s5537_s3 }
 0x222   : > { %2536 = vmatpush.bf16.msrb.mxu1 %v4735_v7 }
 0x223   : > { %p5539_p7 = pnand %p5538_p5, %p5715_p8  ;;  %p5544_p13 = por %p5543_p12, %p5542_p11 }
 0x225   : > { %p5540_p10 = pneg %p5539_p7 }
 0x227   : > { %p5545_p0 = pnand %p5544_p13, %p5540_p10 }
 0x22e   : > { %2105 = vmatmul.bf16.gmra.mxu0 %v7056_v25 }
 0x22f   : > { %2194 = vmatmul.bf16.gmra.mxu1 %v7058_v41  ;;  %2283 = vmatmul.bf16.gmra.mxu2 %v7056_v25 }
 0x230   : > { %2372 = vmatmul.bf16.gmra.mxu3 %v7058_v41 }
 0x23e   : > { %2110 = vmatmul.bf16.gmra.mxu0 %v7072_v24 }
 0x23f   : > { %2199 = vmatmul.bf16.gmra.mxu1 %v7074_v20  ;;  %2288 = vmatmul.bf16.gmra.mxu2 %v7072_v24 }
 0x240   : > { %2377 = vmatmul.bf16.gmra.mxu3 %v7074_v20 }
 0x24e   : > { %2115 = vmatmul.bf16.gmra.mxu0 %v7080_v37 }
 0x24f   : > { %2204 = vmatmul.bf16.gmra.mxu1 %v7082_v52  ;;  %2293 = vmatmul.bf16.gmra.mxu2 %v7080_v37 }
 0x250   : > { %2382 = vmatmul.bf16.gmra.mxu3 %v7082_v52 }
 0x25e   : > { %2120 = vmatmul.bf16.gmra.mxu0 %v7096_v26 }
 0x25f   : > { %2209 = vmatmul.bf16.gmra.mxu1 %v7098_v9  ;;  %2298 = vmatmul.bf16.gmra.mxu2 %v7096_v26 }
 0x260   : > { %2387 = vmatmul.bf16.gmra.mxu3 %v7098_v9 }
 0x26e   : > { %2125 = vmatmul.bf16.gmra.mxu0 %v7104_v44 }
 0x26f   : > { %2214 = vmatmul.bf16.gmra.mxu1 %v7106_v55  ;;  %2303 = vmatmul.bf16.gmra.mxu2 %v7104_v44 }
 0x270   : > { %2392 = vmatmul.bf16.gmra.mxu3 %v7106_v55 }
 0x27e   : > { %2130 = vmatmul.bf16.gmra.mxu0 %v7112_v33 }
 0x27f   : > { %2219 = vmatmul.bf16.gmra.mxu1 %v7114_v28  ;;  %2308 = vmatmul.bf16.gmra.mxu2 %v7112_v33 }
 0x280   : > { %2397 = vmatmul.bf16.gmra.mxu3 %v7114_v28 }
 0x28b   : > { %v2096_v27 = vpop.f32.mrf.mxu0 }
 0x28c   : > { %v2097_v21 = vadd.f32 %v2096_v27, %v7125_v36  ;;  %v2185_v3 = vpop.f32.mrf.mxu1  ;;  %v5624_v27 = vmov 0  }
 0x28e   : > { %v7132_v60 = vadd.f32 %v2185_v3, %v2097_v21  ;;  %2135 = vmatmul.bf16.gmra.mxu0 %v7127_v18  ;;  %v7171_v21 = vsel %vm2800_vm1, 1, %v5624_v27 }
 0x28f   : > { %2224 = vmatmul.bf16.gmra.mxu1 %v7129_v35  ;;  %2313 = vmatmul.bf16.gmra.mxu2 %v7127_v18  ;;  %v3954_v7 = vperm.slane %v7171_v21, 0 }
 0x290   : > { %v2929_v29 = vmul.f32 0.044715, %v7132_v60  ;;  %2402 = vmatmul.bf16.gmra.mxu3 %v7129_v35  ;;  %v2801_v31 = vmul.f32 0.5, %v7132_v60 }
 0x291   : > { %vm7191_vm2 = vcmp.eq.s32.totalorder %v3954_v7, 1  ;;  %v4851_v7 = vld [vmem:[%s5808_s14 + $0x4c] sm:$0xf] }
 0x292   : > { %v3057_v39 = vmul.f32 %v2929_v29, %v7132_v60  ;;  %v2274_v54 = vpop.f32.mrf.mxu2 }
 0x293   : > { %v2275_v58 = vadd.f32 %v2274_v54, %v7135_v1  ;;  %v2363_v30 = vpop.f32.mrf.mxu3  ;;  %v2098_v56 = vpop.f32.mrf.mxu0  ;;  %v3955_v54 = vperm.slane %v7171_v21, 1 }
 0x294   : > { %v3185_v49 = vmul.f32 %v3057_v39, %v7132_v60  ;;  %v2099_v15 = vadd.f32 %v2098_v56, %v7125_v36  ;;  %v2187_v12 = vpop.f32.mrf.mxu1 }
 0x295   : > { %v7149_v46 = vadd.f32 %v2363_v30, %v2275_v58  ;;  %vm7201_vm3 = vcmp.eq.s32.totalorder %v3955_v54, 1 }
 0x296   : > { %v3313_v17 = vadd.f32 %v3185_v49, %v7132_v60  ;;  %v7153_v6 = vadd.f32 %v2187_v12, %v2099_v15 }
 0x297   : > { %v2930_v47 = vmul.f32 0.044715, %v7149_v46 }
 0x298   : > { %v3441_v40 = vmul.f32 0.7978846, %v3313_v17  ;;  %v2933_v57 = vmul.f32 0.044715, %v7153_v6 }
 0x299   : > { %v3058_v8 = vmul.f32 %v2930_v47, %v7149_v46 }
 0x29a   : > { %5084 = vtanh.f32 %v3441_v40  ;;  %v3061_v59 = vmul.f32 %v2933_v57, %v7153_v6  ;;  %v2276_v5 = vpop.f32.mrf.mxu2 }
 0x29b   : > { %v3186_v50 = vmul.f32 %v3058_v8, %v7149_v46  ;;  %v2277_v62 = vadd.f32 %v2276_v5, %v7135_v1  ;;  %v2365_v19 = vpop.f32.mrf.mxu3  ;;  %v2101_v0 = vpop.f32.mrf.mxu0  ;;  %v4831_v5 = vld [vmem:[#allocation2 + $0xa4] sm:$0xf0] }
 0x29c   : > { %v3189_v51 = vmul.f32 %v3061_v59, %v7153_v6  ;;  %v2102_v23 = vadd.f32 %v2101_v0, %v7125_v36  ;;  %v2190_v42 = vpop.f32.mrf.mxu1 }
 0x29d   : > { %v3314_v34 = vadd.f32 %v3186_v50, %v7149_v46  ;;  %v7168_v43 = vadd.f32 %v2365_v19, %v2277_v62  ;;  %v4830_v50 = vld [vmem:[#allocation2 + $0xa4] sm:$0xf]  ;;  %v4504_v62 = vld [vmem:[#allocation2 + $0xa8] sm:$0xf0] }
 0x29e   : > { %v3317_v3 = vadd.f32 %v3189_v51, %v7153_v6  ;;  %v7174_v11 = vadd.f32 %v2190_v42, %v2102_v23  ;;  %2140 = vmatmul.bf16.gmra.mxu0 %v7159_v48 }
 0x29f   : > { %v3442_v13 = vmul.f32 0.7978846, %v3314_v34  ;;  %v2934_v61 = vmul.f32 0.044715, %v7168_v43  ;;  %2229 = vmatmul.bf16.gmra.mxu1 %v7163_v14  ;;  %2318 = vmatmul.bf16.gmra.mxu2 %v7159_v48  ;;  %v2802_v34 = vmul.f32 0.5, %v7149_v46 }
 0x2a0   : > { %v5085_v29 = vpop.eup %5084  ;;  %v3445_v10 = vmul.f32 0.7978846, %v3317_v3  ;;  %v2937_v22 = vmul.f32 0.044715, %v7174_v11  ;;  %2407 = vmatmul.bf16.gmra.mxu3 %v7163_v14 }
 0x2a1   : > { %5086 = vtanh.f32 %v3442_v13  ;;  %v3062_v39 = vmul.f32 %v2934_v61, %v7168_v43  ;;  %v3697_v56 = vadd.f32 1.0, %v5085_v29 }
 0x2a2   : > { %v3065_v58 = vmul.f32 %v2937_v22, %v7174_v11  ;;  %v2279_v30 = vpop.f32.mrf.mxu2  ;;  %5088 = vtanh.f32 %v3445_v10  ;;  %v7209_v10 = vor.u32 %v4831_v5, %v4502_v38  ;;  %v7211_v22 = vor.u32 %v4830_v50, %v4504_v62 }
 0x2a3   : > { %v3190_v49 = vmul.f32 %v3062_v39, %v7168_v43  ;;  %v2280_v15 = vadd.f32 %v2279_v30, %v7135_v1  ;;  %v2368_v12 = vpop.f32.mrf.mxu3  ;;  %v2103_v45 = vpop.f32.mrf.mxu0  ;;  %v3825_v0 = vmul.f32 %v3697_v56, %v2801_v31  ;;  %v4592_v39 = vld [vmem:[%s5808_s14 + $0x58] sm:$0xf0] }
 0x2a4   : > { %v3193_v17 = vmul.f32 %v3065_v58, %v7174_v11  ;;  %v2104_v2 = vadd.f32 %v2103_v45, %v7125_v36  ;;  %v2192_v47 = vpop.f32.mrf.mxu1  ;;  %v4595_v56 = vor.u32 %v4851_v7, %v4592_v39 }
 0x2a5   : > { %v3318_v40 = vadd.f32 %v3190_v49, %v7168_v43  ;;  %v7196_v57 = vadd.f32 %v2368_v12, %v2280_v15  ;;  %v4883_v49 = vld [vmem:[%s5808_s14 + $0x14c] sm:$0xf]  ;;  %v4720_v15 = vld [vmem:[%s5808_s14 + $0x158] sm:$0xf0]  ;;  %v3962_v12 = vsel %vm7191_vm2, %v3825_v0, %v7132_v60  ;;  %v2805_v0 = vmul.f32 0.5, %v7153_v6 }
 0x2a6   : > { %v3321_v8 = vadd.f32 %v3193_v17, %v7174_v11  ;;  %v7199_v59 = vadd.f32 %v2192_v47, %v2104_v2  ;;  %v4723_v31 = vor.u32 %v4883_v49, %v4720_v15  ;;  %2626 = vmatpush.bf16.msrb.mxu2 %v4595_v56 }
 0x2a7   : > { %v5087_v19 = vpop.eup %5086  ;;  %v3446_v23 = vmul.f32 0.7978846, %v3318_v40  ;;  %v2938_v42 = vmul.f32 0.044715, %v7196_v57 }
 0x2a8   : > { %v3698_v27 = vadd.f32 1.0, %v5087_v19  ;;  %v3449_v3 = vmul.f32 0.7978846, %v3321_v8  ;;  %v2941_v13 = vmul.f32 0.044715, %v7199_v59  ;;  %v5089_v61 = vpop.eup %5088  ;;  %2715 = vmatpush.bf16.msrb.mxu3 %v4723_v31 }
 0x2a9   : > { %5090 = vtanh.f32 %v3446_v23  ;;  %v3066_v29 = vmul.f32 %v2938_v42, %v7196_v57  ;;  %v3701_v38 = vadd.f32 1.0, %v5089_v61 }
 0x2aa   : > { %v3826_v54 = vmul.f32 %v3698_v27, %v2802_v34  ;;  %5092 = vtanh.f32 %v3449_v3  ;;  %v3069_v58 = vmul.f32 %v2941_v13, %v7199_v59  ;;  %v2281_v30 = vpop.f32.mrf.mxu2  ;;  %v2806_v34 = vmul.f32 0.5, %v7168_v43 }
 0x2ab   : > { %v3194_v45 = vmul.f32 %v3066_v29, %v7196_v57  ;;  %v2282_v17 = vadd.f32 %v2281_v30, %v7135_v1  ;;  %v2370_v2 = vpop.f32.mrf.mxu3  ;;  %v2106_v47 = vpop.f32.mrf.mxu0  ;;  %v3829_v61 = vmul.f32 %v3701_v38, %v2805_v0  ;;  %v4853_v30 = vld [vmem:[%s5808_s14 + $0x54] sm:$0xf0] }
 0x2ac   : > { %v3963_v40 = vsel %vm7201_vm3, %v3826_v54, %v7149_v46  ;;  %v3197_v8 = vmul.f32 %v3069_v58, %v7199_v59  ;;  %v2107_v5 = vadd.f32 %v2106_v47, %v7125_v36  ;;  %v2195_v50 = vpop.f32.mrf.mxu1  ;;  %v4590_v58 = vld [vmem:[%s5808_s14 + $0x48] sm:$0xf] }
 0x2ad   : > { %v4090_v60 = vpack.c.bf16 %v3963_v40, %v3962_v12  ;;  %v3322_v62 = vadd.f32 %v3194_v45, %v7196_v57  ;;  %v7229_v19 = vadd.f32 %v2370_v2, %v2282_v17  ;;  %v4591_v45 = vor.u32 %v4853_v30, %v4590_v58  ;;  %v4718_v17 = vld [vmem:[%s5808_s14 + $0x148] sm:$0xf]  ;;  %v4885_v2 = vld [vmem:[%s5808_s14 + $0x154] sm:$0xf0] }
 0x2ae   : > { %v3325_v23 = vadd.f32 %v3197_v8, %v7199_v59  ;;  %v7233_v42 = vadd.f32 %v2195_v50, %v2107_v5  ;;  %2145 = vmatmul.bf16.gmra.mxu0 %v7209_v10  ;;  %v4719_v8 = vor.u32 %v4885_v2, %v4718_v17  ;;  %v3966_v5 = vsel %vm7191_vm2, %v3829_v61, %v7153_v6  ;;  %v4510_v6 = vld [vmem:[#allocation2 + $0xb0] sm:$0xf]  ;;  %v4832_v61 = vld [vmem:[#allocation2 + $0xb4] sm:$0xf] }
 0x2af   : > { %v5091_v46 = vpop.eup %5090  ;;  %4154 = vst [vmem:[%s5824_s18] sm:$0xff] %v4090_v60  ;;  %v3450_v27 = vmul.f32 0.7978846, %v3322_v62  ;;  %v2942_v3 = vmul.f32 0.044715, %v7229_v19  ;;  %2234 = vmatmul.bf16.gmra.mxu1 %v7211_v22  ;;  %2323 = vmatmul.bf16.gmra.mxu2 %v7209_v10  ;;  %v2810_v30 = vmul.f32 0.5, %v7196_v57 }
 0x2b0   : > { %v5093_v13 = vpop.eup %5092  ;;  %v3702_v29 = vadd.f32 1.0, %v5091_v46  ;;  %v3453_v7 = vmul.f32 0.7978846, %v3325_v23  ;;  %v2945_v39 = vmul.f32 0.044715, %v7233_v42  ;;  %2412 = vmatmul.bf16.gmra.mxu3 %v7211_v22  ;;  %2448 = vmatpush.bf16.msrb.mxu0 %v4591_v45  ;;  %v2809_v46 = vmul.f32 0.5, %v7174_v11 }
 0x2b1   : > { %5094 = vtanh.f32 %v3450_v27  ;;  %v3070_v54 = vmul.f32 %v2942_v3, %v7229_v19  ;;  %v3705_v49 = vadd.f32 1.0, %v5093_v13  ;;  %2537 = vmatpush.bf16.msrb.mxu1 %v4719_v8 }
 0x2b2   : > { %v3830_v56 = vmul.f32 %v3702_v29, %v2806_v34  ;;  %v3073_v15 = vmul.f32 %v2945_v39, %v7233_v42  ;;  %v2284_v12 = vpop.f32.mrf.mxu2  ;;  %5096 = vtanh.f32 %v3453_v7  ;;  %v4512_v29 = vld [vmem:[#allocation2 + $0xb8] sm:$0xf0] }
 0x2b3   : > { %v3198_v47 = vmul.f32 %v3070_v54, %v7229_v19  ;;  %v2285_v31 = vadd.f32 %v2284_v12, %v7135_v1  ;;  %v2373_v40 = vpop.f32.mrf.mxu3  ;;  %v2108_v38 = vpop.f32.mrf.mxu0  ;;  %v3833_v39 = vmul.f32 %v3705_v49, %v2809_v46 }
 0x2b4   : > { %v3967_v50 = vsel %vm7201_vm3, %v3830_v56, %v7168_v43  ;;  %v3201_v60 = vmul.f32 %v3073_v15, %v7233_v42  ;;  %v2109_v62 = vadd.f32 %v2108_v38, %v7125_v36  ;;  %v2197_v0 = vpop.f32.mrf.mxu1  ;;  %v4833_v43 = vld [vmem:[#allocation2 + $0xb4] sm:$0xf0] }
 0x2b5   : > { %v4092_v23 = vpack.c.bf16 %v3967_v50, %v3966_v5  ;;  %v3326_v34 = vadd.f32 %v3198_v47, %v7229_v19  ;;  %v7261_v27 = vadd.f32 %v2373_v40, %v2285_v31  ;;  %v7272_v40 = vor.u32 %v4833_v43, %v4510_v6 }
 0x2b6   : > { %v3329_v3 = vadd.f32 %v3201_v60, %v7233_v42  ;;  %v7264_v13 = vadd.f32 %v2197_v0, %v2109_v62  ;;  %v3970_v49 = vsel %vm7191_vm2, %v3833_v39, %v7174_v11  ;;  %v7279_v60 = vor.u32 %v4832_v61, %v4512_v29 }
 0x2b7   : > { %v5095_v7 = vpop.eup %5094  ;;  %4156 = vst [vmem:[%s5824_s18 + $0x10] sm:$0xff] %v4092_v23  ;;  %v3454_v54 = vmul.f32 0.7978846, %v3326_v34  ;;  %v2946_v58 = vmul.f32 0.044715, %v7261_v27  ;;  %v2813_v43 = vmul.f32 0.5, %v7199_v59 }
 0x2b8   : > { %v3706_v56 = vadd.f32 1.0, %v5095_v7  ;;  %v3457_v15 = vmul.f32 0.7978846, %v3329_v3  ;;  %v2949_v12 = vmul.f32 0.044715, %v7264_v13  ;;  %v5097_v45 = vpop.eup %5096  ;;  %v2814_v7 = vmul.f32 0.5, %v7229_v19 }
 0x2b9   : > { %5098 = vtanh.f32 %v3454_v54  ;;  %v3074_v17 = vmul.f32 %v2946_v58, %v7261_v27  ;;  %v3709_v0 = vadd.f32 1.0, %v5097_v45 }
 0x2ba   : > { %v3834_v2 = vmul.f32 %v3706_v56, %v2810_v30  ;;  %5100 = vtanh.f32 %v3457_v15  ;;  %v3077_v47 = vmul.f32 %v2949_v12, %v7264_v13  ;;  %v2286_v31 = vpop.f32.mrf.mxu2 }
 0x2bb   : > { %v3202_v38 = vmul.f32 %v3074_v17, %v7261_v27  ;;  %v2287_v8 = vadd.f32 %v2286_v31, %v7135_v1  ;;  %v2375_v5 = vpop.f32.mrf.mxu3  ;;  %v2111_v50 = vpop.f32.mrf.mxu0  ;;  %v3837_v30 = vmul.f32 %v3709_v0, %v2813_v43 }
 0x2bc   : > { %v3971_v62 = vsel %vm7201_vm3, %v3834_v2, %v7196_v57  ;;  %v3205_v23 = vmul.f32 %v3077_v47, %v7264_v13  ;;  %v2112_v46 = vadd.f32 %v2111_v50, %v7125_v36  ;;  %v2200_v34 = vpop.f32.mrf.mxu1 }
 0x2bd   : > { %v4094_v11 = vpack.c.bf16 %v3971_v62, %v3970_v49  ;;  %v3330_v6 = vadd.f32 %v3202_v38, %v7261_v27  ;;  %v7287_v3 = vadd.f32 %v2375_v5, %v2287_v8  ;;  %v3974_v50 = vsel %vm7191_vm2, %v3837_v30, %v7199_v59 }
 0x2be   : > { %v3333_v61 = vadd.f32 %v3205_v23, %v7264_v13  ;;  %v7291_v29 = vadd.f32 %v2200_v34, %v2112_v46  ;;  %2150 = vmatmul.bf16.gmra.mxu0 %v7272_v40 }
 0x2bf   : > { %v5099_v57 = vpop.eup %5098  ;;  %4158 = vst [vmem:[%s5824_s18 + $0x20] sm:$0xff] %v4094_v11  ;;  %v3458_v39 = vmul.f32 0.7978846, %v3330_v6  ;;  %v2950_v54 = vmul.f32 0.044715, %v7287_v3  ;;  %2239 = vmatmul.bf16.gmra.mxu1 %v7279_v60  ;;  %2328 = vmatmul.bf16.gmra.mxu2 %v7272_v40  ;;  %v2817_v11 = vmul.f32 0.5, %v7233_v42 }
 0x2c0   : > { %v5101_v58 = vpop.eup %5100  ;;  %v3710_v56 = vadd.f32 1.0, %v5099_v57  ;;  %v3461_v15 = vmul.f32 0.7978846, %v3333_v61  ;;  %v2953_v12 = vmul.f32 0.044715, %v7291_v29  ;;  %2417 = vmatmul.bf16.gmra.mxu3 %v7279_v60 }
 0x2c1   : > { %5102 = vtanh.f32 %v3458_v39  ;;  %v3078_v45 = vmul.f32 %v2950_v54, %v7287_v3  ;;  %v3713_v31 = vadd.f32 1.0, %v5101_v58  ;;  %v4518_v61 = vld [vmem:[#allocation2 + $0xc0] sm:$0xf]  ;;  %v4834_v39 = vld [vmem:[#allocation2 + $0xc4] sm:$0xf] }
 0x2c2   : > { %v3838_v17 = vmul.f32 %v3710_v56, %v2814_v7  ;;  %v3081_v2 = vmul.f32 %v2953_v12, %v7291_v29  ;;  %v2289_v47 = vpop.f32.mrf.mxu2  ;;  %5104 = vtanh.f32 %v3461_v15  ;;  %v4835_v7 = vld [vmem:[#allocation2 + $0xc4] sm:$0xf0]  ;;  %v2818_v15 = vmul.f32 0.5, %v7261_v27 }
 0x2c3   : > { %v3206_v49 = vmul.f32 %v3078_v45, %v7287_v3  ;;  %v2290_v38 = vadd.f32 %v2289_v47, %v7135_v1  ;;  %v2378_v8 = vpop.f32.mrf.mxu3  ;;  %v2113_v5 = vpop.f32.mrf.mxu0  ;;  %v3841_v58 = vmul.f32 %v3713_v31, %v2817_v11  ;;  %v4847_v31 = vld [vmem:[%s5808_s14 + $0x2c] sm:$0xf] }
 0x2c4   : > { %v3975_v62 = vsel %vm7201_vm3, %v3838_v17, %v7229_v19  ;;  %v3209_v0 = vmul.f32 %v3081_v2, %v7291_v29  ;;  %v2114_v23 = vadd.f32 %v2113_v5, %v7125_v36  ;;  %v2202_v46 = vpop.f32.mrf.mxu1  ;;  %v4520_v19 = vld [vmem:[#allocation2 + $0xc8] sm:$0xf0] }
 0x2c5   : > { %v4096_v34 = vpack.c.bf16 %v3975_v62, %v3974_v50  ;;  %v3334_v6 = vadd.f32 %v3206_v49, %v7287_v3  ;;  %v7315_v43 = vadd.f32 %v2378_v8, %v2290_v38  ;;  %v7325_v49 = vor.u32 %v4835_v7, %v4518_v61  ;;  %v4576_v8 = vld [vmem:[%s5808_s14 + $0x38] sm:$0xf0] }
 0x2c6   : > { %v3337_v59 = vadd.f32 %v3209_v0, %v7291_v29  ;;  %v7318_v57 = vadd.f32 %v2202_v46, %v2114_v23  ;;  %v7327_v38 = vor.u32 %v4834_v39, %v4520_v19  ;;  %v4579_v0 = vor.u32 %v4847_v31, %v4576_v8  ;;  %v4879_v23 = vld [vmem:[%s5808_s14 + $0x12c] sm:$0xf]  ;;  %v4704_v46 = vld [vmem:[%s5808_s14 + $0x138] sm:$0xf0] }
 0x2c7   : > { %v5103_v54 = vpop.eup %5102  ;;  %4160 = vst [vmem:[%s5824_s18 + $0x30] sm:$0xff] %v4096_v34  ;;  %v3462_v30 = vmul.f32 0.7978846, %v3334_v6  ;;  %v2954_v56 = vmul.f32 0.044715, %v7315_v43  ;;  %v3978_v34 = vsel %vm7191_vm2, %v3841_v58, %v7233_v42  ;;  %v4707_v7 = vor.u32 %v4879_v23, %v4704_v46 }
 0x2c8   : > { %v3714_v12 = vadd.f32 1.0, %v5103_v54  ;;  %v3465_v45 = vmul.f32 0.7978846, %v3337_v59  ;;  %v2957_v17 = vmul.f32 0.044715, %v7318_v57  ;;  %v5105_v2 = vpop.eup %5104  ;;  %2627 = vmatpush.bf16.msrb.mxu2 %v4579_v0 }
 0x2c9   : > { %5106 = vtanh.f32 %v3462_v30  ;;  %v3082_v47 = vmul.f32 %v2954_v56, %v7315_v43  ;;  %v3717_v19 = vadd.f32 1.0, %v5105_v2  ;;  %2716 = vmatpush.bf16.msrb.mxu3 %v4707_v7  ;;  %v2822_v2 = vmul.f32 0.5, %v7287_v3  ;;  %v4574_v46 = vld [vmem:[%s5808_s14 + $0x28] sm:$0xf] }
 0x2ca   : > { %v3842_v5 = vmul.f32 %v3714_v12, %v2818_v15  ;;  %5108 = vtanh.f32 %v3465_v45  ;;  %v3085_v50 = vmul.f32 %v2957_v17, %v7318_v57  ;;  %v2291_v62 = vpop.f32.mrf.mxu2  ;;  %v2821_v12 = vmul.f32 0.5, %v7264_v13 }
 0x2cb   : > { %v3210_v11 = vmul.f32 %v3082_v47, %v7315_v43  ;;  %v2292_v6 = vadd.f32 %v2291_v62, %v7135_v1  ;;  %v2380_v61 = vpop.f32.mrf.mxu3  ;;  %v2116_v59 = vpop.f32.mrf.mxu0 }
 0x2cc   : > { %v3979_v39 = vsel %vm7201_vm3, %v3842_v5, %v7261_v27  ;;  %v3213_v54 = vmul.f32 %v3085_v50, %v7318_v57  ;;  %v2117_v30 = vadd.f32 %v2116_v59, %v7125_v36  ;;  %v2205_v56 = vpop.f32.mrf.mxu1  ;;  %v3845_v5 = vmul.f32 %v3717_v19, %v2821_v12 }
 0x2cd   : > { %v4098_v42 = vpack.c.bf16 %v3979_v39, %v3978_v34  ;;  %v3338_v58 = vadd.f32 %v3210_v11, %v7315_v43  ;;  %v7345_v15 = vadd.f32 %v2380_v61, %v2292_v6  ;;  %v4849_v34 = vld [vmem:[%s5808_s14 + $0x34] sm:$0xf0]  ;;  %v4702_v39 = vld [vmem:[%s5808_s14 + $0x128] sm:$0xf] }
 0x2ce   : > { %v3341_v45 = vadd.f32 %v3213_v54, %v7318_v57  ;;  %v7349_v17 = vadd.f32 %v2205_v56, %v2117_v30  ;;  %2155 = vmatmul.bf16.gmra.mxu0 %v7325_v49  ;;  %v4575_v7 = vor.u32 %v4849_v34, %v4574_v46  ;;  %v4881_v54 = vld [vmem:[%s5808_s14 + $0x134] sm:$0xf0]  ;;  %v3982_v12 = vsel %vm7191_vm2, %v3845_v5, %v7264_v13  ;;  %v4526_v13 = vld [vmem:[#allocation2 + $0xd0] sm:$0xf] }
 0x2cf   : > { %v5107_v27 = vpop.eup %5106  ;;  %4162 = vst [vmem:[%s5824_s18 + $0x40] sm:$0xff] %v4098_v42  ;;  %v3466_v47 = vmul.f32 0.7978846, %v3338_v58  ;;  %v2958_v31 = vmul.f32 0.044715, %v7345_v15  ;;  %2244 = vmatmul.bf16.gmra.mxu1 %v7327_v38  ;;  %2333 = vmatmul.bf16.gmra.mxu2 %v7325_v49  ;;  %v4703_v58 = vor.u32 %v4881_v54, %v4702_v39 }
 0x2d0   : > { %v5109_v8 = vpop.eup %5108  ;;  %v3718_v50 = vadd.f32 1.0, %v5107_v27  ;;  %v3469_v62 = vmul.f32 0.7978846, %v3341_v45  ;;  %v2961_v0 = vmul.f32 0.044715, %v7349_v17  ;;  %2422 = vmatmul.bf16.gmra.mxu3 %v7327_v38  ;;  %2449 = vmatpush.bf16.msrb.mxu0 %v4575_v7  ;;  %v2826_v7 = vmul.f32 0.5, %v7315_v43 }
 0x2d1   : > { %5110 = vtanh.f32 %v3466_v47  ;;  %v3086_v23 = vmul.f32 %v2958_v31, %v7345_v15  ;;  %v3721_v6 = vadd.f32 1.0, %v5109_v8  ;;  %v2825_v8 = vmul.f32 0.5, %v7291_v29  ;;  %2538 = vmatpush.bf16.msrb.mxu1 %v4703_v58  ;;  %v4528_v46 = vld [vmem:[#allocation2 + $0xd8] sm:$0xf0] }
 0x2d2   : > { %v3846_v11 = vmul.f32 %v3718_v50, %v2822_v2  ;;  %v3089_v61 = vmul.f32 %v2961_v0, %v7349_v17  ;;  %v2294_v59 = vpop.f32.mrf.mxu2  ;;  %5112 = vtanh.f32 %v3469_v62 }
 0x2d3   : > { %v3214_v19 = vmul.f32 %v3086_v23, %v7345_v15  ;;  %v2295_v30 = vadd.f32 %v2294_v59, %v7135_v1  ;;  %v2383_v56 = vpop.f32.mrf.mxu3  ;;  %v2118_v42 = vpop.f32.mrf.mxu0  ;;  %v4836_v23 = vld [vmem:[#allocation2 + $0xd4] sm:$0xf] }
 0x2d4   : > { %v3983_v45 = vsel %vm7201_vm3, %v3846_v11, %v7287_v3  ;;  %v3217_v27 = vmul.f32 %v3089_v61, %v7349_v17  ;;  %v2119_v2 = vadd.f32 %v2118_v42, %v7125_v36  ;;  %v2207_v47 = vpop.f32.mrf.mxu1  ;;  %v4837_v3 = vld [vmem:[#allocation2 + $0xd4] sm:$0xf0]  ;;  %v3849_v11 = vmul.f32 %v3721_v6, %v2825_v8 }
 0x2d5   : > { %v4100_v31 = vpack.c.bf16 %v3983_v45, %v3982_v12  ;;  %v3342_v50 = vadd.f32 %v3214_v19, %v7345_v15  ;;  %v7377_v62 = vadd.f32 %v2383_v56, %v2295_v30  ;;  %v7388_v45 = vor.u32 %v4837_v3, %v4526_v13 }
 0x2d6   : > { %v3345_v5 = vadd.f32 %v3217_v27, %v7349_v17  ;;  %v7380_v0 = vadd.f32 %v2207_v47, %v2119_v2  ;;  %v3986_v6 = vsel %vm7191_vm2, %v3849_v11, %v7291_v29  ;;  %v7395_v8 = vor.u32 %v4836_v23, %v4528_v46 }
 0x2d7   : > { %v5111_v34 = vpop.eup %5110  ;;  %4164 = vst [vmem:[%s5824_s18 + $0x50] sm:$0xff] %v4100_v31  ;;  %v3470_v61 = vmul.f32 0.7978846, %v3342_v50  ;;  %v2962_v59 = vmul.f32 0.044715, %v7377_v62 }
 0x2d8   : > { %v3722_v39 = vadd.f32 1.0, %v5111_v34  ;;  %v3473_v54 = vmul.f32 0.7978846, %v3345_v5  ;;  %v2965_v19 = vmul.f32 0.044715, %v7380_v0  ;;  %v5113_v30 = vpop.eup %5112  ;;  %9011 = vst [vmem:[#allocation63_spill] sm:$0xff] %v7388_v45 }
 0x2d9   : > { %5114 = vtanh.f32 %v3470_v61  ;;  %v3090_v56 = vmul.f32 %v2962_v59, %v7377_v62  ;;  %9012 = vst [vmem:[#allocation64_spill] sm:$0xff] %v7395_v8  ;;  %v3725_v5 = vadd.f32 1.0, %v5113_v30  ;;  %v2829_v59 = vmul.f32 0.5, %v7318_v57 }
 0x2da   : > { %v3850_v42 = vmul.f32 %v3722_v39, %v2826_v7  ;;  %5116 = vtanh.f32 %v3473_v54  ;;  %v3093_v58 = vmul.f32 %v2965_v19, %v7380_v0  ;;  %v2296_v12 = vpop.f32.mrf.mxu2  ;;  %v2830_v7 = vmul.f32 0.5, %v7345_v15 }
 0x2db   : > { %v3218_v27 = vmul.f32 %v3090_v56, %v7377_v62  ;;  %v2297_v2 = vadd.f32 %v2296_v12, %v7135_v1  ;;  %v2385_v47 = vpop.f32.mrf.mxu3  ;;  %v2121_v31 = vpop.f32.mrf.mxu0  ;;  %v3853_v30 = vmul.f32 %v3725_v5, %v2829_v59 }
 0x2dc   : > { %v3987_v50 = vsel %vm7201_vm3, %v3850_v42, %v7315_v43  ;;  %v3221_v13 = vmul.f32 %v3093_v58, %v7380_v0  ;;  %v2122_v3 = vadd.f32 %v2121_v31, %v7125_v36  ;;  %v2210_v34 = vpop.f32.mrf.mxu1  ;;  %v2833_v31 = vmul.f32 0.5, %v7349_v17 }
 0x2dd   : > { %v4102_v29 = vpack.c.bf16 %v3987_v50, %v3986_v6  ;;  %v3346_v11 = vadd.f32 %v3218_v27, %v7377_v62  ;;  %v7403_v61 = vadd.f32 %v2385_v47, %v2297_v2 }
 0x2de   : > { %v3349_v23 = vadd.f32 %v3221_v13, %v7380_v0  ;;  %v7407_v46 = vadd.f32 %v2210_v34, %v2122_v3  ;;  %2160 = vmatmul.bf16.gmra.mxu0 %v7388_v45  ;;  %v3990_v34 = vsel %vm7191_vm2, %v3853_v30, %v7318_v57 }
 0x2df   : > { %v5115_v43 = vpop.eup %5114  ;;  %4166 = vst [vmem:[%s5824_s18 + $0x60] sm:$0xff] %v4102_v29  ;;  %v3474_v39 = vmul.f32 0.7978846, %v3346_v11  ;;  %v2966_v54 = vmul.f32 0.044715, %v7403_v61  ;;  %2249 = vmatmul.bf16.gmra.mxu1 %v7395_v8  ;;  %2338 = vmatmul.bf16.gmra.mxu2 %v7388_v45 }
 0x2e0   : > { %v5117_v19 = vpop.eup %5116  ;;  %v3726_v56 = vadd.f32 1.0, %v5115_v43  ;;  %v3477_v42 = vmul.f32 0.7978846, %v3349_v23  ;;  %v2969_v58 = vmul.f32 0.044715, %v7407_v46  ;;  %2427 = vmatmul.bf16.gmra.mxu3 %v7395_v8 }
 0x2e1   : > { %5118 = vtanh.f32 %v3474_v39  ;;  %v3094_v12 = vmul.f32 %v2966_v54, %v7403_v61  ;;  %v3729_v27 = vadd.f32 1.0, %v5117_v19  ;;  %v4534_v43 = vld [vmem:[#allocation2 + $0xe0] sm:$0xf]  ;;  %v4845_v8 = vld [vmem:[%s5808_s14 + $0x14] sm:$0xf0] }
 0x2e2   : > { %v3854_v6 = vmul.f32 %v3726_v56, %v2830_v7  ;;  %5120 = vtanh.f32 %v3477_v42  ;;  %v3097_v2 = vmul.f32 %v2969_v58, %v7407_v46  ;;  %v2299_v47 = vpop.f32.mrf.mxu2  ;;  %v4839_v7 = vld [vmem:[#allocation2 + $0xe4] sm:$0xf0]  ;;  %v4838_v42 = vld [vmem:[#allocation2 + $0xe4] sm:$0xf]  ;;  %v4686_v45 = vld [vmem:[%s5808_s14 + $0x108] sm:$0xf] }
 0x2e3   : > { %v3222_v50 = vmul.f32 %v3094_v12, %v7403_v61  ;;  %v2300_v5 = vadd.f32 %v2299_v47, %v7135_v1  ;;  %v2388_v13 = vpop.f32.mrf.mxu3  ;;  %v2123_v3 = vpop.f32.mrf.mxu0  ;;  %v3857_v56 = vmul.f32 %v3729_v27, %v2833_v31 }
 0x2e4   : > { %v3991_v29 = vsel %vm7201_vm3, %v3854_v6, %v7345_v15  ;;  %v3225_v11 = vmul.f32 %v3097_v2, %v7407_v46  ;;  %v2124_v59 = vadd.f32 %v2123_v3, %v7125_v36  ;;  %v2212_v23 = vpop.f32.mrf.mxu1  ;;  %v4536_v15 = vld [vmem:[#allocation2 + $0xe8] sm:$0xf0]  ;;  %v7438_v2 = vor.u32 %v4839_v7, %v4534_v43 }
 0x2e5   : > { %v4104_v39 = vpack.c.bf16 %v3991_v29, %v3990_v34  ;;  %v3350_v54 = vadd.f32 %v3222_v50, %v7403_v61  ;;  %v7431_v19 = vadd.f32 %v2388_v13, %v2300_v5  ;;  %v2834_v50 = vmul.f32 0.5, %v7377_v62  ;;  %v4843_v29 = vld [vmem:[%s5808_s14 + $0xc] sm:$0xf] }
 0x2e6   : > { %v3353_v57 = vadd.f32 %v3225_v11, %v7407_v46  ;;  %v7434_v30 = vadd.f32 %v2212_v23, %v2124_v59  ;;  %v7443_v34 = vor.u32 %v4838_v42, %v4536_v15  ;;  %v4560_v11 = vld [vmem:[%s5808_s14 + $0x18] sm:$0xf0]  ;;  %v3994_v59 = vsel %vm7191_vm2, %v3857_v56, %v7349_v17  ;;  %v4877_v17 = vld [vmem:[%s5808_s14 + $0x114] sm:$0xf0] }
 0x2e7   : > { %v5119_v58 = vpop.eup %5118  ;;  %4168 = vst [vmem:[%s5824_s18 + $0x70] sm:$0xff] %v4104_v39  ;;  %v3478_v12 = vmul.f32 0.7978846, %v3350_v54  ;;  %v2970_v6 = vmul.f32 0.044715, %v7431_v19  ;;  %v4563_v39 = vor.u32 %v4843_v29, %v4560_v11  ;;  %v2837_v29 = vmul.f32 0.5, %v7380_v0 }
 0x2e8   : > { %v5121_v47 = vpop.eup %5120  ;;  %v3730_v27 = vadd.f32 1.0, %v5119_v58  ;;  %v3481_v31 = vmul.f32 0.7978846, %v3353_v57  ;;  %v2973_v5 = vmul.f32 0.044715, %v7434_v30 }
 0x2e9   : > { %v3733_v13 = vadd.f32 1.0, %v5121_v47  ;;  %5122 = vtanh.f32 %v3478_v12  ;;  %v3098_v3 = vmul.f32 %v2970_v6, %v7431_v19  ;;  %v4875_v54 = vld [vmem:[%s5808_s14 + $0x10c] sm:$0xf]  ;;  %v4688_v57 = vld [vmem:[%s5808_s14 + $0x118] sm:$0xf0]  ;;  %2628 = vmatpush.bf16.msrb.mxu2 %v4563_v39 }
 0x2ea   : > { %v3858_v23 = vmul.f32 %v3730_v27, %v2834_v50  ;;  %v3101_v43 = vmul.f32 %v2973_v5, %v7434_v30  ;;  %v2301_v7 = vpop.f32.mrf.mxu2  ;;  %v4558_v58 = vld [vmem:[%s5808_s14 + $0x8] sm:$0xf]  ;;  %5124 = vtanh.f32 %v3481_v31  ;;  %v4691_v47 = vor.u32 %v4875_v54, %v4688_v57 }
 0x2eb   : > { %v3226_v42 = vmul.f32 %v3098_v3, %v7431_v19  ;;  %v2302_v15 = vadd.f32 %v2301_v7, %v7135_v1  ;;  %v2390_v12 = vpop.f32.mrf.mxu3  ;;  %v2126_v6 = vpop.f32.mrf.mxu0  ;;  %v4559_v5 = vor.u32 %v4845_v8, %v4558_v58 }
 0x2ec   : > { %v3995_v56 = vsel %vm7201_vm3, %v3858_v23, %v7377_v62  ;;  %v3229_v50 = vmul.f32 %v3101_v43, %v7434_v30  ;;  %v2127_v27 = vadd.f32 %v2126_v6, %v7125_v36  ;;  %v2215_v31 = vpop.f32.mrf.mxu1  ;;  %2717 = vmatpush.bf16.msrb.mxu3 %v4691_v47  ;;  %v4687_v62 = vor.u32 %v4877_v17, %v4686_v45 }
 0x2ed   : > { %v4106_v3 = vpack.c.bf16 %v3995_v56, %v3994_v59  ;;  %v3354_v11 = vadd.f32 %v3226_v42, %v7431_v19  ;;  %v7466_v7 = vadd.f32 %v2390_v12, %v2302_v15  ;;  %v3861_v43 = vmul.f32 %v3733_v13, %v2837_v29  ;;  %2450 = vmatpush.bf16.msrb.mxu0 %v4559_v5 }
 0x2ee   : > { %v3357_v54 = vadd.f32 %v3229_v50, %v7434_v30  ;;  %v7469_v57 = vadd.f32 %v2215_v31, %v2127_v27  ;;  %2165 = vmatmul.bf16.gmra.mxu0 %v7438_v2  ;;  %v2838_v59 = vmul.f32 0.5, %v7403_v61  ;;  %2539 = vmatpush.bf16.msrb.mxu1 %v4687_v62 }
 0x2ef   : > { %v5123_v23 = vpop.eup %5122  ;;  %4170 = vst [vmem:[%s5824_s18 + $0x80] sm:$0xff] %v4106_v3  ;;  %v3482_v39 = vmul.f32 0.7978846, %v3354_v11  ;;  %v2974_v8 = vmul.f32 0.044715, %v7466_v7  ;;  %2254 = vmatmul.bf16.gmra.mxu1 %v7443_v34  ;;  %2343 = vmatmul.bf16.gmra.mxu2 %v7438_v2  ;;  %v3998_v17 = vsel %vm7191_vm2, %v3861_v43, %v7380_v0 }
 0x2f0   : > { %v3734_v58 = vadd.f32 1.0, %v5123_v23  ;;  %v3485_v42 = vmul.f32 0.7978846, %v3357_v54  ;;  %v2977_v15 = vmul.f32 0.044715, %v7469_v57  ;;  %2432 = vmatmul.bf16.gmra.mxu3 %v7443_v34  ;;  %v5125_v45 = vpop.eup %5124 }
 0x2f1   : > { %5126 = vtanh.f32 %v3482_v39  ;;  %v3102_v13 = vmul.f32 %v2974_v8, %v7466_v7  ;;  %v3737_v3 = vadd.f32 1.0, %v5125_v45  ;;  %v4542_v43 = vld [vmem:[#allocation2 + $0xf0] sm:$0xf]  ;;  %v4841_v39 = vld [vmem:[#allocation2 + $0xf4] sm:$0xf0]  ;;  %v2841_v8 = vmul.f32 0.5, %v7407_v46 }
 0x2f2   : > { %v3862_v12 = vmul.f32 %v3734_v58, %v2838_v59  ;;  %5128 = vtanh.f32 %v3485_v42  ;;  %v3105_v6 = vmul.f32 %v2977_v15, %v7469_v57  ;;  %v2304_v47 = vpop.f32.mrf.mxu2  ;;  %v4544_v42 = vld [vmem:[#allocation2 + $0xf8] sm:$0xf0]  ;;  %v2842_v45 = vmul.f32 0.5, %v7431_v19 }
 0x2f3   : > { %v3230_v56 = vmul.f32 %v3102_v13, %v7466_v7  ;;  %v2305_v50 = vadd.f32 %v2304_v47, %v7135_v1  ;;  %v2393_v27 = vpop.f32.mrf.mxu3  ;;  %v2128_v31 = vpop.f32.mrf.mxu0  ;;  %v3865_v47 = vmul.f32 %v3737_v3, %v2841_v8 }
 0x2f4   : > { %v3999_v5 = vsel %vm7201_vm3, %v3862_v12, %v7403_v61  ;;  %v3233_v29 = vmul.f32 %v3105_v6, %v7469_v57  ;;  %v2129_v11 = vadd.f32 %v2128_v31, %v7125_v36  ;;  %v2217_v54 = vpop.f32.mrf.mxu1  ;;  %v4840_v61 = vld [vmem:[#allocation2 + $0xf4] sm:$0xf] }
 0x2f5   : > { %v4108_v62 = vpack.c.bf16 %v3999_v5, %v3998_v17  ;;  %v3358_v0 = vadd.f32 %v3230_v56, %v7466_v7  ;;  %v7492_v23 = vadd.f32 %v2393_v27, %v2305_v50 }
 0x2f6   : > { %v3361_v59 = vadd.f32 %v3233_v29, %v7469_v57  ;;  %v7496_v58 = vadd.f32 %v2217_v54, %v2129_v11  ;;  %v7504_v11 = vor.u32 %v4841_v39, %v4542_v43  ;;  %v7506_v54 = vor.u32 %v4840_v61, %v4544_v42 }
 0x2f7   : > { %v5127_v15 = vpop.eup %5126  ;;  %4172 = vst [vmem:[%s5824_s18 + $0x90] sm:$0xff] %v4108_v62  ;;  %v3486_v13 = vmul.f32 0.7978846, %v3358_v0  ;;  %v2978_v12 = vmul.f32 0.044715, %v7492_v23 }
 0x2f8   : > { %v5129_v6 = vpop.eup %5128  ;;  %v3738_v17 = vadd.f32 1.0, %v5127_v15  ;;  %v3489_v56 = vmul.f32 0.7978846, %v3361_v59  ;;  %v2981_v50 = vmul.f32 0.044715, %v7496_v58  ;;  %v4002_v15 = vsel %vm7191_vm2, %v3865_v47, %v7407_v46 }
 0x2f9   : > { %5130 = vtanh.f32 %v3486_v13  ;;  %v3106_v27 = vmul.f32 %v2978_v12, %v7492_v23  ;;  %v3741_v62 = vadd.f32 1.0, %v5129_v6  ;;  %v2845_v13 = vmul.f32 0.5, %v7434_v30 }
 0x2fa   : > { %v3866_v31 = vmul.f32 %v3738_v17, %v2842_v45  ;;  %v3109_v5 = vmul.f32 %v2981_v50, %v7496_v58  ;;  %v2306_v29 = vpop.f32.mrf.mxu2  ;;  %5132 = vtanh.f32 %v3489_v56 }
 0x2fb   : > { %v3234_v0 = vmul.f32 %v3106_v27, %v7492_v23  ;;  %v2307_v3 = vadd.f32 %v2306_v29, %v7135_v1  ;;  %v2395_v8 = vpop.f32.mrf.mxu3  ;;  %v2131_v59 = vpop.f32.mrf.mxu0  ;;  %v2846_v27 = vmul.f32 0.5, %v7466_v7 }
 0x2fc   : > { %v4003_v43 = vsel %vm7201_vm3, %v3866_v31, %v7431_v19  ;;  %v3237_v39 = vmul.f32 %v3109_v5, %v7496_v58  ;;  %v2132_v61 = vadd.f32 %v2131_v59, %v7125_v36  ;;  %v2220_v42 = vpop.f32.mrf.mxu1  ;;  %v3869_v19 = vmul.f32 %v3741_v62, %v2845_v13 }
 0x2fd   : > { %v4110_v45 = vpack.c.bf16 %v4003_v43, %v4002_v15  ;;  %v3362_v12 = vadd.f32 %v3234_v0, %v7492_v23  ;;  %v7520_v6 = vadd.f32 %v2395_v8, %v2307_v3 }
 0x2fe   : > { %v3365_v17 = vadd.f32 %v3237_v39, %v7496_v58  ;;  %v7523_v56 = vadd.f32 %v2220_v42, %v2132_v61  ;;  %2170 = vmatmul.bf16.gmra.mxu0 %v7504_v11  ;;  %v4006_v15 = vsel %vm7191_vm2, %v3869_v19, %v7434_v30 }
 0x2ff   : > { %v5131_v46 = vpop.eup %5130  ;;  %4174 = vst [vmem:[%s5824_s18 + $0xa0] sm:$0xff] %v4110_v45  ;;  %v3490_v47 = vmul.f32 0.7978846, %v3362_v12  ;;  %v2982_v50 = vmul.f32 0.044715, %v7520_v6  ;;  %2259 = vmatmul.bf16.gmra.mxu1 %v7506_v54  ;;  %2348 = vmatmul.bf16.gmra.mxu2 %v7504_v11 }
 0x300   : > { %v3742_v31 = vadd.f32 1.0, %v5131_v46  ;;  %v3493_v5 = vmul.f32 0.7978846, %v3365_v17  ;;  %v2985_v29 = vmul.f32 0.044715, %v7523_v56  ;;  %2437 = vmatmul.bf16.gmra.mxu3 %v7506_v54  ;;  %v5133_v0 = vpop.eup %5132 }
 0x301   : > { %5134 = vtanh.f32 %v3490_v47  ;;  %v3110_v3 = vmul.f32 %v2982_v50, %v7520_v6  ;;  %v3745_v13 = vadd.f32 1.0, %v5133_v0  ;;  %v2849_v50 = vmul.f32 0.5, %v7469_v57 }
 0x302   : > { %v3870_v62 = vmul.f32 %v3742_v31, %v2846_v27  ;;  %5136 = vtanh.f32 %v3493_v5  ;;  %v3113_v8 = vmul.f32 %v2985_v29, %v7523_v56  ;;  %v2309_v59 = vpop.f32.mrf.mxu2 }
 0x303   : > { %v3238_v43 = vmul.f32 %v3110_v3, %v7520_v6  ;;  %v2310_v39 = vadd.f32 %v2309_v59, %v7135_v1  ;;  %v2398_v61 = vpop.f32.mrf.mxu3  ;;  %v2133_v42 = vpop.f32.mrf.mxu0 }
 0x304   : > { %v4007_v45 = vsel %vm7201_vm3, %v3870_v62, %v7466_v7  ;;  %v3241_v12 = vmul.f32 %v3113_v8, %v7523_v56  ;;  %v2134_v17 = vadd.f32 %v2133_v42, %v7125_v36  ;;  %v2222_v46 = vpop.f32.mrf.mxu1  ;;  %v2850_v7 = vmul.f32 0.5, %v7492_v23 }
 0x305   : > { %v4112_v47 = vpack.c.bf16 %v4007_v45, %v4006_v15  ;;  %v3366_v30 = vadd.f32 %v3238_v43, %v7520_v6  ;;  %v7546_v19 = vadd.f32 %v2398_v61, %v2310_v39  ;;  %v3873_v62 = vmul.f32 %v3745_v13, %v2849_v50 }
 0x306   : > { %v3369_v27 = vadd.f32 %v3241_v12, %v7523_v56  ;;  %v7550_v31 = vadd.f32 %v2222_v46, %v2134_v17 }
 0x307   : > { %v5135_v5 = vpop.eup %5134  ;;  %4176 = vst [vmem:[%s5824_s18 + $0xb0] sm:$0xff] %v4112_v47  ;;  %v3494_v29 = vmul.f32 0.7978846, %v3366_v30  ;;  %v2986_v0 = vmul.f32 0.044715, %v7546_v19  ;;  %v4010_v47 = vsel %vm7191_vm2, %v3873_v62, %v7469_v57 }
 0x308   : > { %v5137_v3 = vpop.eup %5136  ;;  %v3746_v8 = vadd.f32 1.0, %v5135_v5  ;;  %v3497_v59 = vmul.f32 0.7978846, %v3369_v27  ;;  %v2989_v15 = vmul.f32 0.044715, %v7550_v31 }
 0x309   : > { %5138 = vtanh.f32 %v3494_v29  ;;  %v3114_v43 = vmul.f32 %v2986_v0, %v7546_v19  ;;  %v3749_v45 = vadd.f32 1.0, %v5137_v3  ;;  %v2853_v29 = vmul.f32 0.5, %v7496_v58 }
 0x30a   : > { %v3874_v39 = vmul.f32 %v3746_v8, %v2850_v7  ;;  %v3117_v61 = vmul.f32 %v2989_v15, %v7550_v31  ;;  %v2311_v42 = vpop.f32.mrf.mxu2  ;;  %5140 = vtanh.f32 %v3497_v59 }
 0x30b   : > { %v3242_v12 = vmul.f32 %v3114_v43, %v7546_v19  ;;  %v2312_v17 = vadd.f32 %v2311_v42, %v7135_v1  ;;  %v2400_v46 = vpop.f32.mrf.mxu3  ;;  %v2136_v13 = vpop.f32.mrf.mxu0  ;;  %v2854_v43 = vmul.f32 0.5, %v7520_v6 }
 0x30c   : > { %v4011_v30 = vsel %vm7201_vm3, %v3874_v39, %v7492_v23  ;;  %v3245_v50 = vmul.f32 %v3117_v61, %v7550_v31  ;;  %v2137_v27 = vadd.f32 %v2136_v13, %v7125_v36  ;;  %v2225_v5 = vpop.f32.mrf.mxu1  ;;  %v3877_v23 = vmul.f32 %v3749_v45, %v2853_v29 }
 0x30d   : > { %v4114_v7 = vpack.c.bf16 %v4011_v30, %v4010_v47  ;;  %v3370_v0 = vadd.f32 %v3242_v12, %v7546_v19  ;;  %v7570_v3 = vadd.f32 %v2400_v46, %v2312_v17 }
 0x30e   : > { %v3373_v8 = vadd.f32 %v3245_v50, %v7550_v31  ;;  %v7573_v59 = vadd.f32 %v2225_v5, %v2137_v27  ;;  %2451 = vmatmul.bf16.vlgmr.msrb.gmra.mxu0 %v7030_v53 }
 0x30f   : > { %v5139_v57 = vpop.eup %5138  ;;  %4178 = vst [vmem:[%s5824_s18 + $0xc0] sm:$0xff] %v4114_v7  ;;  %v3498_v62 = vmul.f32 0.7978846, %v3370_v0  ;;  %v2990_v15 = vmul.f32 0.044715, %v7570_v3  ;;  %2540 = vmatmul.bf16.vlgmr.msrb.gmra.mxu1 %v7034_v4  ;;  %2629 = vmatmul.bf16.vlgmr.msrb.gmra.mxu2 %v7030_v53  ;;  %v4014_v53 = vsel %vm7191_vm2, %v3877_v23, %v7496_v58  ;;  %v2857_v23 = vmul.f32 0.5, %v7523_v56 }
 0x310   : > { %v3750_v39 = vadd.f32 1.0, %v5139_v57  ;;  %v3501_v61 = vmul.f32 0.7978846, %v3373_v8  ;;  %v2993_v42 = vmul.f32 0.044715, %v7573_v59  ;;  %2718 = vmatmul.bf16.vlgmr.msrb.gmra.mxu3 %v7034_v4  ;;  %v5141_v12 = vpop.eup %5140 }
 0x311   : > { %5142 = vtanh.f32 %v3498_v62  ;;  %v3118_v17 = vmul.f32 %v2990_v15, %v7570_v3  ;;  %v3753_v5 = vadd.f32 1.0, %v5141_v12 }
 0x312   : > { %v3878_v45 = vmul.f32 %v3750_v39, %v2854_v43  ;;  %5144 = vtanh.f32 %v3501_v61  ;;  %v3121_v46 = vmul.f32 %v2993_v42, %v7573_v59  ;;  %v2314_v13 = vpop.f32.mrf.mxu2 }
 0x313   : > { %v3246_v47 = vmul.f32 %v3118_v17, %v7570_v3  ;;  %v2315_v30 = vadd.f32 %v2314_v13, %v7135_v1  ;;  %v2403_v50 = vpop.f32.mrf.mxu3  ;;  %v2138_v4 = vpop.f32.mrf.mxu0  ;;  %v3881_v12 = vmul.f32 %v3753_v5, %v2857_v23 }
 0x314   : > { %v4015_v27 = vsel %vm7201_vm3, %v3878_v45, %v7520_v6  ;;  %v3249_v7 = vmul.f32 %v3121_v46, %v7573_v59  ;;  %v2139_v29 = vadd.f32 %v2138_v4, %v7125_v36  ;;  %v2227_v0 = vpop.f32.mrf.mxu1  ;;  %v2858_v6 = vmul.f32 0.5, %v7546_v19 }
 0x315   : > { %v4116_v8 = vpack.c.bf16 %v4015_v27, %v4014_v53  ;;  %v3374_v58 = vadd.f32 %v3246_v47, %v7570_v3  ;;  %v7596_v57 = vadd.f32 %v2403_v50, %v2315_v30 }
 0x316   : > { %v3377_v62 = vadd.f32 %v3249_v7, %v7573_v59  ;;  %v7600_v15 = vadd.f32 %v2227_v0, %v2139_v29  ;;  %v4018_v29 = vsel %vm7191_vm2, %v3881_v12, %v7523_v56 }
 0x317   : > { %v5143_v43 = vpop.eup %5142  ;;  %4180 = vst [vmem:[%s5824_s18 + $0xd0] sm:$0xff] %v4116_v8  ;;  %v3502_v39 = vmul.f32 0.7978846, %v3374_v58  ;;  %v2994_v61 = vmul.f32 0.044715, %v7596_v57 }
 0x318   : > { %v5145_v42 = vpop.eup %5144  ;;  %v3754_v17 = vadd.f32 1.0, %v5143_v43  ;;  %v3505_v45 = vmul.f32 0.7978846, %v3377_v62  ;;  %v2997_v46 = vmul.f32 0.044715, %v7600_v15  ;;  %v2861_v43 = vmul.f32 0.5, %v7550_v31 }
 0x319   : > { %5146 = vtanh.f32 %v3502_v39  ;;  %v3122_v13 = vmul.f32 %v2994_v61, %v7596_v57  ;;  %v3757_v50 = vadd.f32 1.0, %v5145_v42 }
 0x31a   : > { %v3882_v53 = vmul.f32 %v3754_v17, %v2858_v6  ;;  %v3125_v47 = vmul.f32 %v2997_v46, %v7600_v15  ;;  %v2316_v30 = vpop.f32.mrf.mxu2  ;;  %5148 = vtanh.f32 %v3505_v45  ;;  %v2862_v45 = vmul.f32 0.5, %v7570_v3 }
 0x31b   : > { %v3250_v4 = vmul.f32 %v3122_v13, %v7596_v57  ;;  %v2317_v27 = vadd.f32 %v2316_v30, %v7135_v1  ;;  %v2405_v7 = vpop.f32.mrf.mxu3  ;;  %v2141_v5 = vpop.f32.mrf.mxu0 }
 0x31c   : > { %v4019_v0 = vsel %vm7201_vm3, %v3882_v53, %v7546_v19  ;;  %v3253_v8 = vmul.f32 %v3125_v47, %v7600_v15  ;;  %v2142_v58 = vadd.f32 %v2141_v5, %v7125_v36  ;;  %v2230_v23 = vpop.f32.mrf.mxu1  ;;  %v3885_v19 = vmul.f32 %v3757_v50, %v2861_v43 }
 0x31d   : > { %v4118_v62 = vpack.c.bf16 %v4019_v0, %v4018_v29  ;;  %v3378_v6 = vadd.f32 %v3250_v4, %v7596_v57  ;;  %v7620_v39 = vadd.f32 %v2405_v7, %v2317_v27 }
 0x31e   : > { %v3381_v61 = vadd.f32 %v3253_v8, %v7600_v15  ;;  %v7623_v42 = vadd.f32 %v2230_v23, %v2142_v58  ;;  %2456 = vmatmul.bf16.gmra.mxu0 %v7048_v63 }
 0x31f   : > { %v5147_v56 = vpop.eup %5146  ;;  %4182 = vst [vmem:[%s5824_s18 + $0xe0] sm:$0xff] %v4118_v62  ;;  %v3506_v12 = vmul.f32 0.7978846, %v3378_v6  ;;  %v2998_v17 = vmul.f32 0.044715, %v7620_v39  ;;  %2545 = vmatmul.bf16.gmra.mxu1 %v7050_v16  ;;  %2634 = vmatmul.bf16.gmra.mxu2 %v7048_v63  ;;  %v4022_v63 = vsel %vm7191_vm2, %v3885_v19, %v7550_v31 }
 0x320   : > { %v3758_v46 = vadd.f32 1.0, %v5147_v56  ;;  %v3509_v13 = vmul.f32 0.7978846, %v3381_v61  ;;  %v3001_v53 = vmul.f32 0.044715, %v7623_v42  ;;  %2723 = vmatmul.bf16.gmra.mxu3 %v7050_v16  ;;  %v5149_v47 = vpop.eup %5148  ;;  %v2865_v61 = vmul.f32 0.5, %v7573_v59 }
 0x321   : > { %5150 = vtanh.f32 %v3506_v12  ;;  %v3126_v30 = vmul.f32 %v2998_v17, %v7620_v39  ;;  %v3761_v8 = vadd.f32 1.0, %v5149_v47 }
 0x322   : > { %v3886_v50 = vmul.f32 %v3758_v46, %v2862_v45  ;;  %5152 = vtanh.f32 %v3509_v13  ;;  %v3129_v4 = vmul.f32 %v3001_v53, %v7623_v42  ;;  %v2319_v27 = vpop.f32.mrf.mxu2 }
 0x323   : > { %v3254_v7 = vmul.f32 %v3126_v30, %v7620_v39  ;;  %v2320_v5 = vadd.f32 %v2319_v27, %v7135_v1  ;;  %v2408_v29 = vpop.f32.mrf.mxu3  ;;  %v2143_v16 = vpop.f32.mrf.mxu0  ;;  %v3889_v13 = vmul.f32 %v3761_v8, %v2865_v61  ;;  %v2869_v61 = vmul.f32 0.5, %v7600_v15 }
 0x324   : > { %v4023_v0 = vsel %vm7201_vm3, %v3886_v50, %v7570_v3  ;;  %v3257_v58 = vmul.f32 %v3129_v4, %v7623_v42  ;;  %v2144_v23 = vadd.f32 %v2143_v16, %v7125_v36  ;;  %v2232_v62 = vpop.f32.mrf.mxu1  ;;  %v2866_v3 = vmul.f32 0.5, %v7596_v57 }
 0x325   : > { %v4120_v43 = vpack.c.bf16 %v4023_v0, %v4022_v63  ;;  %v3382_v31 = vadd.f32 %v3254_v7, %v7620_v39  ;;  %v7646_v6 = vadd.f32 %v2408_v29, %v2320_v5  ;;  %v4026_v8 = vsel %vm7191_vm2, %v3889_v13, %v7573_v59 }
 0x326   : > { %v3385_v56 = vadd.f32 %v3257_v58, %v7623_v42  ;;  %v7650_v19 = vadd.f32 %v2232_v62, %v2144_v23  ;;  %v2870_v13 = vmul.f32 0.5, %v7620_v39 }
 0x327   : > { %v5151_v12 = vpop.eup %5150  ;;  %4184 = vst [vmem:[%s5824_s18 + $0xf0] sm:$0xff] %v4120_v43  ;;  %v3510_v17 = vmul.f32 0.7978846, %v3382_v31  ;;  %v3002_v45 = vmul.f32 0.044715, %v7646_v6 }
 0x328   : > { %v5153_v46 = vpop.eup %5152  ;;  %v3762_v53 = vadd.f32 1.0, %v5151_v12  ;;  %v3513_v47 = vmul.f32 0.7978846, %v3385_v56  ;;  %v3005_v30 = vmul.f32 0.044715, %v7650_v19 }
 0x329   : > { %5154 = vtanh.f32 %v3510_v17  ;;  %v3130_v50 = vmul.f32 %v3002_v45, %v7646_v6  ;;  %v3765_v7 = vadd.f32 1.0, %v5153_v46 }
 0x32a   : > { %v3890_v4 = vmul.f32 %v3762_v53, %v2866_v3  ;;  %v3133_v27 = vmul.f32 %v3005_v30, %v7650_v19  ;;  %v2321_v63 = vpop.f32.mrf.mxu2  ;;  %5156 = vtanh.f32 %v3513_v47 }
 0x32b   : > { %v3258_v5 = vmul.f32 %v3130_v50, %v7646_v6  ;;  %v2322_v29 = vadd.f32 %v2321_v63, %v7135_v1  ;;  %v2410_v16 = vpop.f32.mrf.mxu3  ;;  %v2146_v0 = vpop.f32.mrf.mxu0 }
 0x32c   : > { %v4027_v58 = vsel %vm7201_vm3, %v3890_v4, %v7596_v57  ;;  %v3261_v23 = vmul.f32 %v3133_v27, %v7650_v19  ;;  %v2147_v62 = vadd.f32 %v2146_v0, %v7125_v36  ;;  %v2235_v43 = vpop.f32.mrf.mxu1  ;;  %v3893_v57 = vmul.f32 %v3765_v7, %v2869_v61 }
 0x32d   : > { %v4122_v31 = vpack.c.bf16 %v4027_v58, %v4026_v8  ;;  %v3386_v56 = vadd.f32 %v3258_v5, %v7646_v6  ;;  %v7670_v12 = vadd.f32 %v2410_v16, %v2322_v29  ;;  %v2873_v61 = vmul.f32 0.5, %v7623_v42 }
 0x32e   : > { %v3389_v3 = vadd.f32 %v3261_v23, %v7650_v19  ;;  %v7673_v17 = vadd.f32 %v2235_v43, %v2147_v62  ;;  %2461 = vmatmul.bf16.gmra.mxu0 %v7056_v25 }
 0x32f   : > { %v5155_v59 = vpop.eup %5154  ;;  %4186 = vst [vmem:[%s5824_s18 + $0x100] sm:$0xff] %v4122_v31  ;;  %v3514_v45 = vmul.f32 0.7978846, %v3386_v56  ;;  %v3006_v46 = vmul.f32 0.044715, %v7670_v12  ;;  %2550 = vmatmul.bf16.gmra.mxu1 %v7058_v41  ;;  %2639 = vmatmul.bf16.gmra.mxu2 %v7056_v25  ;;  %v4030_v25 = vsel %vm7191_vm2, %v3893_v57, %v7600_v15 }
 0x330   : > { %v3766_v53 = vadd.f32 1.0, %v5155_v59  ;;  %v3517_v47 = vmul.f32 0.7978846, %v3389_v3  ;;  %v3009_v30 = vmul.f32 0.044715, %v7673_v17  ;;  %2728 = vmatmul.bf16.gmra.mxu3 %v7058_v41  ;;  %v5157_v50 = vpop.eup %5156 }
 0x331   : > { %5158 = vtanh.f32 %v3514_v45  ;;  %v3134_v4 = vmul.f32 %v3006_v46, %v7670_v12  ;;  %v3769_v8 = vadd.f32 1.0, %v5157_v50 }
 0x332   : > { %v3894_v27 = vmul.f32 %v3766_v53, %v2870_v13  ;;  %5160 = vtanh.f32 %v3517_v47  ;;  %v3137_v63 = vmul.f32 %v3009_v30, %v7673_v17  ;;  %v2324_v7 = vpop.f32.mrf.mxu2 }
 0x333   : > { %v3262_v5 = vmul.f32 %v3134_v4, %v7670_v12  ;;  %v2325_v29 = vadd.f32 %v2324_v7, %v7135_v1  ;;  %v2413_v16 = vpop.f32.mrf.mxu3  ;;  %v2148_v41 = vpop.f32.mrf.mxu0  ;;  %v3897_v13 = vmul.f32 %v3769_v8, %v2873_v61 }
 0x334   : > { %v4031_v0 = vsel %vm7201_vm3, %v3894_v27, %v7620_v39  ;;  %v3265_v58 = vmul.f32 %v3137_v63, %v7673_v17  ;;  %v2149_v23 = vadd.f32 %v2148_v41, %v7125_v36  ;;  %v2237_v62 = vpop.f32.mrf.mxu1  ;;  %v2874_v39 = vmul.f32 0.5, %v7646_v6 }
 0x335   : > { %v4124_v43 = vpack.c.bf16 %v4031_v0, %v4030_v25  ;;  %v3390_v15 = vadd.f32 %v3262_v5, %v7670_v12  ;;  %v7696_v31 = vadd.f32 %v2413_v16, %v2325_v29  ;;  %v4034_v41 = vsel %vm7191_vm2, %v3897_v13, %v7623_v42 }
 0x336   : > { %v3393_v56 = vadd.f32 %v3265_v58, %v7673_v17  ;;  %v7700_v3 = vadd.f32 %v2237_v62, %v2149_v23 }
 0x337   : > { %v5159_v59 = vpop.eup %5158  ;;  %4188 = vst [vmem:[%s5824_s18 + $0x110] sm:$0xff] %v4124_v43  ;;  %v3518_v57 = vmul.f32 0.7978846, %v3390_v15  ;;  %v3010_v45 = vmul.f32 0.044715, %v7696_v31  ;;  %v2877_v43 = vmul.f32 0.5, %v7650_v19 }
 0x338   : > { %v5161_v46 = vpop.eup %5160  ;;  %v3770_v53 = vadd.f32 1.0, %v5159_v59  ;;  %v3521_v47 = vmul.f32 0.7978846, %v3393_v56  ;;  %v3013_v30 = vmul.f32 0.044715, %v7700_v3 }
 0x339   : > { %5162 = vtanh.f32 %v3518_v57  ;;  %v3138_v50 = vmul.f32 %v3010_v45, %v7696_v31  ;;  %v3773_v7 = vadd.f32 1.0, %v5161_v46  ;;  %v2878_v45 = vmul.f32 0.5, %v7670_v12 }
 0x33a   : > { %v3898_v4 = vmul.f32 %v3770_v53, %v2874_v39  ;;  %v3141_v27 = vmul.f32 %v3013_v30, %v7700_v3  ;;  %v2326_v63 = vpop.f32.mrf.mxu2  ;;  %5164 = vtanh.f32 %v3521_v47 }
 0x33b   : > { %v3266_v25 = vmul.f32 %v3138_v50, %v7696_v31  ;;  %v2327_v5 = vadd.f32 %v2326_v63, %v7135_v1  ;;  %v2415_v29 = vpop.f32.mrf.mxu3  ;;  %v2151_v16 = vpop.f32.mrf.mxu0 }
 0x33c   : > { %v4035_v0 = vsel %vm7201_vm3, %v3898_v4, %v7646_v6  ;;  %v3269_v8 = vmul.f32 %v3141_v27, %v7700_v3  ;;  %v2152_v58 = vadd.f32 %v2151_v16, %v7125_v36  ;;  %v2240_v23 = vpop.f32.mrf.mxu1  ;;  %v3901_v6 = vmul.f32 %v3773_v7, %v2877_v43 }
 0x33d   : > { %v4126_v62 = vpack.c.bf16 %v4035_v0, %v4034_v41  ;;  %v3394_v15 = vadd.f32 %v3266_v25, %v7696_v31  ;;  %v7720_v61 = vadd.f32 %v2415_v29, %v2327_v5 }
 0x33e   : > { %v3397_v56 = vadd.f32 %v3269_v8, %v7700_v3  ;;  %v7723_v59 = vadd.f32 %v2240_v23, %v2152_v58  ;;  %2466 = vmatmul.bf16.gmra.mxu0 %v7072_v24  ;;  %v2881_v23 = vmul.f32 0.5, %v7673_v17 }
 0x33f   : > { %v5163_v42 = vpop.eup %5162  ;;  %4190 = vst [vmem:[%s5824_s18 + $0x120] sm:$0xff] %v4126_v62  ;;  %v3522_v39 = vmul.f32 0.7978846, %v3394_v15  ;;  %v3014_v57 = vmul.f32 0.044715, %v7720_v61  ;;  %2555 = vmatmul.bf16.gmra.mxu1 %v7074_v20  ;;  %2644 = vmatmul.bf16.gmra.mxu2 %v7072_v24  ;;  %v4038_v24 = vsel %vm7191_vm2, %v3901_v6, %v7650_v19 }
 0x340   : > { %v3774_v46 = vadd.f32 1.0, %v5163_v42  ;;  %v3525_v13 = vmul.f32 0.7978846, %v3397_v56  ;;  %v3017_v53 = vmul.f32 0.044715, %v7723_v59  ;;  %2733 = vmatmul.bf16.gmra.mxu3 %v7074_v20  ;;  %v5165_v47 = vpop.eup %5164 }
 0x341   : > { %5166 = vtanh.f32 %v3522_v39  ;;  %v3142_v30 = vmul.f32 %v3014_v57, %v7720_v61  ;;  %v3777_v29 = vadd.f32 1.0, %v5165_v47 }
 0x342   : > { %v3902_v50 = vmul.f32 %v3774_v46, %v2878_v45  ;;  %5168 = vtanh.f32 %v3525_v13  ;;  %v3145_v4 = vmul.f32 %v3017_v53, %v7723_v59  ;;  %v2329_v27 = vpop.f32.mrf.mxu2 }
 0x343   : > { %v3270_v63 = vmul.f32 %v3142_v30, %v7720_v61  ;;  %v2330_v7 = vadd.f32 %v2329_v27, %v7135_v1  ;;  %v2418_v25 = vpop.f32.mrf.mxu3  ;;  %v2153_v20 = vpop.f32.mrf.mxu0  ;;  %v3905_v39 = vmul.f32 %v3777_v29, %v2881_v23 }
 0x344   : > { %v4039_v5 = vsel %vm7201_vm3, %v3902_v50, %v7670_v12  ;;  %v3273_v16 = vmul.f32 %v3145_v4, %v7723_v59  ;;  %v2154_v41 = vadd.f32 %v2153_v20, %v7125_v36  ;;  %v2242_v0 = vpop.f32.mrf.mxu1  ;;  %v2882_v12 = vmul.f32 0.5, %v7696_v31 }
 0x345   : > { %v4128_v8 = vpack.c.bf16 %v4039_v5, %v4038_v24  ;;  %v3398_v19 = vadd.f32 %v3270_v63, %v7720_v61  ;;  %v7746_v58 = vadd.f32 %v2418_v25, %v2330_v7  ;;  %v4042_v7 = vsel %vm7191_vm2, %v3905_v39, %v7673_v17 }
 0x346   : > { %v3401_v62 = vadd.f32 %v3273_v16, %v7723_v59  ;;  %v7750_v43 = vadd.f32 %v2242_v0, %v2154_v41  ;;  %v2885_v41 = vmul.f32 0.5, %v7700_v3 }
 0x347   : > { %v5167_v15 = vpop.eup %5166  ;;  %4192 = vst [vmem:[%s5824_s18 + $0x130] sm:$0xff] %v4128_v8  ;;  %v3526_v56 = vmul.f32 0.7978846, %v3398_v19  ;;  %v3018_v42 = vmul.f32 0.044715, %v7746_v58 }
 0x348   : > { %v5169_v6 = vpop.eup %5168  ;;  %v3778_v57 = vadd.f32 1.0, %v5167_v15  ;;  %v3529_v45 = vmul.f32 0.7978846, %v3401_v62  ;;  %v3021_v46 = vmul.f32 0.044715, %v7750_v43 }
 0x349   : > { %5170 = vtanh.f32 %v3526_v56  ;;  %v3146_v13 = vmul.f32 %v3018_v42, %v7746_v58  ;;  %v3781_v50 = vadd.f32 1.0, %v5169_v6 }
 0x34a   : > { %v3906_v53 = vmul.f32 %v3778_v57, %v2882_v12  ;;  %v3149_v47 = vmul.f32 %v3021_v46, %v7750_v43  ;;  %v2331_v30 = vpop.f32.mrf.mxu2  ;;  %5172 = vtanh.f32 %v3529_v45  ;;  %v2886_v12 = vmul.f32 0.5, %v7720_v61 }
 0x34b   : > { %v3274_v4 = vmul.f32 %v3146_v13, %v7746_v58  ;;  %v2332_v27 = vadd.f32 %v2331_v30, %v7135_v1  ;;  %v2420_v24 = vpop.f32.mrf.mxu3  ;;  %v2156_v63 = vpop.f32.mrf.mxu0 }
 0x34c   : > { %v4043_v25 = vsel %vm7201_vm3, %v3906_v53, %v7696_v31  ;;  %v3277_v20 = vmul.f32 %v3149_v47, %v7750_v43  ;;  %v2157_v5 = vadd.f32 %v2156_v63, %v7125_v36  ;;  %v2245_v29 = vpop.f32.mrf.mxu1  ;;  %v3909_v31 = vmul.f32 %v3781_v50, %v2885_v41 }
 0x34d   : > { %v4130_v16 = vpack.c.bf16 %v4043_v25, %v4042_v7  ;;  %v3402_v0 = vadd.f32 %v3274_v4, %v7746_v58  ;;  %v7770_v8 = vadd.f32 %v2420_v24, %v2332_v27 }
 0x34e   : > { %v3405_v19 = vadd.f32 %v3277_v20, %v7750_v43  ;;  %v7773_v23 = vadd.f32 %v2245_v29, %v2157_v5  ;;  %2471 = vmatmul.bf16.gmra.mxu0 %v7080_v37  ;;  %v2889_v20 = vmul.f32 0.5, %v7723_v59 }
 0x34f   : > { %v5171_v17 = vpop.eup %5170  ;;  %4194 = vst [vmem:[%s5824_s18 + $0x140] sm:$0xff] %v4130_v16  ;;  %v3530_v62 = vmul.f32 0.7978846, %v3402_v0  ;;  %v3022_v15 = vmul.f32 0.044715, %v7770_v8  ;;  %2560 = vmatmul.bf16.gmra.mxu1 %v7082_v52  ;;  %2649 = vmatmul.bf16.gmra.mxu2 %v7080_v37  ;;  %v4046_v37 = vsel %vm7191_vm2, %v3909_v31, %v7700_v3 }
 0x350   : > { %v3782_v56 = vadd.f32 1.0, %v5171_v17  ;;  %v3533_v42 = vmul.f32 0.7978846, %v3405_v19  ;;  %v3025_v6 = vmul.f32 0.044715, %v7773_v23  ;;  %2738 = vmatmul.bf16.gmra.mxu3 %v7082_v52  ;;  %v5173_v39 = vpop.eup %5172 }
 0x351   : > { %5174 = vtanh.f32 %v3530_v62  ;;  %v3150_v57 = vmul.f32 %v3022_v15, %v7770_v8  ;;  %v3785_v4 = vadd.f32 1.0, %v5173_v39 }
 0x352   : > { %v3910_v45 = vmul.f32 %v3782_v56, %v2886_v12  ;;  %5176 = vtanh.f32 %v3533_v42  ;;  %v3153_v46 = vmul.f32 %v3025_v6, %v7773_v23  ;;  %v2334_v13 = vpop.f32.mrf.mxu2 }
 0x353   : > { %v3278_v53 = vmul.f32 %v3150_v57, %v7770_v8  ;;  %v2335_v47 = vadd.f32 %v2334_v13, %v7135_v1  ;;  %v2423_v30 = vpop.f32.mrf.mxu3  ;;  %v2158_v52 = vpop.f32.mrf.mxu0  ;;  %v3913_v17 = vmul.f32 %v3785_v4, %v2889_v20  ;;  %v2893_v4 = vmul.f32 0.5, %v7750_v43 }
 0x354   : > { %v4047_v50 = vsel %vm7201_vm3, %v3910_v45, %v7720_v61  ;;  %v3281_v27 = vmul.f32 %v3153_v46, %v7773_v23  ;;  %v2159_v24 = vadd.f32 %v2158_v52, %v7125_v36  ;;  %v2247_v63 = vpop.f32.mrf.mxu1  ;;  %v2890_v61 = vmul.f32 0.5, %v7746_v58 }
 0x355   : > { %v4132_v7 = vpack.c.bf16 %v4047_v50, %v4046_v37  ;;  %v3406_v3 = vadd.f32 %v3278_v53, %v7770_v8  ;;  %v7796_v25 = vadd.f32 %v2423_v30, %v2335_v47  ;;  %v4050_v37 = vsel %vm7191_vm2, %v3913_v17, %v7723_v59 }
 0x356   : > { %v3409_v5 = vadd.f32 %v3281_v27, %v7773_v23  ;;  %v7800_v29 = vadd.f32 %v2247_v63, %v2159_v24 }
 0x357   : > { %v5175_v16 = vpop.eup %5174  ;;  %4196 = vst [vmem:[%s5824_s18 + $0x150] sm:$0xff] %v4132_v7  ;;  %v3534_v41 = vmul.f32 0.7978846, %v3406_v3  ;;  %v3026_v0 = vmul.f32 0.044715, %v7796_v25 }
 0x358   : > { %v5177_v19 = vpop.eup %5176  ;;  %v3786_v31 = vadd.f32 1.0, %v5175_v16  ;;  %v3537_v62 = vmul.f32 0.7978846, %v3409_v5  ;;  %v3029_v15 = vmul.f32 0.044715, %v7800_v29  ;;  %v2894_v5 = vmul.f32 0.5, %v7770_v8 }
 0x359   : > { %5178 = vtanh.f32 %v3534_v41  ;;  %v3154_v12 = vmul.f32 %v3026_v0, %v7796_v25  ;;  %v3789_v39 = vadd.f32 1.0, %v5177_v19 }
 0x35a   : > { %v3914_v56 = vmul.f32 %v3786_v31, %v2890_v61  ;;  %v3157_v42 = vmul.f32 %v3029_v15, %v7800_v29  ;;  %v2336_v6 = vpop.f32.mrf.mxu2  ;;  %5180 = vtanh.f32 %v3537_v62 }
 0x35b   : > { %v3282_v57 = vmul.f32 %v3154_v12, %v7796_v25  ;;  %v2337_v45 = vadd.f32 %v2336_v6, %v7135_v1  ;;  %v2425_v46 = vpop.f32.mrf.mxu3  ;;  %v2161_v13 = vpop.f32.mrf.mxu0 }
 0x35c   : > { %v4051_v53 = vsel %vm7201_vm3, %v3914_v56, %v7746_v58  ;;  %v3285_v47 = vmul.f32 %v3157_v42, %v7800_v29  ;;  %v2162_v30 = vadd.f32 %v2161_v13, %v7125_v36  ;;  %v2250_v52 = vpop.f32.mrf.mxu1  ;;  %v3917_v58 = vmul.f32 %v3789_v39, %v2893_v4 }
 0x35d   : > { %v4134_v50 = vpack.c.bf16 %v4051_v53, %v4050_v37  ;;  %v3410_v27 = vadd.f32 %v3282_v57, %v7796_v25  ;;  %v7820_v24 = vadd.f32 %v2425_v46, %v2337_v45  ;;  %v2897_v37 = vmul.f32 0.5, %v7773_v23 }
 0x35e   : > { %v3413_v63 = vadd.f32 %v3285_v47, %v7800_v29  ;;  %v7823_v7 = vadd.f32 %v2250_v52, %v2162_v30  ;;  %2476 = vmatmul.bf16.gmra.mxu0 %v7096_v26 }
 0x35f   : > { %v5179_v59 = vpop.eup %5178  ;;  %4198 = vst [vmem:[%s5824_s18 + $0x160] sm:$0xff] %v4134_v50  ;;  %v3538_v3 = vmul.f32 0.7978846, %v3410_v27  ;;  %v3030_v20 = vmul.f32 0.044715, %v7820_v24  ;;  %2565 = vmatmul.bf16.gmra.mxu1 %v7098_v9  ;;  %2654 = vmatmul.bf16.gmra.mxu2 %v7096_v26  ;;  %v4054_v26 = vsel %vm7191_vm2, %v3917_v58, %v7750_v43 }
 0x360   : > { %v3790_v16 = vadd.f32 1.0, %v5179_v59  ;;  %v3541_v61 = vmul.f32 0.7978846, %v3413_v63  ;;  %v3033_v41 = vmul.f32 0.044715, %v7823_v7  ;;  %2743 = vmatmul.bf16.gmra.mxu3 %v7098_v9  ;;  %v5181_v0 = vpop.eup %5180 }
 0x361   : > { %5182 = vtanh.f32 %v3538_v3  ;;  %v3158_v19 = vmul.f32 %v3030_v20, %v7820_v24  ;;  %v3793_v6 = vadd.f32 1.0, %v5181_v0 }
 0x362   : > { %v3918_v17 = vmul.f32 %v3790_v16, %v2894_v5  ;;  %5184 = vtanh.f32 %v3541_v61  ;;  %v3161_v31 = vmul.f32 %v3033_v41, %v7823_v7  ;;  %v2339_v62 = vpop.f32.mrf.mxu2 }
 0x363   : > { %v3286_v15 = vmul.f32 %v3158_v19, %v7820_v24  ;;  %v2340_v12 = vadd.f32 %v2339_v62, %v7135_v1  ;;  %v2428_v56 = vpop.f32.mrf.mxu3  ;;  %v2163_v9 = vpop.f32.mrf.mxu0  ;;  %v3921_v27 = vmul.f32 %v3793_v6, %v2897_v37 }
 0x364   : > { %v4055_v42 = vsel %vm7201_vm3, %v3918_v17, %v7770_v8  ;;  %v3289_v39 = vmul.f32 %v3161_v31, %v7823_v7  ;;  %v2164_v57 = vadd.f32 %v2163_v9, %v7125_v36  ;;  %v2252_v45 = vpop.f32.mrf.mxu1  ;;  %v2898_v8 = vmul.f32 0.5, %v7796_v25 }
 0x365   : > { %v4136_v46 = vpack.c.bf16 %v4055_v42, %v4054_v26  ;;  %v3414_v43 = vadd.f32 %v3286_v15, %v7820_v24  ;;  %v7846_v13 = vadd.f32 %v2428_v56, %v2340_v12  ;;  %v4058_v31 = vsel %vm7191_vm2, %v3921_v27, %v7773_v23 }
 0x366   : > { %v3417_v53 = vadd.f32 %v3289_v39, %v7823_v7  ;;  %v7850_v47 = vadd.f32 %v2252_v45, %v2164_v57  ;;  %v2901_v9 = vmul.f32 0.5, %v7800_v29 }
 0x367   : > { %v5183_v30 = vpop.eup %5182  ;;  %4200 = vst [vmem:[%s5824_s18 + $0x170] sm:$0xff] %v4136_v46  ;;  %v3542_v52 = vmul.f32 0.7978846, %v3414_v43  ;;  %v3034_v50 = vmul.f32 0.044715, %v7846_v13  ;;  %v2902_v43 = vmul.f32 0.5, %v7820_v24 }
 0x368   : > { %v5185_v4 = vpop.eup %5184  ;;  %v3794_v63 = vadd.f32 1.0, %v5183_v30  ;;  %v3545_v59 = vmul.f32 0.7978846, %v3417_v53  ;;  %v3037_v58 = vmul.f32 0.044715, %v7850_v47 }
 0x369   : > { %5186 = vtanh.f32 %v3542_v52  ;;  %v3162_v3 = vmul.f32 %v3034_v50, %v7846_v13  ;;  %v3797_v61 = vadd.f32 1.0, %v5185_v4 }
 0x36a   : > { %v3922_v20 = vmul.f32 %v3794_v63, %v2898_v8  ;;  %v3165_v5 = vmul.f32 %v3037_v58, %v7850_v47  ;;  %v2341_v16 = vpop.f32.mrf.mxu2  ;;  %5188 = vtanh.f32 %v3545_v59 }
 0x36b   : > { %v3290_v41 = vmul.f32 %v3162_v3, %v7846_v13  ;;  %v2342_v0 = vadd.f32 %v2341_v16, %v7135_v1  ;;  %v2430_v19 = vpop.f32.mrf.mxu3  ;;  %v2166_v17 = vpop.f32.mrf.mxu0 }
 0x36c   : > { %v4059_v62 = vsel %vm7201_vm3, %v3922_v20, %v7796_v25  ;;  %v3293_v26 = vmul.f32 %v3165_v5, %v7850_v47  ;;  %v2167_v15 = vadd.f32 %v2166_v17, %v7125_v36  ;;  %v2255_v12 = vpop.f32.mrf.mxu1  ;;  %v3925_v25 = vmul.f32 %v3797_v61, %v2901_v9 }
 0x36d   : > { %v4138_v56 = vpack.c.bf16 %v4059_v62, %v4058_v31  ;;  %v3418_v42 = vadd.f32 %v3290_v41, %v7846_v13  ;;  %v7870_v6 = vadd.f32 %v2430_v19, %v2342_v0  ;;  %v2905_v19 = vmul.f32 0.5, %v7823_v7 }
 0x36e   : > { %v3421_v39 = vadd.f32 %v3293_v26, %v7850_v47  ;;  %v7873_v57 = vadd.f32 %v2255_v12, %v2167_v15  ;;  %2481 = vmatmul.bf16.gmra.mxu0 %v7104_v44 }
 0x36f   : > { %v5187_v23 = vpop.eup %5186  ;;  %4202 = vst [vmem:[%s5824_s18 + $0x180] sm:$0xff] %v4138_v56  ;;  %v3546_v45 = vmul.f32 0.7978846, %v3418_v42  ;;  %v3038_v46 = vmul.f32 0.044715, %v7870_v6  ;;  %2570 = vmatmul.bf16.gmra.mxu1 %v7106_v55  ;;  %2659 = vmatmul.bf16.gmra.mxu2 %v7104_v44  ;;  %v4062_v44 = vsel %vm7191_vm2, %v3925_v25, %v7800_v29 }
 0x370   : > { %v3798_v37 = vadd.f32 1.0, %v5187_v23  ;;  %v3549_v53 = vmul.f32 0.7978846, %v3421_v39  ;;  %v3041_v30 = vmul.f32 0.044715, %v7873_v57  ;;  %2748 = vmatmul.bf16.gmra.mxu3 %v7106_v55  ;;  %v5189_v8 = vpop.eup %5188 }
 0x371   : > { %5190 = vtanh.f32 %v3546_v45  ;;  %v3166_v52 = vmul.f32 %v3038_v46, %v7870_v6  ;;  %v3801_v20 = vadd.f32 1.0, %v5189_v8 }
 0x372   : > { %v3926_v50 = vmul.f32 %v3798_v37, %v2902_v43  ;;  %5192 = vtanh.f32 %v3549_v53  ;;  %v3169_v4 = vmul.f32 %v3041_v30, %v7873_v57  ;;  %v2344_v27 = vpop.f32.mrf.mxu2 }
 0x373   : > { %v3294_v63 = vmul.f32 %v3166_v52, %v7870_v6  ;;  %v2345_v59 = vadd.f32 %v2344_v27, %v7135_v1  ;;  %v2433_v58 = vpop.f32.mrf.mxu3  ;;  %v2168_v55 = vpop.f32.mrf.mxu0  ;;  %v3929_v56 = vmul.f32 %v3801_v20, %v2905_v19 }
 0x374   : > { %v4063_v3 = vsel %vm7201_vm3, %v3926_v50, %v7820_v24  ;;  %v3297_v5 = vmul.f32 %v3169_v4, %v7873_v57  ;;  %v2169_v16 = vadd.f32 %v2168_v55, %v7125_v36  ;;  %v2257_v61 = vpop.f32.mrf.mxu1  ;;  %v2906_v24 = vmul.f32 0.5, %v7846_v13 }
 0x375   : > { %v4140_v41 = vpack.c.bf16 %v4063_v3, %v4062_v44  ;;  %v3422_v29 = vadd.f32 %v3294_v63, %v7870_v6  ;;  %v7896_v0 = vadd.f32 %v2433_v58, %v2345_v59  ;;  %v4066_v52 = vsel %vm7191_vm2, %v3929_v56, %v7823_v7 }
 0x376   : > { %v3425_v17 = vadd.f32 %v3297_v5, %v7873_v57  ;;  %v7900_v31 = vadd.f32 %v2257_v61, %v2169_v16  ;;  %v2909_v59 = vmul.f32 0.5, %v7850_v47  ;;  %v2910_v61 = vmul.f32 0.5, %v7870_v6 }
 0x377   : > { %v5191_v62 = vpop.eup %5190  ;;  %4204 = vst [vmem:[%s5824_s18 + $0x190] sm:$0xff] %v4140_v41  ;;  %v3550_v26 = vmul.f32 0.7978846, %v3422_v29  ;;  %v3042_v15 = vmul.f32 0.044715, %v7896_v0 }
 0x378   : > { %v5193_v12 = vpop.eup %5192  ;;  %v3802_v9 = vadd.f32 1.0, %v5191_v62  ;;  %v3553_v42 = vmul.f32 0.7978846, %v3425_v17  ;;  %v3045_v39 = vmul.f32 0.044715, %v7900_v31 }
 0x379   : > { %5194 = vtanh.f32 %v3550_v26  ;;  %v3170_v23 = vmul.f32 %v3042_v15, %v7896_v0  ;;  %v3805_v43 = vadd.f32 1.0, %v5193_v12 }
 0x37a   : > { %v3930_v25 = vmul.f32 %v3802_v9, %v2906_v24  ;;  %v3173_v45 = vmul.f32 %v3045_v39, %v7900_v31  ;;  %v2346_v46 = vpop.f32.mrf.mxu2  ;;  %5196 = vtanh.f32 %v3553_v42 }
 0x37b   : > { %v3298_v37 = vmul.f32 %v3170_v23, %v7896_v0  ;;  %v2347_v53 = vadd.f32 %v2346_v46, %v7135_v1  ;;  %v2435_v30 = vpop.f32.mrf.mxu3  ;;  %v2171_v8 = vpop.f32.mrf.mxu0 }
 0x37c   : > { %v4067_v50 = vsel %vm7201_vm3, %v3930_v25, %v7846_v13  ;;  %v3301_v4 = vmul.f32 %v3173_v45, %v7900_v31  ;;  %v2172_v27 = vadd.f32 %v2171_v8, %v7125_v36  ;;  %v2260_v44 = vpop.f32.mrf.mxu1  ;;  %v3933_v13 = vmul.f32 %v3805_v43, %v2909_v59  ;;  %v5340_v8 = vld [vmem:[%s5815_s19] sm:$0xf] }
 0x37d   : > { %v4142_v63 = vpack.c.bf16 %v4067_v50, %v4066_v52  ;;  %v3426_v58 = vadd.f32 %v3298_v37, %v7896_v0  ;;  %v7920_v55 = vadd.f32 %v2435_v30, %v2347_v53  ;;  %v2913_v37 = vmul.f32 0.5, %v7873_v57 }
 0x37e   : > { %v3429_v3 = vadd.f32 %v3301_v4, %v7900_v31  ;;  %v7923_v20 = vadd.f32 %v2260_v44, %v2172_v27  ;;  %2486 = vmatmul.bf16.gmra.mxu0 %v7112_v33  ;;  %v7953_v52 = vperm.slane %v5340_v8, 2  ;;  %v2914_v50 = vmul.f32 0.5, %v7896_v0 }
 0x37f   : > { %v5195_v7 = vpop.eup %5194  ;;  %4206 = vst [vmem:[%s5824_s18 + $0x1a0] sm:$0xff] %v4142_v63  ;;  %v3554_v5 = vmul.f32 0.7978846, %v3426_v58  ;;  %v3046_v16 = vmul.f32 0.044715, %v7920_v55  ;;  %2575 = vmatmul.bf16.gmra.mxu1 %v7114_v28  ;;  %2664 = vmatmul.bf16.gmra.mxu2 %v7112_v33  ;;  %v4070_v33 = vsel %vm7191_vm2, %v3933_v13, %v7850_v47 }
 0x380   : > { %v3806_v41 = vadd.f32 1.0, %v5195_v7  ;;  %v3557_v29 = vmul.f32 0.7978846, %v3429_v3  ;;  %v3049_v19 = vmul.f32 0.044715, %v7923_v20  ;;  %2753 = vmatmul.bf16.gmra.mxu3 %v7114_v28  ;;  %v5197_v17 = vpop.eup %5196 }
 0x381   : > { %5198 = vtanh.f32 %v3554_v5  ;;  %v3174_v62 = vmul.f32 %v3046_v16, %v7920_v55  ;;  %v3809_v39 = vadd.f32 1.0, %v5197_v17 }
 0x382   : > { %v3934_v24 = vmul.f32 %v3806_v41, %v2910_v61  ;;  %5200 = vtanh.f32 %v3557_v29  ;;  %v3177_v26 = vmul.f32 %v3049_v19, %v7923_v20  ;;  %v2349_v15 = vpop.f32.mrf.mxu2 }
 0x383   : > { %v3302_v12 = vmul.f32 %v3174_v62, %v7920_v55  ;;  %v2350_v56 = vadd.f32 %v2349_v15, %v7135_v1  ;;  %v2438_v9 = vpop.f32.mrf.mxu3  ;;  %v2173_v28 = vpop.f32.mrf.mxu0  ;;  %v3937_v44 = vmul.f32 %v3809_v39, %v2913_v37 }
 0x384   : > { %v4071_v42 = vsel %vm7201_vm3, %v3934_v24, %v7870_v6  ;;  %v3305_v23 = vmul.f32 %v3177_v26, %v7923_v20  ;;  %v2174_v25 = vadd.f32 %v2173_v28, %v7125_v36  ;;  %v2262_v45 = vpop.f32.mrf.mxu1 }
 0x385   : > { %v4144_v46 = vpack.c.bf16 %v4071_v42, %v4070_v33  ;;  %v3430_v47 = vadd.f32 %v3302_v12, %v7920_v55  ;;  %v7946_v43 = vadd.f32 %v2438_v9, %v2350_v56  ;;  %v4074_v17 = vsel %vm7191_vm2, %v3937_v44, %v7873_v57 }
 0x386   : > { %v3433_v53 = vadd.f32 %v3305_v23, %v7923_v20  ;;  %v7950_v30 = vadd.f32 %v2262_v45, %v2174_v25  ;;  %v2917_v12 = vmul.f32 0.5, %v7900_v31  ;;  %v7983_v23 = vperm.slane %v5340_v8, 3 }
 0x387   : > { %v5199_v6 = vpop.eup %5198  ;;  %4208 = vst [vmem:[%s5824_s18 + $0x1b0] sm:$0xff] %v4144_v46  ;;  %v3558_v36 = vmul.f32 0.7978846, %v3430_v47  ;;  %v3050_v4 = vmul.f32 0.044715, %v7946_v43  ;;  %v2918_v25 = vmul.f32 0.5, %v7920_v55 }
 0x388   : > { %v5201_v27 = vpop.eup %5200  ;;  %v3810_v63 = vadd.f32 1.0, %v5199_v6  ;;  %v3561_v59 = vmul.f32 0.7978846, %v3433_v53  ;;  %v3053_v58 = vmul.f32 0.044715, %v7950_v30 }
 0x389   : > { %5202 = vtanh.f32 %v3558_v36  ;;  %v3178_v3 = vmul.f32 %v3050_v4, %v7946_v43  ;;  %v3813_v16 = vadd.f32 1.0, %v5201_v27 }
 0x38a   : > { %v3938_v7 = vmul.f32 %v3810_v63, %v2914_v50  ;;  %v3181_v13 = vmul.f32 %v3053_v58, %v7950_v30  ;;  %v2351_v5 = vpop.f32.mrf.mxu2  ;;  %5204 = vtanh.f32 %v3561_v59 }
 0x38b   : > { %v3306_v61 = vmul.f32 %v3178_v3, %v7946_v43  ;;  %v2352_v41 = vadd.f32 %v2351_v5, %v7135_v1  ;;  %v2440_v29 = vpop.f32.mrf.mxu3  ;;  %v2452_v19 = vpop.f32.mrf.mxu0  ;;  %v2921_v5 = vmul.f32 0.5, %v7923_v20 }
 0x38c   : > { %v4075_v62 = vsel %vm7201_vm3, %v3938_v7, %v7896_v0  ;;  %v3309_v24 = vmul.f32 %v3181_v13, %v7950_v30  ;;  %v2453_v26 = vadd.f32 %v2452_v19, %v7953_v52  ;;  %v2541_v15 = vpop.f32.mrf.mxu1  ;;  %v3941_v0 = vmul.f32 %v3813_v16, %v2917_v12 }
 0x38d   : > { %v4146_v33 = vpack.c.bf16 %v4075_v62, %v4074_v17  ;;  %v3434_v1 = vadd.f32 %v3306_v61, %v7946_v43  ;;  %v7973_v56 = vadd.f32 %v2440_v29, %v2352_v41 }
 0x38e   : > { %v3437_v9 = vadd.f32 %v3309_v24, %v7950_v30  ;;  %v7976_v28 = vadd.f32 %v2541_v15, %v2453_v26  ;;  %2491 = vmatmul.bf16.gmra.mxu0 %v7127_v18 }
 0x38f   : > { %v5203_v57 = vpop.eup %5202  ;;  %4210 = vst [vmem:[%s5824_s18 + $0x1c0] sm:$0xff] %v4146_v33  ;;  %v3562_v42 = vmul.f32 0.7978846, %v3434_v1  ;;  %v3054_v39 = vmul.f32 0.044715, %v7973_v56  ;;  %2580 = vmatmul.bf16.gmra.mxu1 %v7129_v35  ;;  %2669 = vmatmul.bf16.gmra.mxu2 %v7127_v18  ;;  %v4078_v18 = vsel %vm7191_vm2, %v3941_v0, %v7900_v31 }
 0x390   : > { %v3814_v45 = vadd.f32 1.0, %v5203_v57  ;;  %v3565_v46 = vmul.f32 0.7978846, %v3437_v9  ;;  %v2931_v47 = vmul.f32 0.044715, %v7976_v28  ;;  %2758 = vmatmul.bf16.gmra.mxu3 %v7129_v35  ;;  %v5205_v37 = vpop.eup %5204 }
 0x391   : > { %5206 = vtanh.f32 %v3562_v42  ;;  %v3182_v53 = vmul.f32 %v3054_v39, %v7973_v56  ;;  %v3817_v63 = vadd.f32 1.0, %v5205_v37 }
 0x392   : > { %v3942_v6 = vmul.f32 %v3814_v45, %v2918_v25  ;;  %5208 = vtanh.f32 %v3565_v46  ;;  %v3059_v50 = vmul.f32 %v2931_v47, %v7976_v28  ;;  %v2630_v36 = vpop.f32.mrf.mxu2 }
 0x393   : > { %v3310_v8 = vmul.f32 %v3182_v53, %v7973_v56  ;;  %v2631_v4 = vadd.f32 %v2630_v36, %v7983_v23  ;;  %v2719_v27 = vpop.f32.mrf.mxu3  ;;  %v2454_v35 = vpop.f32.mrf.mxu0  ;;  %v3945_v62 = vmul.f32 %v3817_v63, %v2921_v5 }
 0x394   : > { %v4079_v44 = vsel %vm7201_vm3, %v3942_v6, %v7920_v55  ;;  %v3187_v59 = vmul.f32 %v3059_v50, %v7976_v28  ;;  %v2455_v58 = vadd.f32 %v2454_v35, %v7953_v52  ;;  %v2543_v3 = vpop.f32.mrf.mxu1  ;;  %v2922_v55 = vmul.f32 0.5, %v7946_v43 }
 0x395   : > { %v4148_v7 = vpack.c.bf16 %v4079_v44, %v4078_v18  ;;  %v3438_v31 = vadd.f32 %v3310_v8, %v7973_v56  ;;  %v8001_v13 = vadd.f32 %v2719_v27, %v2631_v4  ;;  %v4082_v45 = vsel %vm7191_vm2, %v3945_v62, %v7923_v20 }
 0x396   : > { %v3315_v16 = vadd.f32 %v3187_v59, %v7976_v28  ;;  %v8005_v61 = vadd.f32 %v2543_v3, %v2455_v58  ;;  %v2925_v50 = vmul.f32 0.5, %v7950_v30  ;;  %v2926_v44 = vmul.f32 0.5, %v7973_v56 }
 0x397   : > { %v5207_v41 = vpop.eup %5206  ;;  %4212 = vst [vmem:[%s5824_s18 + $0x1d0] sm:$0xff] %v4148_v7  ;;  %v3566_v29 = vmul.f32 0.7978846, %v3438_v31  ;;  %v2932_v19 = vmul.f32 0.044715, %v8001_v13 }
 0x398   : > { %v5209_v17 = vpop.eup %5208  ;;  %v3818_v24 = vadd.f32 1.0, %v5207_v41  ;;  %v3443_v26 = vmul.f32 0.7978846, %v3315_v16  ;;  %v2935_v15 = vmul.f32 0.044715, %v8005_v61  ;;  %v3956_v41 = vperm.slane %v7171_v21, 2 }
 0x399   : > { %5210 = vtanh.f32 %v3566_v29  ;;  %v3060_v33 = vmul.f32 %v2932_v19, %v8001_v13  ;;  %v3821_v57 = vadd.f32 1.0, %v5209_v17 }
 0x39a   : > { %v3946_v12 = vmul.f32 %v3818_v24, %v2922_v55  ;;  %v3063_v1 = vmul.f32 %v2935_v15, %v8005_v61  ;;  %v2632_v9 = vpop.f32.mrf.mxu2  ;;  %5212 = vtanh.f32 %v3443_v26  ;;  %v3957_v15 = vperm.slane %v7171_v21, 3 }
 0x39b   : > { %v3188_v0 = vmul.f32 %v3060_v33, %v8001_v13  ;;  %v2633_v42 = vadd.f32 %v2632_v9, %v7983_v23  ;;  %v2721_v39 = vpop.f32.mrf.mxu3  ;;  %v2457_v25 = vpop.f32.mrf.mxu0  ;;  %vm8063_vm4 = vcmp.eq.s32.totalorder %v3956_v41, 1 }
 0x39c   : > { %v4083_v46 = vsel %vm7201_vm3, %v3946_v12, %v7946_v43  ;;  %v3191_v47 = vmul.f32 %v3063_v1, %v8005_v61  ;;  %v2458_v37 = vadd.f32 %v2457_v25, %v7953_v52  ;;  %v2546_v53 = vpop.f32.mrf.mxu1  ;;  %v3949_v43 = vmul.f32 %v3821_v57, %v2925_v50 }
 0x39d   : > { %v4150_v6 = vpack.c.bf16 %v4083_v46, %v4082_v45  ;;  %v3316_v36 = vadd.f32 %v3188_v0, %v8001_v13  ;;  %v8025_v18 = vadd.f32 %v2721_v39, %v2633_v42  ;;  %v2803_v1 = vmul.f32 0.5, %v7976_v28 }
 0x39e   : > { %v3319_v8 = vadd.f32 %v3191_v47, %v8005_v61  ;;  %v8028_v4 = vadd.f32 %v2546_v53, %v2458_v37  ;;  %2496 = vmatmul.bf16.gmra.mxu0 %v7159_v48  ;;  %vm8067_vm5 = vcmp.eq.s32.totalorder %v3957_v15, 1 }
 0x39f   : > { %v5211_v20 = vpop.eup %5210  ;;  %4214 = vst [vmem:[%s5824_s18 + $0x1e0] sm:$0xff] %v4150_v6  ;;  %v3444_v27 = vmul.f32 0.7978846, %v3316_v36  ;;  %v2936_v35 = vmul.f32 0.044715, %v8025_v18  ;;  %2585 = vmatmul.bf16.gmra.mxu1 %v7163_v14  ;;  %2674 = vmatmul.bf16.gmra.mxu2 %v7159_v48  ;;  %v4086_v48 = vsel %vm7191_vm2, %v3949_v43, %v7950_v30 }
 0x3a0   : > { %v3822_v63 = vadd.f32 1.0, %v5211_v20  ;;  %v3447_v59 = vmul.f32 0.7978846, %v3319_v8  ;;  %v2939_v58 = vmul.f32 0.044715, %v8028_v4  ;;  %2763 = vmatmul.bf16.gmra.mxu3 %v7163_v14  ;;  %v5213_v3 = vpop.eup %5212 }
 0x3a1   : > { %5214 = vtanh.f32 %v3444_v27  ;;  %v3064_v7 = vmul.f32 %v2936_v35, %v8025_v18  ;;  %v3699_v62 = vadd.f32 1.0, %v5213_v3 }
 0x3a2   : > { %v3950_v31 = vmul.f32 %v3822_v63, %v2926_v44  ;;  %5216 = vtanh.f32 %v3447_v59  ;;  %v3067_v5 = vmul.f32 %v2939_v58, %v8028_v4  ;;  %v2635_v16 = vpop.f32.mrf.mxu2 }
 0x3a3   : > { %v3192_v55 = vmul.f32 %v3064_v7, %v8025_v18  ;;  %v2636_v29 = vadd.f32 %v2635_v16, %v7983_v23  ;;  %v2724_v14 = vpop.f32.mrf.mxu3  ;;  %v2459_v19 = vpop.f32.mrf.mxu0  ;;  %v3827_v25 = vmul.f32 %v3699_v62, %v2803_v1 }
 0x3a4   : > { %v4087_v17 = vsel %vm7201_vm3, %v3950_v31, %v7973_v56  ;;  %v3195_v24 = vmul.f32 %v3067_v5, %v8028_v4  ;;  %v2460_v26 = vadd.f32 %v2459_v19, %v7953_v52  ;;  %v2548_v32 = vpop.f32.mrf.mxu1  ;;  %v2804_v56 = vmul.f32 0.5, %v8001_v13 }
 0x3a5   : > { %v4152_v30 = vpack.c.bf16 %v4087_v17, %v4086_v48  ;;  %v3320_v33 = vadd.f32 %v3192_v55, %v8025_v18  ;;  %v8053_v12 = vadd.f32 %v2724_v14, %v2636_v29  ;;  %v3964_v44 = vsel %vm8063_vm4, %v3827_v25, %v7976_v28 }
 0x3a6   : > { %v3323_v9 = vadd.f32 %v3195_v24, %v8028_v4  ;;  %v8057_v57 = vadd.f32 %v2548_v32, %v2460_v26  ;;  %v2807_v31 = vmul.f32 0.5, %v8005_v61  ;;  %v2808_v14 = vmul.f32 0.5, %v8025_v18 }
 0x3a7   : > { %v5215_v51 = vpop.eup %5214  ;;  %4216 = vst [vmem:[%s5824_s18 + $0x1f0] sm:$0xff] %v4152_v30  ;;  %v3448_v0 = vmul.f32 0.7978846, %v3320_v33  ;;  %v2940_v42 = vmul.f32 0.044715, %v8053_v12 }
 0x3a8   : > { %v5217_v39 = vpop.eup %5216  ;;  %v3700_v21 = vadd.f32 1.0, %v5215_v51  ;;  %v3451_v45 = vmul.f32 0.7978846, %v3323_v9  ;;  %v2943_v46 = vmul.f32 0.044715, %v8057_v57 }
 0x3a9   : > { %5218 = vtanh.f32 %v3448_v0  ;;  %v3068_v53 = vmul.f32 %v2940_v42, %v8053_v12  ;;  %v3703_v8 = vadd.f32 1.0, %v5217_v39 }
 0x3aa   : > { %v3828_v6 = vmul.f32 %v3700_v21, %v2804_v56  ;;  %v3071_v50 = vmul.f32 %v2943_v46, %v8057_v57  ;;  %v2637_v36 = vpop.f32.mrf.mxu2  ;;  %5220 = vtanh.f32 %v3451_v45  ;;  %v2811_v45 = vmul.f32 0.5, %v8028_v4 }
 0x3ab   : > { %v3196_v20 = vmul.f32 %v3068_v53, %v8053_v12  ;;  %v2638_v43 = vadd.f32 %v2637_v36, %v7983_v23  ;;  %v2726_v27 = vpop.f32.mrf.mxu3  ;;  %v2462_v35 = vpop.f32.mrf.mxu0 }
 0x3ac   : > { %v3965_v63 = vsel %vm8067_vm5, %v3828_v6, %v8001_v13  ;;  %v3199_v59 = vmul.f32 %v3071_v50, %v8057_v57  ;;  %v2463_v58 = vadd.f32 %v2462_v35, %v7953_v52  ;;  %v2551_v3 = vpop.f32.mrf.mxu1  ;;  %v3831_v13 = vmul.f32 %v3703_v8, %v2807_v31 }
 0x3ad   : > { %v4091_v7 = vpack.c.bf16 %v3965_v63, %v3964_v44  ;;  %v3324_v5 = vadd.f32 %v3196_v20, %v8053_v12  ;;  %v8085_v16 = vadd.f32 %v2726_v27, %v2638_v43 }
 0x3ae   : > { %v3327_v48 = vadd.f32 %v3199_v59, %v8057_v57  ;;  %v8088_v41 = vadd.f32 %v2551_v3, %v2463_v58  ;;  %2501 = vmatmul.bf16.gmra.mxu0 %v7209_v10 }
 0x3af   : > { %v5219_v28 = vpop.eup %5218  ;;  %4155 = vst [vmem:[%s5824_s18 + $0x8] sm:$0xff] %v4091_v7  ;;  %v3452_v55 = vmul.f32 0.7978846, %v3324_v5  ;;  %v2944_v29 = vmul.f32 0.044715, %v8085_v16  ;;  %2590 = vmatmul.bf16.gmra.mxu1 %v7211_v22  ;;  %2679 = vmatmul.bf16.gmra.mxu2 %v7209_v10  ;;  %v3968_v10 = vsel %vm8063_vm4, %v3831_v13, %v8005_v61 }
 0x3b0   : > { %v3704_v19 = vadd.f32 1.0, %v5219_v28  ;;  %v3455_v17 = vmul.f32 0.7978846, %v3327_v48  ;;  %v2947_v62 = vmul.f32 0.044715, %v8088_v41  ;;  %2768 = vmatmul.bf16.gmra.mxu3 %v7211_v22  ;;  %v5221_v24 = vpop.eup %5220 }
 0x3b1   : > { %5222 = vtanh.f32 %v3452_v55  ;;  %v3072_v26 = vmul.f32 %v2944_v29, %v8085_v16  ;;  %v3707_v56 = vadd.f32 1.0, %v5221_v24 }
 0x3b2   : > { %v3832_v32 = vmul.f32 %v3704_v19, %v2808_v14  ;;  %5224 = vtanh.f32 %v3455_v17  ;;  %v3075_v30 = vmul.f32 %v2947_v62, %v8088_v41  ;;  %v2640_v15 = vpop.f32.mrf.mxu2  ;;  %v2815_v17 = vmul.f32 0.5, %v8057_v57 }
 0x3b3   : > { %v3200_v33 = vmul.f32 %v3072_v26, %v8085_v16  ;;  %v2641_v1 = vadd.f32 %v2640_v15, %v7983_v23  ;;  %v2729_v9 = vpop.f32.mrf.mxu3  ;;  %v2464_v22 = vpop.f32.mrf.mxu0  ;;  %v3835_v20 = vmul.f32 %v3707_v56, %v2811_v45 }
 0x3b4   : > { %v3969_v51 = vsel %vm8067_vm5, %v3832_v32, %v8025_v18  ;;  %v3203_v0 = vmul.f32 %v3075_v30, %v8088_v41  ;;  %v2465_v42 = vadd.f32 %v2464_v22, %v7953_v52  ;;  %v2553_v39 = vpop.f32.mrf.mxu1  ;;  %v2812_v18 = vmul.f32 0.5, %v8053_v12 }
 0x3b5   : > { %v4093_v25 = vpack.c.bf16 %v3969_v51, %v3968_v10  ;;  %v3328_v61 = vadd.f32 %v3200_v33, %v8085_v16  ;;  %v8111_v21 = vadd.f32 %v2729_v9, %v2641_v1  ;;  %v3972_v28 = vsel %vm8063_vm4, %v3835_v20, %v8028_v4 }
 0x3b6   : > { %v3331_v46 = vadd.f32 %v3203_v0, %v8088_v41  ;;  %v8115_v53 = vadd.f32 %v2553_v39, %v2465_v42  ;;  %v2816_v10 = vmul.f32 0.5, %v8085_v16  ;;  %v2819_v20 = vmul.f32 0.5, %v8088_v41 }
 0x3b7   : > { %v5223_v6 = vpop.eup %5222  ;;  %4157 = vst [vmem:[%s5824_s18 + $0x18] sm:$0xff] %v4093_v25  ;;  %v3456_v50 = vmul.f32 0.7978846, %v3328_v61  ;;  %v2948_v36 = vmul.f32 0.044715, %v8111_v21 }
 0x3b8   : > { %v5225_v8 = vpop.eup %5224  ;;  %v3708_v43 = vadd.f32 1.0, %v5223_v6  ;;  %v3459_v27 = vmul.f32 0.7978846, %v3331_v46  ;;  %v2951_v35 = vmul.f32 0.044715, %v8115_v53 }
 0x3b9   : > { %5226 = vtanh.f32 %v3456_v50  ;;  %v3076_v44 = vmul.f32 %v2948_v36, %v8111_v21  ;;  %v3711_v3 = vadd.f32 1.0, %v5225_v8 }
 0x3ba   : > { %v3836_v63 = vmul.f32 %v3708_v43, %v2812_v18  ;;  %v3079_v59 = vmul.f32 %v2951_v35, %v8115_v53  ;;  %v2642_v58 = vpop.f32.mrf.mxu2  ;;  %5228 = vtanh.f32 %v3459_v27 }
 0x3bb   : > { %v3204_v7 = vmul.f32 %v3076_v44, %v8111_v21  ;;  %v2643_v31 = vadd.f32 %v2642_v58, %v7983_v23  ;;  %v2731_v5 = vpop.f32.mrf.mxu3  ;;  %v2467_v48 = vpop.f32.mrf.mxu0 }
 0x3bc   : > { %v3973_v13 = vsel %vm8067_vm5, %v3836_v63, %v8053_v12  ;;  %v3207_v55 = vmul.f32 %v3079_v59, %v8115_v53  ;;  %v2468_v29 = vadd.f32 %v2467_v48, %v7953_v52  ;;  %v2556_v14 = vpop.f32.mrf.mxu1  ;;  %v3839_v12 = vmul.f32 %v3711_v3, %v2815_v17 }
 0x3bd   : > { %v4095_v19 = vpack.c.bf16 %v3973_v13, %v3972_v28  ;;  %v3332_v62 = vadd.f32 %v3204_v7, %v8111_v21  ;;  %v8135_v24 = vadd.f32 %v2731_v5, %v2643_v31 }
 0x3be   : > { %v3335_v26 = vadd.f32 %v3207_v55, %v8115_v53  ;;  %v8138_v32 = vadd.f32 %v2556_v14, %v2468_v29  ;;  %2506 = vmatmul.bf16.gmra.mxu0 %v7272_v40 }
 0x3bf   : > { %v5227_v4 = vpop.eup %5226  ;;  %4159 = vst [vmem:[%s5824_s18 + $0x28] sm:$0xff] %v4095_v19  ;;  %v3460_v30 = vmul.f32 0.7978846, %v3332_v62  ;;  %v2952_v15 = vmul.f32 0.044715, %v8135_v24  ;;  %2595 = vmatmul.bf16.gmra.mxu1 %v7279_v60  ;;  %2684 = vmatmul.bf16.gmra.mxu2 %v7272_v40  ;;  %v3976_v40 = vsel %vm8063_vm4, %v3839_v12, %v8057_v57 }
 0x3c0   : > { %v3712_v33 = vadd.f32 1.0, %v5227_v4  ;;  %v3463_v1 = vmul.f32 0.7978846, %v3335_v26  ;;  %v2955_v9 = vmul.f32 0.044715, %v8138_v32  ;;  %2773 = vmatmul.bf16.gmra.mxu3 %v7279_v60  ;;  %v5229_v22 = vpop.eup %5228 }
 0x3c1   : > { %5230 = vtanh.f32 %v3460_v30  ;;  %v3080_v51 = vmul.f32 %v2952_v15, %v8135_v24  ;;  %v3715_v46 = vadd.f32 1.0, %v5229_v22 }
 0x3c2   : > { %v3840_v56 = vmul.f32 %v3712_v33, %v2816_v10  ;;  %5232 = vtanh.f32 %v3463_v1  ;;  %v3083_v0 = vmul.f32 %v2955_v9, %v8138_v32  ;;  %v2645_v42 = vpop.f32.mrf.mxu2  ;;  %v2823_v10 = vmul.f32 0.5, %v8115_v53 }
 0x3c3   : > { %v3208_v39 = vmul.f32 %v3080_v51, %v8135_v24  ;;  %v2646_v25 = vadd.f32 %v2645_v42, %v7983_v23  ;;  %v2734_v61 = vpop.f32.mrf.mxu3  ;;  %v2469_v60 = vpop.f32.mrf.mxu0  ;;  %v3843_v58 = vmul.f32 %v3715_v46, %v2819_v20 }
 0x3c4   : > { %v3977_v45 = vsel %vm8067_vm5, %v3840_v56, %v8085_v16  ;;  %v3211_v6 = vmul.f32 %v3083_v0, %v8138_v32  ;;  %v2470_v18 = vadd.f32 %v2469_v60, %v7953_v52  ;;  %v2558_v50 = vpop.f32.mrf.mxu1  ;;  %v2820_v16 = vmul.f32 0.5, %v8111_v21 }
 0x3c5   : > { %v4097_v36 = vpack.c.bf16 %v3977_v45, %v3976_v40  ;;  %v3336_v57 = vadd.f32 %v3208_v39, %v8135_v24  ;;  %v8161_v8 = vadd.f32 %v2734_v61, %v2646_v25  ;;  %v3980_v62 = vsel %vm8063_vm4, %v3843_v58, %v8088_v41 }
 0x3c6   : > { %v3339_v43 = vadd.f32 %v3211_v6, %v8138_v32  ;;  %v8165_v27 = vadd.f32 %v2558_v50, %v2470_v18  ;;  %v2824_v0 = vmul.f32 0.5, %v8135_v24 }
 0x3c7   : > { %v5231_v35 = vpop.eup %5230  ;;  %4161 = vst [vmem:[%s5824_s18 + $0x38] sm:$0xff] %v4097_v36  ;;  %v3464_v44 = vmul.f32 0.7978846, %v3336_v57  ;;  %v2956_v63 = vmul.f32 0.044715, %v8161_v8 }
 0x3c8   : > { %v5233_v59 = vpop.eup %5232  ;;  %v3716_v3 = vadd.f32 1.0, %v5231_v35  ;;  %v3467_v7 = vmul.f32 0.7978846, %v3339_v43  ;;  %v2959_v31 = vmul.f32 0.044715, %v8165_v27 }
 0x3c9   : > { %5234 = vtanh.f32 %v3464_v44  ;;  %v3084_v5 = vmul.f32 %v2956_v63, %v8161_v8  ;;  %v3719_v55 = vadd.f32 1.0, %v5233_v59  ;;  %v2827_v63 = vmul.f32 0.5, %v8138_v32 }
 0x3ca   : > { %v3844_v48 = vmul.f32 %v3716_v3, %v2820_v16  ;;  %v3087_v28 = vmul.f32 %v2959_v31, %v8165_v27  ;;  %v2647_v13 = vpop.f32.mrf.mxu2  ;;  %5236 = vtanh.f32 %v3467_v7 }
 0x3cb   : > { %v3212_v29 = vmul.f32 %v3084_v5, %v8161_v8  ;;  %v2648_v14 = vadd.f32 %v2647_v13, %v7983_v23  ;;  %v2736_v19 = vpop.f32.mrf.mxu3  ;;  %v2472_v17 = vpop.f32.mrf.mxu0 }
 0x3cc   : > { %v3981_v26 = vsel %vm8067_vm5, %v3844_v48, %v8111_v21  ;;  %v3215_v4 = vmul.f32 %v3087_v28, %v8165_v27  ;;  %v2473_v12 = vadd.f32 %v2472_v17, %v7953_v52  ;;  %v2561_v30 = vpop.f32.mrf.mxu1  ;;  %v3847_v21 = vmul.f32 %v3719_v55, %v2823_v10 }
 0x3cd   : > { %v4099_v15 = vpack.c.bf16 %v3981_v26, %v3980_v62  ;;  %v3340_v33 = vadd.f32 %v3212_v29, %v8161_v8  ;;  %v8185_v1 = vadd.f32 %v2736_v19, %v2648_v14 }
 0x3ce   : > { %v3343_v9 = vadd.f32 %v3215_v4, %v8165_v27  ;;  %v8188_v22 = vadd.f32 %v2561_v30, %v2473_v12  ;;  %2511 = vmatmul.bf16.gmra.mxu0 %v7325_v49 }
 0x3cf   : > { %v5235_v41 = vpop.eup %5234  ;;  %4163 = vst [vmem:[%s5824_s18 + $0x48] sm:$0xff] %v4099_v15  ;;  %v3468_v51 = vmul.f32 0.7978846, %v3340_v33  ;;  %v2960_v56 = vmul.f32 0.044715, %v8185_v1  ;;  %2600 = vmatmul.bf16.gmra.mxu1 %v7327_v38  ;;  %2689 = vmatmul.bf16.gmra.mxu2 %v7325_v49  ;;  %v3984_v49 = vsel %vm8063_vm4, %v3847_v21, %v8115_v53 }
 0x3d0   : > { %v3720_v42 = vadd.f32 1.0, %v5235_v41  ;;  %v3471_v40 = vmul.f32 0.7978846, %v3343_v9  ;;  %v2963_v39 = vmul.f32 0.044715, %v8188_v22  ;;  %2778 = vmatmul.bf16.gmra.mxu3 %v7327_v38  ;;  %v5237_v25 = vpop.eup %5236 }
 0x3d1   : > { %5238 = vtanh.f32 %v3468_v51  ;;  %v3088_v61 = vmul.f32 %v2960_v56, %v8185_v1  ;;  %v3723_v57 = vadd.f32 1.0, %v5237_v25  ;;  %v2831_v51 = vmul.f32 0.5, %v8165_v27 }
 0x3d2   : > { %v3848_v60 = vmul.f32 %v3720_v42, %v2824_v0  ;;  %5240 = vtanh.f32 %v3471_v40  ;;  %v3091_v45 = vmul.f32 %v2963_v39, %v8188_v22  ;;  %v2650_v46 = vpop.f32.mrf.mxu2 }
 0x3d3   : > { %v3216_v6 = vmul.f32 %v3088_v61, %v8185_v1  ;;  %v2651_v18 = vadd.f32 %v2650_v46, %v7983_v23  ;;  %v2739_v50 = vpop.f32.mrf.mxu3  ;;  %v2474_v38 = vpop.f32.mrf.mxu0  ;;  %v3851_v48 = vmul.f32 %v3723_v57, %v2827_v63 }
 0x3d4   : > { %v3985_v36 = vsel %vm8067_vm5, %v3848_v60, %v8135_v24  ;;  %v3219_v20 = vmul.f32 %v3091_v45, %v8188_v22  ;;  %v2475_v43 = vadd.f32 %v2474_v38, %v7953_v52  ;;  %v2563_v35 = vpop.f32.mrf.mxu1  ;;  %v2828_v24 = vmul.f32 0.5, %v8161_v8  ;;  %v9018_v60 = vld [vmem:[#allocation64_spill] sm:$0xff] }
 0x3d5   : > { %v4101_v16 = vpack.c.bf16 %v3985_v36, %v3984_v49  ;;  %v3344_v53 = vadd.f32 %v3216_v6, %v8185_v1  ;;  %v8211_v44 = vadd.f32 %v2739_v50, %v2651_v18  ;;  %v3988_v15 = vsel %vm8063_vm4, %v3851_v48, %v8138_v32  ;;  %v9017_v32 = vld [vmem:[#allocation63_spill] sm:$0xff] }
 0x3d6   : > { %v3347_v59 = vadd.f32 %v3219_v20, %v8188_v22  ;;  %v8215_v58 = vadd.f32 %v2563_v35, %v2475_v43  ;;  %v2832_v45 = vmul.f32 0.5, %v8185_v1  ;;  %v2835_v48 = vmul.f32 0.5, %v8188_v22 }
 0x3d7   : > { %v5239_v3 = vpop.eup %5238  ;;  %4165 = vst [vmem:[%s5824_s18 + $0x58] sm:$0xff] %v4101_v16  ;;  %v3472_v7 = vmul.f32 0.7978846, %v3344_v53  ;;  %v2964_v31 = vmul.f32 0.044715, %v8211_v44 }
 0x3d8   : > { %v5241_v5 = vpop.eup %5240  ;;  %v3724_v28 = vadd.f32 1.0, %v5239_v3  ;;  %v3475_v13 = vmul.f32 0.7978846, %v3347_v59  ;;  %v2967_v55 = vmul.f32 0.044715, %v8215_v58 }
 0x3d9   : > { %5242 = vtanh.f32 %v3472_v7  ;;  %v3092_v29 = vmul.f32 %v2964_v31, %v8211_v44  ;;  %v3727_v62 = vadd.f32 1.0, %v5241_v5 }
 0x3da   : > { %v3852_v14 = vmul.f32 %v3724_v28, %v2828_v24  ;;  %v3095_v19 = vmul.f32 %v2967_v55, %v8215_v58  ;;  %v2652_v17 = vpop.f32.mrf.mxu2  ;;  %5244 = vtanh.f32 %v3475_v13 }
 0x3db   : > { %v3220_v26 = vmul.f32 %v3092_v29, %v8211_v44  ;;  %v2653_v4 = vadd.f32 %v2652_v17, %v7983_v23  ;;  %v2741_v12 = vpop.f32.mrf.mxu3  ;;  %v2477_v30 = vpop.f32.mrf.mxu0 }
 0x3dc   : > { %v3989_v10 = vsel %vm8067_vm5, %v3852_v14, %v8161_v8  ;;  %v3223_v33 = vmul.f32 %v3095_v19, %v8215_v58  ;;  %v2478_v9 = vadd.f32 %v2477_v30, %v7953_v52  ;;  %v2566_v41 = vpop.f32.mrf.mxu1  ;;  %v3855_v8 = vmul.f32 %v3727_v62, %v2831_v51 }
 0x3dd   : > { %v4103_v21 = vpack.c.bf16 %v3989_v10, %v3988_v15  ;;  %v3348_v56 = vadd.f32 %v3220_v26, %v8211_v44  ;;  %v8235_v0 = vadd.f32 %v2741_v12, %v2653_v4 }
 0x3de   : > { %v3351_v42 = vadd.f32 %v3223_v33, %v8215_v58  ;;  %v8238_v40 = vadd.f32 %v2566_v41, %v2478_v9  ;;  %2516 = vmatmul.bf16.gmra.mxu0 %v9017_v32  ;;  %v3992_v20 = vsel %vm8063_vm4, %v3855_v8, %v8165_v27 }
 0x3df   : > { %v5243_v39 = vpop.eup %5242  ;;  %4167 = vst [vmem:[%s5824_s18 + $0x68] sm:$0xff] %v4103_v21  ;;  %v3476_v25 = vmul.f32 0.7978846, %v3348_v56  ;;  %v2968_v61 = vmul.f32 0.044715, %v8235_v0  ;;  %2605 = vmatmul.bf16.gmra.mxu1 %v9018_v60  ;;  %2694 = vmatmul.bf16.gmra.mxu2 %v9017_v32 }
 0x3e0   : > { %v3728_v46 = vadd.f32 1.0, %v5243_v39  ;;  %v3479_v49 = vmul.f32 0.7978846, %v3351_v42  ;;  %v2971_v6 = vmul.f32 0.044715, %v8238_v40  ;;  %2783 = vmatmul.bf16.gmra.mxu3 %v9018_v60  ;;  %v5245_v18 = vpop.eup %5244 }
 0x3e1   : > { %5246 = vtanh.f32 %v3476_v25  ;;  %v3096_v50 = vmul.f32 %v2968_v61, %v8235_v0  ;;  %v3731_v59 = vadd.f32 1.0, %v5245_v18  ;;  %v2839_v61 = vmul.f32 0.5, %v8215_v58 }
 0x3e2   : > { %v3856_v38 = vmul.f32 %v3728_v46, %v2832_v45  ;;  %5248 = vtanh.f32 %v3479_v49  ;;  %v3099_v36 = vmul.f32 %v2971_v6, %v8238_v40  ;;  %v2655_v57 = vpop.f32.mrf.mxu2 }
 0x3e3   : > { %v3224_v43 = vmul.f32 %v3096_v50, %v8235_v0  ;;  %v2656_v35 = vadd.f32 %v2655_v57, %v7983_v23  ;;  %v2744_v16 = vpop.f32.mrf.mxu3  ;;  %v2479_v53 = vpop.f32.mrf.mxu0  ;;  %v3859_v17 = vmul.f32 %v3731_v59, %v2835_v48  ;;  %v2840_v50 = vmul.f32 0.5, %v8235_v0 }
 0x3e4   : > { %v3993_v63 = vsel %vm8067_vm5, %v3856_v38, %v8185_v1  ;;  %v3227_v3 = vmul.f32 %v3099_v36, %v8238_v40  ;;  %v2480_v24 = vadd.f32 %v2479_v53, %v7953_v52  ;;  %v2568_v7 = vpop.f32.mrf.mxu1  ;;  %v2836_v1 = vmul.f32 0.5, %v8211_v44 }
 0x3e5   : > { %v4105_v31 = vpack.c.bf16 %v3993_v63, %v3992_v20  ;;  %v3352_v27 = vadd.f32 %v3224_v43, %v8235_v0  ;;  %v8261_v5 = vadd.f32 %v2744_v16, %v2656_v35  ;;  %v3996_v56 = vsel %vm8063_vm4, %v3859_v17, %v8188_v22 }
 0x3e6   : > { %v3355_v28 = vadd.f32 %v3227_v3, %v8238_v40  ;;  %v8265_v13 = vadd.f32 %v2568_v7, %v2480_v24 }
 0x3e7   : > { %v5247_v55 = vpop.eup %5246  ;;  %4169 = vst [vmem:[%s5824_s18 + $0x78] sm:$0xff] %v4105_v31  ;;  %v3480_v29 = vmul.f32 0.7978846, %v3352_v27  ;;  %v2972_v14 = vmul.f32 0.044715, %v8261_v5 }
 0x3e8   : > { %v5249_v19 = vpop.eup %5248  ;;  %v3732_v62 = vadd.f32 1.0, %v5247_v55  ;;  %v3483_v26 = vmul.f32 0.7978846, %v3355_v28  ;;  %v2975_v4 = vmul.f32 0.044715, %v8265_v13 }
 0x3e9   : > { %5250 = vtanh.f32 %v3480_v29  ;;  %v3100_v12 = vmul.f32 %v2972_v14, %v8261_v5  ;;  %v3735_v33 = vadd.f32 1.0, %v5249_v19 }
 0x3ea   : > { %v3860_v30 = vmul.f32 %v3732_v62, %v2836_v1  ;;  %v3103_v15 = vmul.f32 %v2975_v4, %v8265_v13  ;;  %v2657_v10 = vpop.f32.mrf.mxu2  ;;  %5252 = vtanh.f32 %v3483_v26  ;;  %v2843_v1 = vmul.f32 0.5, %v8238_v40 }
 0x3eb   : > { %v3228_v9 = vmul.f32 %v3100_v12, %v8261_v5  ;;  %v2658_v41 = vadd.f32 %v2657_v10, %v7983_v23  ;;  %v2746_v21 = vpop.f32.mrf.mxu3  ;;  %v2482_v51 = vpop.f32.mrf.mxu0 }
 0x3ec   : > { %v3997_v42 = vsel %vm8067_vm5, %v3860_v30, %v8211_v44  ;;  %v3231_v32 = vmul.f32 %v3103_v15, %v8265_v13  ;;  %v2483_v39 = vadd.f32 %v2482_v51, %v7953_v52  ;;  %v2571_v8 = vpop.f32.mrf.mxu1  ;;  %v3863_v44 = vmul.f32 %v3735_v33, %v2839_v61 }
 0x3ed   : > { %v4107_v25 = vpack.c.bf16 %v3997_v42, %v3996_v56  ;;  %v3356_v60 = vadd.f32 %v3228_v9, %v8261_v5  ;;  %v8285_v45 = vadd.f32 %v2746_v21, %v2658_v41 }
 0x3ee   : > { %v3359_v46 = vadd.f32 %v3231_v32, %v8265_v13  ;;  %v8288_v49 = vadd.f32 %v2571_v8, %v2483_v39  ;;  %2521 = vmatmul.bf16.gmra.mxu0 %v7438_v2 }
 0x3ef   : > { %v5251_v22 = vpop.eup %5250  ;;  %4171 = vst [vmem:[%s5824_s18 + $0x88] sm:$0xff] %v4107_v25  ;;  %v3484_v6 = vmul.f32 0.7978846, %v3356_v60  ;;  %v2976_v18 = vmul.f32 0.044715, %v8285_v45  ;;  %2610 = vmatmul.bf16.gmra.mxu1 %v7443_v34  ;;  %2699 = vmatmul.bf16.gmra.mxu2 %v7438_v2  ;;  %v4000_v2 = vsel %vm8063_vm4, %v3863_v44, %v8215_v58 }
 0x3f0   : > { %v3736_v38 = vadd.f32 1.0, %v5251_v22  ;;  %v3487_v36 = vmul.f32 0.7978846, %v3359_v46  ;;  %v2979_v57 = vmul.f32 0.044715, %v8288_v49  ;;  %2788 = vmatmul.bf16.gmra.mxu3 %v7443_v34  ;;  %v5253_v20 = vpop.eup %5252  ;;  %v2847_v22 = vmul.f32 0.5, %v8265_v13 }
 0x3f1   : > { %5254 = vtanh.f32 %v3484_v6  ;;  %v3104_v43 = vmul.f32 %v2976_v18, %v8285_v45  ;;  %v3739_v7 = vadd.f32 1.0, %v5253_v20 }
 0x3f2   : > { %v3864_v35 = vmul.f32 %v3736_v38, %v2840_v50  ;;  %5256 = vtanh.f32 %v3487_v36  ;;  %v3107_v16 = vmul.f32 %v2979_v57, %v8288_v49  ;;  %v2660_v53 = vpop.f32.mrf.mxu2  ;;  %v2848_v57 = vmul.f32 0.5, %v8285_v45 }
 0x3f3   : > { %v3232_v63 = vmul.f32 %v3104_v43, %v8285_v45  ;;  %v2661_v59 = vadd.f32 %v2660_v53, %v7983_v23  ;;  %v2749_v3 = vpop.f32.mrf.mxu3  ;;  %v2484_v34 = vpop.f32.mrf.mxu0  ;;  %v3867_v4 = vmul.f32 %v3739_v7, %v2843_v1 }
 0x3f4   : > { %v4001_v24 = vsel %vm8067_vm5, %v3864_v35, %v8235_v0  ;;  %v3235_v31 = vmul.f32 %v3107_v16, %v8288_v49  ;;  %v2485_v27 = vadd.f32 %v2484_v34, %v7953_v52  ;;  %v2573_v48 = vpop.f32.mrf.mxu1  ;;  %v2844_v0 = vmul.f32 0.5, %v8261_v5 }
 0x3f5   : > { %v4109_v28 = vpack.c.bf16 %v4001_v24, %v4000_v2  ;;  %v3360_v58 = vadd.f32 %v3232_v63, %v8285_v45  ;;  %v8311_v55 = vadd.f32 %v2749_v3, %v2661_v59  ;;  %v4004_v39 = vsel %vm8063_vm4, %v3867_v4, %v8238_v40 }
 0x3f6   : > { %v3363_v29 = vadd.f32 %v3235_v31, %v8288_v49  ;;  %v8315_v14 = vadd.f32 %v2573_v48, %v2485_v27 }
 0x3f7   : > { %v5255_v19 = vpop.eup %5254  ;;  %4173 = vst [vmem:[%s5824_s18 + $0x98] sm:$0xff] %v4109_v28  ;;  %v3488_v17 = vmul.f32 0.7978846, %v3360_v58  ;;  %v2980_v62 = vmul.f32 0.044715, %v8311_v55 }
 0x3f8   : > { %v5257_v26 = vpop.eup %5256  ;;  %v3740_v12 = vadd.f32 1.0, %v5255_v19  ;;  %v3491_v30 = vmul.f32 0.7978846, %v3363_v29  ;;  %v2983_v15 = vmul.f32 0.044715, %v8315_v14  ;;  %v2851_v29 = vmul.f32 0.5, %v8288_v49 }
 0x3f9   : > { %5258 = vtanh.f32 %v3488_v17  ;;  %v3108_v10 = vmul.f32 %v2980_v62, %v8311_v55  ;;  %v3743_v21 = vadd.f32 1.0, %v5257_v26 }
 0x3fa   : > { %v3868_v33 = vmul.f32 %v3740_v12, %v2844_v0  ;;  %v3111_v9 = vmul.f32 %v2983_v15, %v8315_v14  ;;  %v2662_v41 = vpop.f32.mrf.mxu2  ;;  %5260 = vtanh.f32 %v3491_v30 }
 0x3fb   : > { %v3236_v51 = vmul.f32 %v3108_v10, %v8311_v55  ;;  %v2663_v56 = vadd.f32 %v2662_v41, %v7983_v23  ;;  %v2751_v42 = vpop.f32.mrf.mxu3  ;;  %v2487_v32 = vpop.f32.mrf.mxu0 }
 0x3fc   : > { %v4005_v8 = vsel %vm8067_vm5, %v3868_v33, %v8261_v5  ;;  %v3239_v25 = vmul.f32 %v3111_v9, %v8315_v14  ;;  %v2488_v61 = vadd.f32 %v2487_v32, %v7953_v52  ;;  %v2576_v60 = vpop.f32.mrf.mxu1  ;;  %v3871_v5 = vmul.f32 %v3743_v21, %v2847_v22 }
 0x3fd   : > { %v4111_v46 = vpack.c.bf16 %v4005_v8, %v4004_v39  ;;  %v3364_v44 = vadd.f32 %v3236_v51, %v8311_v55  ;;  %v8335_v6 = vadd.f32 %v2751_v42, %v2663_v56 }
 0x3fe   : > { %v3367_v18 = vadd.f32 %v3239_v25, %v8315_v14  ;;  %v8338_v50 = vadd.f32 %v2576_v60, %v2488_v61  ;;  %2526 = vmatmul.bf16.gmra.mxu0 %v7504_v11 }
 0x3ff   : > { %v5259_v40 = vpop.eup %5258  ;;  %4175 = vst [vmem:[%s5824_s18 + $0xa8] sm:$0xff] %v4111_v46  ;;  %v3492_v38 = vmul.f32 0.7978846, %v3364_v44  ;;  %v2984_v36 = vmul.f32 0.044715, %v8335_v6  ;;  %2615 = vmatmul.bf16.gmra.mxu1 %v7506_v54  ;;  %2704 = vmatmul.bf16.gmra.mxu2 %v7504_v11  ;;  %v4008_v11 = vsel %vm8063_vm4, %v3871_v5, %v8265_v13  ;;  %v2855_v44 = vmul.f32 0.5, %v8315_v14 }
 0x400   : > { %v3744_v20 = vadd.f32 1.0, %v5259_v40  ;;  %v3495_v43 = vmul.f32 0.7978846, %v3367_v18  ;;  %v2987_v35 = vmul.f32 0.044715, %v8338_v50  ;;  %2793 = vmatmul.bf16.gmra.mxu3 %v7506_v54  ;;  %v5261_v16 = vpop.eup %5260 }
 0x401   : > { %5262 = vtanh.f32 %v3492_v38  ;;  %v3112_v53 = vmul.f32 %v2984_v36, %v8335_v6  ;;  %v3747_v31 = vadd.f32 1.0, %v5261_v16 }
 0x402   : > { %v3872_v2 = vmul.f32 %v3744_v20, %v2848_v57  ;;  %5264 = vtanh.f32 %v3495_v43  ;;  %v3115_v63 = vmul.f32 %v2987_v35, %v8338_v50  ;;  %v2665_v59 = vpop.f32.mrf.mxu2  ;;  %v2856_v20 = vmul.f32 0.5, %v8335_v6 }
 0x403   : > { %v3240_v3 = vmul.f32 %v3112_v53, %v8335_v6  ;;  %v2666_v34 = vadd.f32 %v2665_v59, %v7983_v23  ;;  %v2754_v24 = vpop.f32.mrf.mxu3  ;;  %v2489_v54 = vpop.f32.mrf.mxu0  ;;  %v3875_v12 = vmul.f32 %v3747_v31, %v2851_v29 }
 0x404   : > { %v4009_v7 = vsel %vm8067_vm5, %v3872_v2, %v8285_v45  ;;  %v3243_v27 = vmul.f32 %v3115_v63, %v8338_v50  ;;  %v2490_v48 = vadd.f32 %v2489_v54, %v7953_v52  ;;  %v2578_v28 = vpop.f32.mrf.mxu1  ;;  %v2852_v45 = vmul.f32 0.5, %v8311_v55 }
 0x405   : > { %v4113_v58 = vpack.c.bf16 %v4009_v7, %v4008_v11  ;;  %v3368_v13 = vadd.f32 %v3240_v3, %v8335_v6  ;;  %v8361_v1 = vadd.f32 %v2754_v24, %v2666_v34  ;;  %v4012_v8 = vsel %vm8063_vm4, %v3875_v12, %v8288_v49 }
 0x406   : > { %v3371_v19 = vadd.f32 %v3243_v27, %v8338_v50  ;;  %v8365_v0 = vadd.f32 %v2578_v28, %v2490_v48 }
 0x407   : > { %v5263_v17 = vpop.eup %5262  ;;  %4177 = vst [vmem:[%s5824_s18 + $0xb8] sm:$0xff] %v4113_v58  ;;  %v3496_v62 = vmul.f32 0.7978846, %v3368_v13  ;;  %v2988_v26 = vmul.f32 0.044715, %v8361_v1 }
 0x408   : > { %v5265_v4 = vpop.eup %5264  ;;  %v3748_v30 = vadd.f32 1.0, %v5263_v17  ;;  %v3499_v15 = vmul.f32 0.7978846, %v3371_v19  ;;  %v2991_v10 = vmul.f32 0.044715, %v8365_v0  ;;  %v2859_v19 = vmul.f32 0.5, %v8338_v50 }
 0x409   : > { %5266 = vtanh.f32 %v3496_v62  ;;  %v3116_v33 = vmul.f32 %v2988_v26, %v8361_v1  ;;  %v3751_v51 = vadd.f32 1.0, %v5265_v4 }
 0x40a   : > { %v3876_v9 = vmul.f32 %v3748_v30, %v2852_v45  ;;  %v3119_v41 = vmul.f32 %v2991_v10, %v8365_v0  ;;  %v2667_v21 = vpop.f32.mrf.mxu2  ;;  %5268 = vtanh.f32 %v3499_v15 }
 0x40b   : > { %v3244_v56 = vmul.f32 %v3116_v33, %v8361_v1  ;;  %v2668_v42 = vadd.f32 %v2667_v21, %v7983_v23  ;;  %v2756_v32 = vpop.f32.mrf.mxu3  ;;  %v2492_v39 = vpop.f32.mrf.mxu0  ;;  %v3879_v36 = vmul.f32 %v3751_v51, %v2855_v44 }
 0x40c   : > { %v4013_v25 = vsel %vm8067_vm5, %v3876_v9, %v8311_v55  ;;  %v3247_v61 = vmul.f32 %v3119_v41, %v8365_v0  ;;  %v2493_v60 = vadd.f32 %v2492_v39, %v7953_v52  ;;  %v2581_v46 = vpop.f32.mrf.mxu1 }
 0x40d   : > { %v4115_v22 = vpack.c.bf16 %v4013_v25, %v4012_v8  ;;  %v3372_v18 = vadd.f32 %v3244_v56, %v8361_v1  ;;  %v8385_v40 = vadd.f32 %v2756_v32, %v2668_v42  ;;  %v4016_v3 = vsel %vm8063_vm4, %v3879_v36, %v8315_v14 }
 0x40e   : > { %v3375_v5 = vadd.f32 %v3247_v61, %v8365_v0  ;;  %v8388_v38 = vadd.f32 %v2581_v46, %v2493_v60 }
 0x40f   : > { %v5267_v49 = vpop.eup %5266  ;;  %4179 = vst [vmem:[%s5824_s18 + $0xc8] sm:$0xff] %v4115_v22  ;;  %v3500_v55 = vmul.f32 0.7978846, %v3372_v18  ;;  %v2992_v57 = vmul.f32 0.044715, %v8385_v40  ;;  %v2863_v18 = vmul.f32 0.5, %v8365_v0 }
 0x410   : > { %v3752_v43 = vadd.f32 1.0, %v5267_v49  ;;  %v3503_v35 = vmul.f32 0.7978846, %v3375_v5  ;;  %v2995_v16 = vmul.f32 0.044715, %v8388_v38  ;;  %v5269_v53 = vpop.eup %5268 }
 0x411   : > { %5270 = vtanh.f32 %v3500_v55  ;;  %v3120_v2 = vmul.f32 %v2992_v57, %v8385_v40  ;;  %v3755_v27 = vadd.f32 1.0, %v5269_v53 }
 0x412   : > { %v3880_v63 = vmul.f32 %v3752_v43, %v2856_v20  ;;  %5272 = vtanh.f32 %v3503_v35  ;;  %v3123_v59 = vmul.f32 %v2995_v16, %v8388_v38  ;;  %v2670_v11 = vpop.f32.mrf.mxu2  ;;  %v2864_v43 = vmul.f32 0.5, %v8385_v40 }
 0x413   : > { %v3248_v34 = vmul.f32 %v3120_v2, %v8385_v40  ;;  %v2671_v24 = vadd.f32 %v2670_v11, %v7983_v23  ;;  %v2759_v54 = vpop.f32.mrf.mxu3  ;;  %v2494_v7 = vpop.f32.mrf.mxu0  ;;  %v3883_v30 = vmul.f32 %v3755_v27, %v2859_v19 }
 0x414   : > { %v4017_v31 = vsel %vm8067_vm5, %v3880_v63, %v8335_v6  ;;  %v3251_v48 = vmul.f32 %v3123_v59, %v8388_v38  ;;  %v2495_v28 = vadd.f32 %v2494_v7, %v7953_v52  ;;  %v2583_v58 = vpop.f32.mrf.mxu1  ;;  %v2860_v6 = vmul.f32 0.5, %v8361_v1 }
 0x415   : > { %v4117_v13 = vpack.c.bf16 %v4017_v31, %v4016_v3  ;;  %v3376_v14 = vadd.f32 %v3248_v34, %v8385_v40  ;;  %v8407_v29 = vadd.f32 %v2759_v54, %v2671_v24  ;;  %v4020_v25 = vsel %vm8063_vm4, %v3883_v30, %v8338_v50 }
 0x416   : > { %v3379_v17 = vadd.f32 %v3251_v48, %v8388_v38  ;;  %v8411_v45 = vadd.f32 %v2583_v58, %v2495_v28 }
 0x417   : > { %v5271_v62 = vpop.eup %5270  ;;  %4181 = vst [vmem:[%s5824_s18 + $0xd8] sm:$0xff] %v4117_v13  ;;  %v3504_v26 = vmul.f32 0.7978846, %v3376_v14  ;;  %v2996_v4 = vmul.f32 0.044715, %v8407_v29 }
 0x418   : > { %v5273_v12 = vpop.eup %5272  ;;  %v3756_v15 = vadd.f32 1.0, %v5271_v62  ;;  %v3507_v10 = vmul.f32 0.7978846, %v3379_v17  ;;  %v2999_v33 = vmul.f32 0.044715, %v8411_v45  ;;  %v2867_v17 = vmul.f32 0.5, %v8388_v38 }
 0x419   : > { %5274 = vtanh.f32 %v3504_v26  ;;  %v3124_v9 = vmul.f32 %v2996_v4, %v8407_v29  ;;  %v3759_v56 = vadd.f32 1.0, %v5273_v12 }
 0x41a   : > { %v3884_v41 = vmul.f32 %v3756_v15, %v2860_v6  ;;  %v3127_v21 = vmul.f32 %v2999_v33, %v8411_v45  ;;  %v2672_v51 = vpop.f32.mrf.mxu2  ;;  %5276 = vtanh.f32 %v3507_v10 }
 0x41b   : > { %v3252_v42 = vmul.f32 %v3124_v9, %v8407_v29  ;;  %v2673_v32 = vadd.f32 %v2672_v51, %v7983_v23  ;;  %v2761_v39 = vpop.f32.mrf.mxu3  ;;  %v2497_v8 = vpop.f32.mrf.mxu0  ;;  %v3887_v57 = vmul.f32 %v3759_v56, %v2863_v18 }
 0x41c   : > { %v4021_v61 = vsel %vm8067_vm5, %v3884_v41, %v8361_v1  ;;  %v3255_v60 = vmul.f32 %v3127_v21, %v8411_v45  ;;  %v2498_v46 = vadd.f32 %v2497_v8, %v7953_v52  ;;  %v2586_v22 = vpop.f32.mrf.mxu1 }
 0x41d   : > { %v4119_v44 = vpack.c.bf16 %v4021_v61, %v4020_v25  ;;  %v3380_v5 = vadd.f32 %v3252_v42, %v8407_v29  ;;  %v8431_v49 = vadd.f32 %v2761_v39, %v2673_v32  ;;  %v4024_v34 = vsel %vm8063_vm4, %v3887_v57, %v8365_v0 }
 0x41e   : > { %v3383_v36 = vadd.f32 %v3255_v60, %v8411_v45  ;;  %v8434_v55 = vadd.f32 %v2586_v22, %v2498_v46 }
 0x41f   : > { %v5275_v50 = vpop.eup %5274  ;;  %4183 = vst [vmem:[%s5824_s18 + $0xe8] sm:$0xff] %v4119_v44  ;;  %v3508_v1 = vmul.f32 0.7978846, %v3380_v5  ;;  %v3000_v20 = vmul.f32 0.044715, %v8431_v49  ;;  %v2871_v5 = vmul.f32 0.5, %v8411_v45 }
 0x420   : > { %v3760_v35 = vadd.f32 1.0, %v5275_v50  ;;  %v3511_v16 = vmul.f32 0.7978846, %v3383_v36  ;;  %v3003_v53 = vmul.f32 0.044715, %v8434_v55  ;;  %v5277_v2 = vpop.eup %5276 }
 0x421   : > { %5278 = vtanh.f32 %v3508_v1  ;;  %v3128_v63 = vmul.f32 %v3000_v20, %v8431_v49  ;;  %v3763_v48 = vadd.f32 1.0, %v5277_v2 }
 0x422   : > { %v3888_v59 = vmul.f32 %v3760_v35, %v2864_v43  ;;  %5280 = vtanh.f32 %v3511_v16  ;;  %v3131_v11 = vmul.f32 %v3003_v53, %v8434_v55  ;;  %v2675_v3 = vpop.f32.mrf.mxu2  ;;  %v2872_v35 = vmul.f32 0.5, %v8431_v49 }
 0x423   : > { %v3256_v24 = vmul.f32 %v3128_v63, %v8431_v49  ;;  %v2676_v54 = vadd.f32 %v2675_v3, %v7983_v23  ;;  %v2764_v7 = vpop.f32.mrf.mxu3  ;;  %v2499_v31 = vpop.f32.mrf.mxu0  ;;  %v3891_v15 = vmul.f32 %v3763_v48, %v2867_v17 }
 0x424   : > { %v4025_v27 = vsel %vm8067_vm5, %v3888_v59, %v8385_v40  ;;  %v3259_v28 = vmul.f32 %v3131_v11, %v8434_v55  ;;  %v2500_v58 = vadd.f32 %v2499_v31, %v7953_v52  ;;  %v2588_v13 = vpop.f32.mrf.mxu1  ;;  %v2868_v40 = vmul.f32 0.5, %v8407_v29 }
 0x425   : > { %v4121_v14 = vpack.c.bf16 %v4025_v27, %v4024_v34  ;;  %v3384_v0 = vadd.f32 %v3256_v24, %v8431_v49  ;;  %v8453_v19 = vadd.f32 %v2764_v7, %v2676_v54  ;;  %v4028_v61 = vsel %vm8063_vm4, %v3891_v15, %v8388_v38 }
 0x426   : > { %v3387_v62 = vadd.f32 %v3259_v28, %v8434_v55  ;;  %v8457_v6 = vadd.f32 %v2588_v13, %v2500_v58 }
 0x427   : > { %v5279_v26 = vpop.eup %5278  ;;  %4185 = vst [vmem:[%s5824_s18 + $0xf8] sm:$0xff] %v4121_v14  ;;  %v3512_v4 = vmul.f32 0.7978846, %v3384_v0  ;;  %v3004_v12 = vmul.f32 0.044715, %v8453_v19 }
 0x428   : > { %v5281_v30 = vpop.eup %5280  ;;  %v3764_v10 = vadd.f32 1.0, %v5279_v26  ;;  %v3515_v33 = vmul.f32 0.7978846, %v3387_v62  ;;  %v3007_v9 = vmul.f32 0.044715, %v8457_v6  ;;  %v2875_v62 = vmul.f32 0.5, %v8434_v55 }
 0x429   : > { %5282 = vtanh.f32 %v3512_v4  ;;  %v3132_v41 = vmul.f32 %v3004_v12, %v8453_v19  ;;  %v3767_v42 = vadd.f32 1.0, %v5281_v30 }
 0x42a   : > { %v3892_v21 = vmul.f32 %v3764_v10, %v2868_v40  ;;  %v3135_v51 = vmul.f32 %v3007_v9, %v8457_v6  ;;  %v2677_v56 = vpop.f32.mrf.mxu2  ;;  %5284 = vtanh.f32 %v3515_v33 }
 0x42b   : > { %v3260_v32 = vmul.f32 %v3132_v41, %v8453_v19  ;;  %v2678_v39 = vadd.f32 %v2677_v56, %v7983_v23  ;;  %v2766_v8 = vpop.f32.mrf.mxu3  ;;  %v2502_v25 = vpop.f32.mrf.mxu0  ;;  %v3895_v20 = vmul.f32 %v3767_v42, %v2871_v5 }
 0x42c   : > { %v4029_v60 = vsel %vm8067_vm5, %v3892_v21, %v8407_v29  ;;  %v3263_v46 = vmul.f32 %v3135_v51, %v8457_v6  ;;  %v2503_v22 = vadd.f32 %v2502_v25, %v7953_v52  ;;  %v2591_v44 = vpop.f32.mrf.mxu1 }
 0x42d   : > { %v4123_v18 = vpack.c.bf16 %v4029_v60, %v4028_v61  ;;  %v3388_v36 = vadd.f32 %v3260_v32, %v8453_v19  ;;  %v8477_v50 = vadd.f32 %v2766_v8, %v2678_v39  ;;  %v4032_v24 = vsel %vm8063_vm4, %v3895_v20, %v8411_v45 }
 0x42e   : > { %v3391_v57 = vadd.f32 %v3263_v46, %v8457_v6  ;;  %v8480_v1 = vadd.f32 %v2591_v44, %v2503_v22 }
 0x42f   : > { %v5283_v38 = vpop.eup %5282  ;;  %4187 = vst [vmem:[%s5824_s18 + $0x108] sm:$0xff] %v4123_v18  ;;  %v3516_v29 = vmul.f32 0.7978846, %v3388_v36  ;;  %v3008_v43 = vmul.f32 0.044715, %v8477_v50  ;;  %v2879_v36 = vmul.f32 0.5, %v8457_v6 }
 0x430   : > { %v3768_v16 = vadd.f32 1.0, %v5283_v38  ;;  %v3519_v53 = vmul.f32 0.7978846, %v3391_v57  ;;  %v3011_v2 = vmul.f32 0.044715, %v8480_v1  ;;  %v5285_v63 = vpop.eup %5284 }
 0x431   : > { %5286 = vtanh.f32 %v3516_v29  ;;  %v3136_v59 = vmul.f32 %v3008_v43, %v8477_v50  ;;  %v3771_v28 = vadd.f32 1.0, %v5285_v63 }
 0x432   : > { %v3896_v11 = vmul.f32 %v3768_v16, %v2872_v35  ;;  %5288 = vtanh.f32 %v3519_v53  ;;  %v3139_v3 = vmul.f32 %v3011_v2, %v8480_v1  ;;  %v2680_v34 = vpop.f32.mrf.mxu2  ;;  %v2880_v16 = vmul.f32 0.5, %v8477_v50 }
 0x433   : > { %v3264_v54 = vmul.f32 %v3136_v59, %v8477_v50  ;;  %v2681_v7 = vadd.f32 %v2680_v34, %v7983_v23  ;;  %v2769_v31 = vpop.f32.mrf.mxu3  ;;  %v2504_v27 = vpop.f32.mrf.mxu0  ;;  %v3899_v10 = vmul.f32 %v3771_v28, %v2875_v62 }
 0x434   : > { %v4033_v48 = vsel %vm8067_vm5, %v3896_v11, %v8431_v49  ;;  %v3267_v58 = vmul.f32 %v3139_v3, %v8480_v1  ;;  %v2505_v13 = vadd.f32 %v2504_v27, %v7953_v52  ;;  %v2593_v14 = vpop.f32.mrf.mxu1  ;;  %v2876_v49 = vmul.f32 0.5, %v8453_v19 }
 0x435   : > { %v4125_v0 = vpack.c.bf16 %v4033_v48, %v4032_v24  ;;  %v3392_v45 = vadd.f32 %v3264_v54, %v8477_v50  ;;  %v8499_v17 = vadd.f32 %v2769_v31, %v2681_v7  ;;  %v4036_v60 = vsel %vm8063_vm4, %v3899_v10, %v8434_v55 }
 0x436   : > { %v3395_v26 = vadd.f32 %v3267_v58, %v8480_v1  ;;  %v8503_v40 = vadd.f32 %v2593_v14, %v2505_v13 }
 0x437   : > { %v5287_v4 = vpop.eup %5286  ;;  %4189 = vst [vmem:[%s5824_s18 + $0x118] sm:$0xff] %v4125_v0  ;;  %v3520_v12 = vmul.f32 0.7978846, %v3392_v45  ;;  %v3012_v30 = vmul.f32 0.044715, %v8499_v17 }
 0x438   : > { %v5289_v15 = vpop.eup %5288  ;;  %v3772_v33 = vadd.f32 1.0, %v5287_v4  ;;  %v3523_v9 = vmul.f32 0.7978846, %v3395_v26  ;;  %v3015_v41 = vmul.f32 0.044715, %v8503_v40  ;;  %v2883_v26 = vmul.f32 0.5, %v8480_v1 }
 0x439   : > { %5290 = vtanh.f32 %v3520_v12  ;;  %v3140_v21 = vmul.f32 %v3012_v30, %v8499_v17  ;;  %v3775_v32 = vadd.f32 1.0, %v5289_v15 }
 0x43a   : > { %v3900_v51 = vmul.f32 %v3772_v33, %v2876_v49  ;;  %v3143_v56 = vmul.f32 %v3015_v41, %v8503_v40  ;;  %v2682_v42 = vpop.f32.mrf.mxu2  ;;  %5292 = vtanh.f32 %v3523_v9 }
 0x43b   : > { %v3268_v39 = vmul.f32 %v3140_v21, %v8499_v17  ;;  %v2683_v8 = vadd.f32 %v2682_v42, %v7983_v23  ;;  %v2771_v25 = vpop.f32.mrf.mxu3  ;;  %v2507_v61 = vpop.f32.mrf.mxu0  ;;  %v3903_v43 = vmul.f32 %v3775_v32, %v2879_v36 }
 0x43c   : > { %v4037_v46 = vsel %vm8067_vm5, %v3900_v51, %v8453_v19  ;;  %v3271_v22 = vmul.f32 %v3143_v56, %v8503_v40  ;;  %v2508_v44 = vadd.f32 %v2507_v61, %v7953_v52  ;;  %v2596_v18 = vpop.f32.mrf.mxu1 }
 0x43d   : > { %v4127_v5 = vpack.c.bf16 %v4037_v46, %v4036_v60  ;;  %v3396_v57 = vadd.f32 %v3268_v39, %v8499_v17  ;;  %v8523_v38 = vadd.f32 %v2771_v25, %v2683_v8  ;;  %v4040_v54 = vsel %vm8063_vm4, %v3903_v43, %v8457_v6 }
 0x43e   : > { %v3399_v20 = vadd.f32 %v3271_v22, %v8503_v40  ;;  %v8526_v29 = vadd.f32 %v2596_v18, %v2508_v44 }
 0x43f   : > { %v5291_v55 = vpop.eup %5290  ;;  %4191 = vst [vmem:[%s5824_s18 + $0x128] sm:$0xff] %v4127_v5  ;;  %v3524_v19 = vmul.f32 0.7978846, %v3396_v57  ;;  %v3016_v35 = vmul.f32 0.044715, %v8523_v38  ;;  %v2887_v57 = vmul.f32 0.5, %v8503_v40 }
 0x440   : > { %v3776_v53 = vadd.f32 1.0, %v5291_v55  ;;  %v3527_v2 = vmul.f32 0.7978846, %v3399_v20  ;;  %v3019_v63 = vmul.f32 0.044715, %v8526_v29  ;;  %v5293_v59 = vpop.eup %5292 }
 0x441   : > { %5294 = vtanh.f32 %v3524_v19  ;;  %v3144_v11 = vmul.f32 %v3016_v35, %v8523_v38  ;;  %v3779_v58 = vadd.f32 1.0, %v5293_v59 }
 0x442   : > { %v3904_v3 = vmul.f32 %v3776_v53, %v2880_v16  ;;  %5296 = vtanh.f32 %v3527_v2  ;;  %v3147_v34 = vmul.f32 %v3019_v63, %v8526_v29  ;;  %v2685_v24 = vpop.f32.mrf.mxu2  ;;  %v2888_v53 = vmul.f32 0.5, %v8523_v38 }
 0x443   : > { %v3272_v7 = vmul.f32 %v3144_v11, %v8523_v38  ;;  %v2686_v31 = vadd.f32 %v2685_v24, %v7983_v23  ;;  %v2774_v27 = vpop.f32.mrf.mxu3  ;;  %v2509_v48 = vpop.f32.mrf.mxu0  ;;  %v3907_v33 = vmul.f32 %v3779_v58, %v2883_v26 }
 0x444   : > { %v4041_v28 = vsel %vm8067_vm5, %v3904_v3, %v8477_v50  ;;  %v3275_v13 = vmul.f32 %v3147_v34, %v8526_v29  ;;  %v2510_v14 = vadd.f32 %v2509_v48, %v7953_v52  ;;  %v2598_v0 = vpop.f32.mrf.mxu1  ;;  %v2884_v50 = vmul.f32 0.5, %v8499_v17 }
 0x445   : > { %v4129_v45 = vpack.c.bf16 %v4041_v28, %v4040_v54  ;;  %v3400_v6 = vadd.f32 %v3272_v7, %v8523_v38  ;;  %v8545_v62 = vadd.f32 %v2774_v27, %v2686_v31  ;;  %v4044_v46 = vsel %vm8063_vm4, %v3907_v33, %v8480_v1 }
 0x446   : > { %v3403_v4 = vadd.f32 %v3275_v13, %v8526_v29  ;;  %v8549_v49 = vadd.f32 %v2598_v0, %v2510_v14 }
 0x447   : > { %v5295_v12 = vpop.eup %5294  ;;  %4193 = vst [vmem:[%s5824_s18 + $0x138] sm:$0xff] %v4129_v45  ;;  %v3528_v30 = vmul.f32 0.7978846, %v3400_v6  ;;  %v3020_v15 = vmul.f32 0.044715, %v8545_v62 }
 0x448   : > { %v5297_v10 = vpop.eup %5296  ;;  %v3780_v9 = vadd.f32 1.0, %v5295_v12  ;;  %v3531_v41 = vmul.f32 0.7978846, %v3403_v4  ;;  %v3023_v21 = vmul.f32 0.044715, %v8549_v49  ;;  %v2891_v4 = vmul.f32 0.5, %v8526_v29 }
 0x449   : > { %5298 = vtanh.f32 %v3528_v30  ;;  %v3148_v51 = vmul.f32 %v3020_v15, %v8545_v62  ;;  %v3783_v39 = vadd.f32 1.0, %v5297_v10 }
 0x44a   : > { %v3908_v56 = vmul.f32 %v3780_v9, %v2884_v50  ;;  %v3151_v42 = vmul.f32 %v3023_v21, %v8549_v49  ;;  %v2687_v32 = vpop.f32.mrf.mxu2  ;;  %5300 = vtanh.f32 %v3531_v41 }
 0x44b   : > { %v3276_v8 = vmul.f32 %v3148_v51, %v8545_v62  ;;  %v2688_v25 = vadd.f32 %v2687_v32, %v7983_v23  ;;  %v2776_v61 = vpop.f32.mrf.mxu3  ;;  %v2512_v60 = vpop.f32.mrf.mxu0  ;;  %v3911_v35 = vmul.f32 %v3783_v39, %v2887_v57 }
 0x44c   : > { %v4045_v22 = vsel %vm8067_vm5, %v3908_v56, %v8499_v17  ;;  %v3279_v44 = vmul.f32 %v3151_v42, %v8549_v49  ;;  %v2513_v18 = vadd.f32 %v2512_v60, %v7953_v52  ;;  %v2601_v5 = vpop.f32.mrf.mxu1 }
 0x44d   : > { %v4131_v36 = vpack.c.bf16 %v4045_v22, %v4044_v46  ;;  %v3404_v20 = vadd.f32 %v3276_v8, %v8545_v62  ;;  %v8569_v55 = vadd.f32 %v2776_v61, %v2688_v25  ;;  %v4048_v7 = vsel %vm8063_vm4, %v3911_v35, %v8503_v40 }
 0x44e   : > { %v3407_v43 = vadd.f32 %v3279_v44, %v8549_v49  ;;  %v8572_v19 = vadd.f32 %v2601_v5, %v2513_v18 }
 0x44f   : > { %v5299_v1 = vpop.eup %5298  ;;  %4195 = vst [vmem:[%s5824_s18 + $0x148] sm:$0xff] %v4131_v36  ;;  %v3532_v17 = vmul.f32 0.7978846, %v3404_v20  ;;  %v3024_v16 = vmul.f32 0.044715, %v8569_v55  ;;  %v2895_v20 = vmul.f32 0.5, %v8549_v49 }
 0x450   : > { %v3784_v2 = vadd.f32 1.0, %v5299_v1  ;;  %v3535_v63 = vmul.f32 0.7978846, %v3407_v43  ;;  %v3027_v59 = vmul.f32 0.044715, %v8572_v19  ;;  %v5301_v11 = vpop.eup %5300 }
 0x451   : > { %5302 = vtanh.f32 %v3532_v17  ;;  %v3152_v3 = vmul.f32 %v3024_v16, %v8569_v55  ;;  %v3787_v13 = vadd.f32 1.0, %v5301_v11 }
 0x452   : > { %v3912_v34 = vmul.f32 %v3784_v2, %v2888_v53  ;;  %5304 = vtanh.f32 %v3535_v63  ;;  %v3155_v24 = vmul.f32 %v3027_v59, %v8572_v19  ;;  %v2690_v54 = vpop.f32.mrf.mxu2  ;;  %v2896_v2 = vmul.f32 0.5, %v8569_v55 }
 0x453   : > { %v3280_v31 = vmul.f32 %v3152_v3, %v8569_v55  ;;  %v2691_v27 = vadd.f32 %v2690_v54, %v7983_v23  ;;  %v2779_v48 = vpop.f32.mrf.mxu3  ;;  %v2514_v28 = vpop.f32.mrf.mxu0  ;;  %v3915_v9 = vmul.f32 %v3787_v13, %v2891_v4 }
 0x454   : > { %v4049_v58 = vsel %vm8067_vm5, %v3912_v34, %v8523_v38  ;;  %v3283_v14 = vmul.f32 %v3155_v24, %v8572_v19  ;;  %v2515_v0 = vadd.f32 %v2514_v28, %v7953_v52  ;;  %v2603_v45 = vpop.f32.mrf.mxu1  ;;  %v2892_v38 = vmul.f32 0.5, %v8545_v62 }
 0x455   : > { %v4133_v6 = vpack.c.bf16 %v4049_v58, %v4048_v7  ;;  %v3408_v40 = vadd.f32 %v3280_v31, %v8569_v55  ;;  %v8591_v26 = vadd.f32 %v2779_v48, %v2691_v27  ;;  %v4052_v22 = vsel %vm8063_vm4, %v3915_v9, %v8526_v29 }
 0x456   : > { %v3411_v12 = vadd.f32 %v3283_v14, %v8572_v19  ;;  %v8595_v50 = vadd.f32 %v2603_v45, %v2515_v0 }
 0x457   : > { %v5303_v30 = vpop.eup %5302  ;;  %4197 = vst [vmem:[%s5824_s18 + $0x158] sm:$0xff] %v4133_v6  ;;  %v3536_v15 = vmul.f32 0.7978846, %v3408_v40  ;;  %v3028_v10 = vmul.f32 0.044715, %v8591_v26 }
 0x458   : > { %v5305_v33 = vpop.eup %5304  ;;  %v3788_v41 = vadd.f32 1.0, %v5303_v30  ;;  %v3539_v21 = vmul.f32 0.7978846, %v3411_v12  ;;  %v3031_v51 = vmul.f32 0.044715, %v8595_v50  ;;  %v2899_v12 = vmul.f32 0.5, %v8572_v19 }
 0x459   : > { %5306 = vtanh.f32 %v3536_v15  ;;  %v3156_v56 = vmul.f32 %v3028_v10, %v8591_v26  ;;  %v3791_v8 = vadd.f32 1.0, %v5305_v33 }
 0x45a   : > { %v3916_v42 = vmul.f32 %v3788_v41, %v2892_v38  ;;  %v3159_v32 = vmul.f32 %v3031_v51, %v8595_v50  ;;  %v2692_v39 = vpop.f32.mrf.mxu2  ;;  %5308 = vtanh.f32 %v3539_v21 }
 0x45b   : > { %v3284_v25 = vmul.f32 %v3156_v56, %v8591_v26  ;;  %v2693_v61 = vadd.f32 %v2692_v39, %v7983_v23  ;;  %v2781_v60 = vpop.f32.mrf.mxu3  ;;  %v2517_v46 = vpop.f32.mrf.mxu0  ;;  %v3919_v16 = vmul.f32 %v3791_v8, %v2895_v20 }
 0x45c   : > { %v4053_v44 = vsel %vm8067_vm5, %v3916_v42, %v8545_v62  ;;  %v3287_v18 = vmul.f32 %v3159_v32, %v8595_v50  ;;  %v2518_v5 = vadd.f32 %v2517_v46, %v7953_v52  ;;  %v2606_v36 = vpop.f32.mrf.mxu1 }
 0x45d   : > { %v4135_v57 = vpack.c.bf16 %v4053_v44, %v4052_v22  ;;  %v3412_v43 = vadd.f32 %v3284_v25, %v8591_v26  ;;  %v8615_v1 = vadd.f32 %v2781_v60, %v2693_v61  ;;  %v4056_v31 = vsel %vm8063_vm4, %v3919_v16, %v8549_v49 }
 0x45e   : > { %v3415_v35 = vadd.f32 %v3287_v18, %v8595_v50  ;;  %v8618_v17 = vadd.f32 %v2606_v36, %v2518_v5 }
 0x45f   : > { %v5307_v29 = vpop.eup %5306  ;;  %4199 = vst [vmem:[%s5824_s18 + $0x168] sm:$0xff] %v4135_v57  ;;  %v3540_v62 = vmul.f32 0.7978846, %v3412_v43  ;;  %v3032_v53 = vmul.f32 0.044715, %v8615_v1  ;;  %v2903_v43 = vmul.f32 0.5, %v8595_v50 }
 0x460   : > { %v3792_v63 = vadd.f32 1.0, %v5307_v29  ;;  %v3543_v59 = vmul.f32 0.7978846, %v3415_v35  ;;  %v3035_v11 = vmul.f32 0.044715, %v8618_v17  ;;  %v5309_v3 = vpop.eup %5308 }
 0x461   : > { %5310 = vtanh.f32 %v3540_v62  ;;  %v3160_v34 = vmul.f32 %v3032_v53, %v8615_v1  ;;  %v3795_v14 = vadd.f32 1.0, %v5309_v3 }
 0x462   : > { %v3920_v24 = vmul.f32 %v3792_v63, %v2896_v2  ;;  %5312 = vtanh.f32 %v3543_v59  ;;  %v3163_v54 = vmul.f32 %v3035_v11, %v8618_v17  ;;  %v2695_v7 = vpop.f32.mrf.mxu2  ;;  %v2904_v63 = vmul.f32 0.5, %v8615_v1 }
 0x463   : > { %v3288_v27 = vmul.f32 %v3160_v34, %v8615_v1  ;;  %v2696_v48 = vadd.f32 %v2695_v7, %v7983_v23  ;;  %v2784_v28 = vpop.f32.mrf.mxu3  ;;  %v2519_v58 = vpop.f32.mrf.mxu0  ;;  %v3923_v41 = vmul.f32 %v3795_v14, %v2899_v12 }
 0x464   : > { %v4057_v13 = vsel %vm8067_vm5, %v3920_v24, %v8569_v55  ;;  %v3291_v0 = vmul.f32 %v3163_v54, %v8618_v17  ;;  %v2520_v45 = vadd.f32 %v2519_v58, %v7953_v52  ;;  %v2608_v6 = vpop.f32.mrf.mxu1  ;;  %v2900_v55 = vmul.f32 0.5, %v8591_v26 }
 0x465   : > { %v4137_v40 = vpack.c.bf16 %v4057_v13, %v4056_v31  ;;  %v3416_v49 = vadd.f32 %v3288_v27, %v8615_v1  ;;  %v8637_v4 = vadd.f32 %v2784_v28, %v2696_v48  ;;  %v4060_v44 = vsel %vm8063_vm4, %v3923_v41, %v8572_v19 }
 0x466   : > { %v3419_v30 = vadd.f32 %v3291_v0, %v8618_v17  ;;  %v8641_v38 = vadd.f32 %v2608_v6, %v2520_v45 }
 0x467   : > { %v5311_v15 = vpop.eup %5310  ;;  %4201 = vst [vmem:[%s5824_s18 + $0x178] sm:$0xff] %v4137_v40  ;;  %v3544_v10 = vmul.f32 0.7978846, %v3416_v49  ;;  %v3036_v33 = vmul.f32 0.044715, %v8637_v4 }
 0x468   : > { %v5313_v9 = vpop.eup %5312  ;;  %v3796_v21 = vadd.f32 1.0, %v5311_v15  ;;  %v3547_v51 = vmul.f32 0.7978846, %v3419_v30  ;;  %v3039_v56 = vmul.f32 0.044715, %v8641_v38  ;;  %v2907_v30 = vmul.f32 0.5, %v8618_v17 }
 0x469   : > { %5314 = vtanh.f32 %v3544_v10  ;;  %v3164_v42 = vmul.f32 %v3036_v33, %v8637_v4  ;;  %v3799_v25 = vadd.f32 1.0, %v5313_v9 }
 0x46a   : > { %v3924_v32 = vmul.f32 %v3796_v21, %v2900_v55  ;;  %v3167_v39 = vmul.f32 %v3039_v56, %v8641_v38  ;;  %v2697_v8 = vpop.f32.mrf.mxu2  ;;  %5316 = vtanh.f32 %v3547_v51 }
 0x46b   : > { %v3292_v61 = vmul.f32 %v3164_v42, %v8637_v4  ;;  %v2698_v60 = vadd.f32 %v2697_v8, %v7983_v23  ;;  %v2786_v46 = vpop.f32.mrf.mxu3  ;;  %v2522_v22 = vpop.f32.mrf.mxu0  ;;  %v3927_v53 = vmul.f32 %v3799_v25, %v2903_v43 }
 0x46c   : > { %v4061_v18 = vsel %vm8067_vm5, %v3924_v32, %v8591_v26  ;;  %v3295_v5 = vmul.f32 %v3167_v39, %v8641_v38  ;;  %v2523_v36 = vadd.f32 %v2522_v22, %v7953_v52  ;;  %v2611_v57 = vpop.f32.mrf.mxu1 }
 0x46d   : > { %v4139_v20 = vpack.c.bf16 %v4061_v18, %v4060_v44  ;;  %v3420_v35 = vadd.f32 %v3292_v61, %v8637_v4  ;;  %v8661_v29 = vadd.f32 %v2786_v46, %v2698_v60  ;;  %v4064_v27 = vsel %vm8063_vm4, %v3927_v53, %v8595_v50 }
 0x46e   : > { %v3423_v16 = vadd.f32 %v3295_v5, %v8641_v38  ;;  %v8664_v62 = vadd.f32 %v2611_v57, %v2523_v36 }
 0x46f   : > { %v5315_v19 = vpop.eup %5314  ;;  %4203 = vst [vmem:[%s5824_s18 + $0x188] sm:$0xff] %v4139_v20  ;;  %v3548_v26 = vmul.f32 0.7978846, %v3420_v35  ;;  %v3040_v2 = vmul.f32 0.044715, %v8661_v29  ;;  %v2911_v35 = vmul.f32 0.5, %v8641_v38 }
 0x470   : > { %v3800_v59 = vadd.f32 1.0, %v5315_v19  ;;  %v3551_v11 = vmul.f32 0.7978846, %v3423_v16  ;;  %v3043_v3 = vmul.f32 0.044715, %v8664_v62  ;;  %v5317_v34 = vpop.eup %5316 }
 0x471   : > { %5318 = vtanh.f32 %v3548_v26  ;;  %v3168_v24 = vmul.f32 %v3040_v2, %v8661_v29  ;;  %v3803_v0 = vadd.f32 1.0, %v5317_v34 }
 0x472   : > { %v3928_v54 = vmul.f32 %v3800_v59, %v2904_v63  ;;  %5320 = vtanh.f32 %v3551_v11  ;;  %v3171_v7 = vmul.f32 %v3043_v3, %v8664_v62  ;;  %v2700_v31 = vpop.f32.mrf.mxu2  ;;  %v2912_v59 = vmul.f32 0.5, %v8661_v29 }
 0x473   : > { %v3296_v48 = vmul.f32 %v3168_v24, %v8661_v29  ;;  %v2701_v28 = vadd.f32 %v2700_v31, %v7983_v23  ;;  %v2789_v58 = vpop.f32.mrf.mxu3  ;;  %v2524_v13 = vpop.f32.mrf.mxu0  ;;  %v3931_v21 = vmul.f32 %v3803_v0, %v2907_v30 }
 0x474   : > { %v4065_v14 = vsel %vm8067_vm5, %v3928_v54, %v8615_v1  ;;  %v3299_v45 = vmul.f32 %v3171_v7, %v8664_v62  ;;  %v2525_v6 = vadd.f32 %v2524_v13, %v7953_v52  ;;  %v2613_v40 = vpop.f32.mrf.mxu1  ;;  %v2908_v1 = vmul.f32 0.5, %v8637_v4 }
 0x475   : > { %v4141_v49 = vpack.c.bf16 %v4065_v14, %v4064_v27  ;;  %v3424_v50 = vadd.f32 %v3296_v48, %v8661_v29  ;;  %v8683_v12 = vadd.f32 %v2789_v58, %v2701_v28  ;;  %v4068_v18 = vsel %vm8063_vm4, %v3931_v21, %v8618_v17 }
 0x476   : > { %v3427_v15 = vadd.f32 %v3299_v45, %v8664_v62  ;;  %v8687_v55 = vadd.f32 %v2613_v40, %v2525_v6 }
 0x477   : > { %v5319_v10 = vpop.eup %5318  ;;  %4205 = vst [vmem:[%s5824_s18 + $0x198] sm:$0xff] %v4141_v49  ;;  %v3552_v33 = vmul.f32 0.7978846, %v3424_v50  ;;  %v3044_v9 = vmul.f32 0.044715, %v8683_v12 }
 0x478   : > { %v5321_v41 = vpop.eup %5320  ;;  %v3804_v51 = vadd.f32 1.0, %v5319_v10  ;;  %v3555_v56 = vmul.f32 0.7978846, %v3427_v15  ;;  %v3047_v42 = vmul.f32 0.044715, %v8687_v55  ;;  %v2915_v15 = vmul.f32 0.5, %v8664_v62 }
 0x479   : > { %5322 = vtanh.f32 %v3552_v33  ;;  %v3172_v32 = vmul.f32 %v3044_v9, %v8683_v12  ;;  %v3807_v61 = vadd.f32 1.0, %v5321_v41 }
 0x47a   : > { %v3932_v39 = vmul.f32 %v3804_v51, %v2908_v1  ;;  %v3175_v8 = vmul.f32 %v3047_v42, %v8687_v55  ;;  %v2702_v25 = vpop.f32.mrf.mxu2  ;;  %5324 = vtanh.f32 %v3555_v56 }
 0x47b   : > { %v3300_v60 = vmul.f32 %v3172_v32, %v8683_v12  ;;  %v2703_v46 = vadd.f32 %v2702_v25, %v7983_v23  ;;  %v2791_v22 = vpop.f32.mrf.mxu3  ;;  %v2527_v44 = vpop.f32.mrf.mxu0  ;;  %v3935_v2 = vmul.f32 %v3807_v61, %v2911_v35 }
 0x47c   : > { %v4069_v5 = vsel %vm8067_vm5, %v3932_v39, %v8637_v4  ;;  %v3303_v36 = vmul.f32 %v3175_v8, %v8687_v55  ;;  %v2528_v57 = vadd.f32 %v2527_v44, %v7953_v52  ;;  %v2616_v20 = vpop.f32.mrf.mxu1 }
 0x47d   : > { %v4143_v43 = vpack.c.bf16 %v4069_v5, %v4068_v18  ;;  %v3428_v16 = vadd.f32 %v3300_v60, %v8683_v12  ;;  %v8707_v19 = vadd.f32 %v2791_v22, %v2703_v46  ;;  %v4072_v48 = vsel %vm8063_vm4, %v3935_v2, %v8641_v38 }
 0x47e   : > { %v3431_v53 = vadd.f32 %v3303_v36, %v8687_v55  ;;  %v8710_v26 = vadd.f32 %v2616_v20, %v2528_v57 }
 0x47f   : > { %v5323_v17 = vpop.eup %5322  ;;  %4207 = vst [vmem:[%s5824_s18 + $0x1a8] sm:$0xff] %v4143_v43  ;;  %v3556_v4 = vmul.f32 0.7978846, %v3428_v16  ;;  %v3048_v63 = vmul.f32 0.044715, %v8707_v19  ;;  %v2919_v43 = vmul.f32 0.5, %v8687_v55 }
 0x480   : > { %v3808_v11 = vadd.f32 1.0, %v5323_v17  ;;  %v3559_v3 = vmul.f32 0.7978846, %v3431_v53  ;;  %v3051_v34 = vmul.f32 0.044715, %v8710_v26  ;;  %v5325_v24 = vpop.eup %5324  ;;  %v2920_v17 = vmul.f32 0.5, %v8707_v19 }
 0x481   : > { %5326 = vtanh.f32 %v3556_v4  ;;  %v3176_v54 = vmul.f32 %v3048_v63, %v8707_v19  ;;  %v3811_v45 = vadd.f32 1.0, %v5325_v24 }
 0x482   : > { %v3936_v7 = vmul.f32 %v3808_v11, %v2912_v59  ;;  %v3179_v31 = vmul.f32 %v3051_v34, %v8710_v26  ;;  %v2705_v27 = vpop.f32.mrf.mxu2  ;;  %5328 = vtanh.f32 %v3559_v3 }
 0x483   : > { %v3304_v28 = vmul.f32 %v3176_v54, %v8707_v19  ;;  %v2706_v58 = vadd.f32 %v2705_v27, %v7983_v23  ;;  %v2794_v13 = vpop.f32.mrf.mxu3  ;;  %v2529_v14 = vpop.f32.mrf.mxu0 }
 0x484   : > { %v4073_v0 = vsel %vm8067_vm5, %v3936_v7, %v8661_v29  ;;  %v3307_v6 = vmul.f32 %v3179_v31, %v8710_v26  ;;  %v2530_v40 = vadd.f32 %v2529_v14, %v7953_v52  ;;  %v2618_v30 = vpop.f32.mrf.mxu1  ;;  %v2916_v29 = vmul.f32 0.5, %v8683_v12 }
 0x485   : > { %v4145_v49 = vpack.c.bf16 %v4073_v0, %v4072_v48  ;;  %v3432_v38 = vadd.f32 %v3304_v28, %v8707_v19  ;;  %v8729_v50 = vadd.f32 %v2794_v13, %v2706_v58  ;;  %v3939_v52 = vmul.f32 %v3811_v45, %v2915_v15 }
 0x486   : > { %v3435_v10 = vadd.f32 %v3307_v6, %v8710_v26  ;;  %v8733_v1 = vadd.f32 %v2618_v30, %v2530_v40  ;;  %v2923_v31 = vmul.f32 0.5, %v8710_v26 }
 0x487   : > { %v5327_v33 = vpop.eup %5326  ;;  %4209 = vst [vmem:[%s5824_s18 + $0x1b8] sm:$0xff] %v4145_v49  ;;  %v3560_v9 = vmul.f32 0.7978846, %v3432_v38  ;;  %v3052_v41 = vmul.f32 0.044715, %v8729_v50  ;;  %v4076_v46 = vsel %vm8063_vm4, %v3939_v52, %v8664_v62  ;;  %v2924_v58 = vmul.f32 0.5, %v8729_v50 }
 0x488   : > { %v3812_v21 = vadd.f32 1.0, %v5327_v33  ;;  %v3563_v51 = vmul.f32 0.7978846, %v3435_v10  ;;  %v3055_v56 = vmul.f32 0.044715, %v8733_v1  ;;  %v5329_v42 = vpop.eup %5328  ;;  %v2927_v40 = vmul.f32 0.5, %v8733_v1 }
 0x489   : > { %5330 = vtanh.f32 %v3560_v9  ;;  %v3180_v32 = vmul.f32 %v3052_v41, %v8729_v50  ;;  %v3815_v44 = vadd.f32 1.0, %v5329_v42 }
 0x48a   : > { %v3940_v39 = vmul.f32 %v3812_v21, %v2916_v29  ;;  %v3183_v8 = vmul.f32 %v3055_v56, %v8733_v1  ;;  %v2707_v25 = vpop.f32.mrf.mxu2  ;;  %5332 = vtanh.f32 %v3563_v51 }
 0x48b   : > { %v3308_v61 = vmul.f32 %v3180_v32, %v8729_v50  ;;  %v2708_v60 = vadd.f32 %v2707_v25, %v7983_v23  ;;  %v2796_v5 = vpop.f32.mrf.mxu3  ;;  %v3943_v53 = vmul.f32 %v3815_v44, %v2919_v43 }
 0x48c   : > { %v4077_v22 = vsel %vm8067_vm5, %v3940_v39, %v8683_v12  ;;  %v3311_v18 = vmul.f32 %v3183_v8, %v8733_v1 }
 0x48d   : > { %v4147_v36 = vpack.c.bf16 %v4077_v22, %v4076_v46  ;;  %v3436_v57 = vadd.f32 %v3308_v61, %v8729_v50  ;;  %v2797_v20 = vadd.f32 %v2796_v5, %v2708_v60  ;;  %v4080_v3 = vsel %vm8063_vm4, %v3943_v53, %v8687_v55 }
 0x48e   : > { %v3439_v23 = vadd.f32 %v3311_v18, %v8733_v1 }
 0x48f   : > { %v5331_v35 = vpop.eup %5330  ;;  %4211 = vst [vmem:[%s5824_s18 + $0x1c8] sm:$0xff] %v4147_v36  ;;  %v3564_v16 = vmul.f32 0.7978846, %v3436_v57  ;;  %v3056_v62 = vmul.f32 0.044715, %v2797_v20  ;;  %v2928_v30 = vmul.f32 0.5, %v2797_v20 }
 0x490   : > { %v3816_v12 = vadd.f32 1.0, %v5331_v35  ;;  %v3567_v2 = vmul.f32 0.7978846, %v3439_v23  ;;  %v5333_v4 = vpop.eup %5332 }
 0x491   : > { %5334 = vtanh.f32 %v3564_v16  ;;  %v3184_v63 = vmul.f32 %v3056_v62, %v2797_v20  ;;  %v3819_v24 = vadd.f32 1.0, %v5333_v4 }
 0x492   : > { %v3944_v59 = vmul.f32 %v3816_v12, %v2920_v17  ;;  %5336 = vtanh.f32 %v3567_v2 }
 0x493   : > { %v3312_v11 = vmul.f32 %v3184_v63, %v2797_v20  ;;  %v3947_v28 = vmul.f32 %v3819_v24, %v2923_v31 }
 0x494   : > { %v4081_v34 = vsel %vm8067_vm5, %v3944_v59, %v8707_v19 }
 0x495   : > { %v4149_v54 = vpack.c.bf16 %v4081_v34, %v4080_v3  ;;  %v3440_v7 = vadd.f32 %v3312_v11, %v2797_v20  ;;  %v4084_v19 = vsel %vm8063_vm4, %v3947_v28, %v8710_v26 }
 0x497   : > { %v5335_v27 = vpop.eup %5334  ;;  %4213 = vst [vmem:[%s5824_s18 + $0x1d8] sm:$0xff] %v4149_v54  ;;  %v3568_v48 = vmul.f32 0.7978846, %v3440_v7 }
 0x498   : > { %v3820_v13 = vadd.f32 1.0, %v5335_v27  ;;  %v5337_v14 = vpop.eup %5336 }
 0x499   : > { %5338 = vtanh.f32 %v3568_v48  ;;  %v3823_v45 = vadd.f32 1.0, %v5337_v14 }
 0x49a   : > { %v3948_v55 = vmul.f32 %v3820_v13, %v2924_v58 }
 0x49b   : > { %v3951_v38 = vmul.f32 %v3823_v45, %v2927_v40 }
 0x49c   : > { %v4085_v0 = vsel %vm8067_vm5, %v3948_v55, %v8729_v50 }
 0x49d   : > { %v4151_v6 = vpack.c.bf16 %v4085_v0, %v4084_v19  ;;  %v4088_v50 = vsel %vm8063_vm4, %v3951_v38, %v8733_v1 }
 0x49f   : > { %v5339_v49 = vpop.eup %5338  ;;  %4215 = vst [vmem:[%s5824_s18 + $0x1e8] sm:$0xff] %v4151_v6 }
 0x4a0   : > { %v3824_v26 = vadd.f32 1.0, %v5339_v49 }
 0x4a2   : > { %v3952_v15 = vmul.f32 %v3824_v26, %v2928_v30 }
 0x4a4   : > { %v4089_v10 = vsel %vm8067_vm5, %v3952_v15, %v2797_v20 }
 0x4a5   : > { %v4153_v33 = vpack.c.bf16 %v4089_v10, %v4088_v50 }
 0x4a7   : > { %4217 = vst [vmem:[%s5824_s18 + $0x1f8] sm:$0xff] %v4153_v33 }
 0x4a8   : > { %5548 = shalt.err (!%p5545_p0)
}
 0x4a9   : > { %s5625_s28 = smov 256   ;;  %s5626_s13 = smov 768  }
 0x4aa   : > { %s5627_s20 = smov 16  }
 0x4ab   : > { %4925 = dma.vmem_to_hbm [thread:$0]  (%p5715_p8), %s4235_s9, 8192, %s4237_s10, %s4219_s26, %s5625_s28, %s5626_s13, %s5627_s20  }
 0x4ac PF: > { %s9020_s14 = sld [smem:[#allocation22_spill]] }
 0x4ad   : > { %s9021_s15 = sld [smem:[#allocation20_spill]] }
 0x4b2   : > { %p4958_p1 = scmp.ge.s32.totalorder %s9020_s14, 2 }
 0x4b3   : > { %s4251_s21 = sand.u32 1, %s9021_s15  }
 0x4b4   : > { %p4948_p2 = pnand %p4958_p1, %p5719_p9  ;;  %s4252_s27 = scalar_lea.sflag [#allocation5], %s4251_s21 }
 0x4b6   : > { %p4949_p4 = pneg %p4948_p2 }
 0x4b8   : > { %5590 = dma.done.wait (%p4949_p4), %s4252_s27, 8192  }
 0x4b9   : > { %5592 = vsyncadd (%p4949_p4), %s4252_s27, 4294959104  ;;  %s27_s26 = sadd.s32 1, %s9020_s14   ;;  %s9023_s18 = sld [smem:[#allocation21_spill]] }
 0x4ba   : > { %p24_p6 = scmp.ge.s32.totalorder %s27_s26, 5   ;;  %s9024_s23 = sld [smem:[#allocation26_spill]] }
 0x4bb   : > { %s9025_s7 = sld [smem:[#allocation25_spill]]  ;;  %s9026_s21 = smov %s5599_s22 }
 0x4bc   : > { %s9028_s24 = smov %s5611_s25 }
 0x4bd   :  { %26 = sbr.rel (!%p24_p6) target bundleno = 13 (0xd), region = 131 }
 0x4bf   : > { %s9027_s22 = smov %s9023_s18 }
 0x4c1   : > { %s9029_s25 = smov %s9025_s7 }
 0x4c2   :  { %4258 = vsyncpa [#allocation4], 1 }
 0x4c3   :  { %4260 = vsyncpa [#allocation4 + $0x1], 1 }
 0x4c4   :  { %4261 = vsyncpa [#allocation7], 1 }
 0x4c5   :  { %4262 = vsyncpa [#allocation10], 1 }
 0x4c6   :  { %4264 = vsyncpa [#allocation10 + $0x1], 1 }
 0x4c7   :  { %4265 = vsyncpa [#allocation13], 1 }
 0x4c8   :  { %4267 = vsyncpa [#allocation13 + $0x1], 1 }
 0x4c9   :  { %4268 = vsyncpa [#allocation5], 1 }
 0x4ca   :  { %4270 = vsyncpa [#allocation5 + $0x1], 1 }

</bundles_post_ra>
